<compile_context>
chip_gen: v7x
topology: tpu7x:2x2x1
jax: 0.10.0
libtpu: 0.0.40
codegen_flags: <defaults>
</compile_context>

<pallas_src>
import functools

import jax
import jax.numpy as jnp
from jax.experimental import pallas as pl
from jax.experimental.pallas import tpu as pltpu

LEAK = 0.2
LATENT = 32
N_LAYERS = 11  # 5 encoder + fused/padded mean|logvar head + 5 decoder


def _round_up(n, m):
    return ((n + m - 1) // m) * m


def torch_layer_dims(seq_len):
    """(in, out) of every nn.Linear in the PyTorch module, in execution order."""
    enc = [(seq_len, 256), (256, 512), (512, 512), (512, 256), (256, 128)]
    heads = [(128, LATENT), (128, LATENT)]
    dec = [(LATENT, 128), (128, 256), (256, 512), (512, 256), (256, seq_len)]
    return enc + heads + dec  # 12 layers total


def kernel_layer_dims(seq_len):
    """(in, out) of the 11 fused/padded kernel layers."""
    seq_pad = _round_up(seq_len, 128)
    return [
        (seq_pad, 256), (256, 512), (512, 512), (512, 256), (256, 128),  # encoder
        (128, 128),                                                      # fused mean|logvar head (padded)
        (LATENT, 128), (128, 256), (256, 512), (512, 256), (256, seq_pad),  # decoder
    ]


def _lrelu(h):
    return jnp.where(h > 0, h, LEAK * h)


def vae_kernel(seq_len, *refs):
    """Fused forward pass with per-layer double-buffered weight streaming.

    refs: x_pad, eps, bias_flat, w0_hbm..w10_hbm, xhat_pad, ml, w_buf, sem
      - weights are bf16 (din, dout) HBM refs (exact padded kernel dims)
      - bias_flat is f32 (1, sum(dout)) with lane-aligned per-layer offsets
      - w_buf is a (2, 512, 512) bf16 VMEM double buffer, sem a 2-wide DMA sem
    """
    dims = kernel_layer_dims(seq_len)
    douts = [d for _, d in dims]
    boffs = [0]
    for d in douts[:-1]:
        boffs.append(boffs[-1] + d)

    x_ref, eps_ref, b_ref = refs[0], refs[1], refs[2]
    w_hbm = refs[3:3 + N_LAYERS]
    xhat_ref, ml_ref = refs[3 + N_LAYERS], refs[4 + N_LAYERS]
    w_buf, sem = refs[5 + N_LAYERS], refs[6 + N_LAYERS]

    def make_copy(i):
        din, dout = dims[i]
        slot = i & 1
        return pltpu.make_async_copy(
            w_hbm[i], w_buf.at[slot, :din, :dout], sem.at[slot])

    copies = [make_copy(i) for i in range(N_LAYERS)]
    copies[0].start()  # prime layer 0

    def layer(h, i):
        slot = i & 1
        # Prefetch layer i+1's weight into the other slot; it overlaps the MXU
        # work of layer i (the previous user of that slot has already computed).
        if i + 1 < N_LAYERS:
            copies[i + 1].start()
        copies[i].wait()
        din, dout = dims[i]
        w = w_buf[slot, :din, :dout]                    # static, tile-aligned slice
        b = b_ref[:, boffs[i]:boffs[i] + dout]          # lane-aligned static slice
        # bf16 MXU operands, f32 accumulation; bias add stays on the f32 VPU path.
        y = jnp.dot(h.astype(jnp.bfloat16), w, preferred_element_type=jnp.float32)
        return y + b

    # ---- encoder: 5 x (Linear + LeakyReLU(0.2)) ----
    h = x_ref[...]
    for i in range(5):
        h = _lrelu(layer(h, i))

    # ---- fused mean|logvar head: one (128, 128) dot; cols [0:32]=mean, [32:64]=logvar ----
    ml = layer(h, 5)
    ml_ref[...] = ml                                     # lane-dense (batch, 128) store
    mean = ml[:, :LATENT]
    log_var = ml[:, LATENT:2 * LATENT]

    # ---- reparameterization exactly as in the PyTorch module: z = mean + log_var * eps ----
    z = mean + log_var * eps_ref[...]

    # ---- decoder: 4 x (Linear + LeakyReLU) + final Linear (no activation) ----
    h = z
    for i in range(6, 10):
        h = _lrelu(layer(h, i))
    xhat_ref[...] = layer(h, 10)


def init_params(key, seq_len, dtype=jnp.float32):
    """Deterministic synthetic parameters: weights (in, out), biases (1, out), f32."""
    params = []
    for (din, dout) in torch_layer_dims(seq_len):
        key, kw, kb = jax.random.split(key, 3)
        scale = 1.0 / jnp.sqrt(jnp.asarray(din, dtype))
        w = jax.random.uniform(kw, (din, dout), dtype, -scale, scale)
        b = jax.random.uniform(kb, (1, dout), dtype, -scale, scale)
        params.append((w, b))
    return params


def prepare_params(params, seq_len):
    """Kernel-side prep: bf16 weights (fused head, padded seq dims) + one flat f32 bias."""
    seq_pad = _round_up(seq_len, 128)
    dims = kernel_layer_dims(seq_len)

    kparams = []
    # encoder layer 0: zero-pad the (seq_len, 256) weight rows to (seq_pad, 256)
    w0, b0 = params[0]
    w0p = jnp.zeros((seq_pad, w0.shape[1]), w0.dtype).at[:seq_len].set(w0)
    kparams.append((w0p, b0))
    # encoder layers 1..4 unchanged
    kparams.extend(params[1:5])
    # fused mean|logvar head padded to 128 output lanes (zero cols 64:128)
    wm, bm = params[5]
    wv, bv = params[6]
    wh = (jnp.zeros((128, 128), wm.dtype)
          .at[:, :LATENT].set(wm).at[:, LATENT:2 * LATENT].set(wv))
    bh = (jnp.zeros((1, 128), bm.dtype)
          .at[:, :LATENT].set(bm).at[:, LATENT:2 * LATENT].set(bv))
    kparams.append((wh, bh))
    # decoder layers 7..10 unchanged
    kparams.extend(params[7:11])
    # final decoder layer: zero-pad (256, seq_len) cols and bias to seq_pad
    wl, bl = params[11]
    wlp = jnp.zeros((wl.shape[0], seq_pad), wl.dtype).at[:, :seq_len].set(wl)
    blp = jnp.zeros((1, seq_pad), bl.dtype).at[:, :seq_len].set(bl)
    kparams.append((wlp, blp))

    assert [(w.shape[0], w.shape[1]) for w, _ in kparams] == dims

    # weights as bf16 HBM slabs (halves weight-streaming bytes, MXU-native);
    # all biases concatenated into one f32 (1, 3328) array -> a single bulk DMA.
    weights = tuple(w.astype(jnp.bfloat16) for w, _ in kparams)
    bias_flat = jnp.concatenate([b.astype(jnp.float32) for _, b in kparams], axis=1)
    return bias_flat, weights


@functools.partial(jax.jit, static_argnames=("seq_len",))
def vae_forward(x, eps, bias_flat, weights, seq_len):
    batch = x.shape[0]
    seq_pad = _round_up(seq_len, 128)
    x_pad = jnp.zeros((batch, seq_pad), jnp.float32).at[:, :seq_len].set(x)

    vmem = pl.BlockSpec(memory_space=pltpu.MemorySpace.VMEM)
    hbm = pl.BlockSpec(memory_space=pl.ANY)   # weights stay in HBM; kernel DMAs them
    dims = kernel_layer_dims(seq_len)

    # Advisory cost hint: dominated by ~2.1 MB of bf16 weight traffic.
    flops = 2 * batch * sum(din * dout for din, dout in dims)
    weight_bytes = sum(din * dout * 2 for din, dout in dims)
    io_bytes = (weight_bytes
                + int(bias_flat.size) * 4 + int(x_pad.size) * 4 + int(eps.size) * 4
                + batch * seq_pad * 4 + batch * 128 * 4)

    xhat_pad, ml = pl.pallas_call(
        functools.partial(vae_kernel, seq_len),
        out_shape=(
            jax.ShapeDtypeStruct((batch, seq_pad), jnp.float32),  # x_hat (padded)
            jax.ShapeDtypeStruct((batch, 128), jnp.float32),      # mean | log_var | 0
        ),
        in_specs=[vmem, vmem, vmem] + [hbm] * N_LAYERS,
        out_specs=(vmem, vmem),
        scratch_shapes=[
            pltpu.VMEM((2, 512, 512), jnp.bfloat16),   # double-buffered weight slab (1 MiB)
            pltpu.SemaphoreType.DMA((2,)),
        ],
        compiler_params=pltpu.CompilerParams(
            vmem_limit_bytes=32 * 1024 * 1024),        # safe on v7x's 64 MiB physical VMEM
        cost_estimate=pl.CostEstimate(
            flops=flops, transcendentals=0, bytes_accessed=io_bytes),
    )(x_pad, eps, bias_flat, *weights)

    x_hat = xhat_pad[:, :seq_len]
    mean = ml[:, :LATENT]
    log_var = ml[:, LATENT:2 * LATENT]
    return x_hat, mean, log_var


def reference_forward(x, eps, params):
    """Pure-JAX reference mirroring the PyTorch module, with the same
    bf16-operand / f32-accumulation matmul configuration as the kernel."""
    def linear(h, w, b):
        return jnp.dot(h.astype(jnp.bfloat16), w.astype(jnp.bfloat16),
                       preferred_element_type=jnp.float32) + b

    h = x
    for i in range(5):
        w, b = params[i]
        h = _lrelu(linear(h, w, b))
    mean = linear(h, *params[5])
    log_var = linear(h, *params[6])
    z = mean + log_var * eps
    h = z
    for i in range(7, 11):
        w, b = params[i]
        h = _lrelu(linear(h, w, b))
    x_hat = linear(h, *params[11])
    return x_hat, mean, log_var


if __name__ == "__main__":
    seq_len = 300   # module default (padded to 384 lanes inside the wrapper)
    batch = 8

    key = jax.random.PRNGKey(0)
    key, kx, keps, kp = jax.random.split(key, 4)

    x = jax.random.normal(kx, (batch, seq_len), jnp.float32)
    eps = jax.random.normal(keps, (batch, LATENT), jnp.float32)  # torch.randn_like(log_var)
    params = init_params(kp, seq_len)
    bias_flat, weights = prepare_params(params, seq_len)

    x_hat, mean, log_var = vae_forward(x, eps, bias_flat, weights, seq_len=seq_len)
    jax.block_until_ready((x_hat, mean, log_var))

    # sanity check against pure-JAX reference (same bf16/f32 numerics)
    r_xhat, r_mean, r_logvar = reference_forward(x, eps, params)
    assert jnp.allclose(mean, r_mean, atol=2e-2, rtol=2e-2)
    assert jnp.allclose(log_var, r_logvar, atol=2e-2, rtol=2e-2)
    assert jnp.allclose(x_hat, r_xhat, atol=2e-2, rtol=2e-2)

    print("KERNEL_OK")
</pallas_src>

<mosaic_0001>
module attributes {stable_mosaic.version = 11 : i64} {
  func.func @vae_kernel(%arg0: memref<8x384xf32, #tpu.memory_space<vmem>>, %arg1: memref<8x32xf32, #tpu.memory_space<vmem>>, %arg2: memref<1x3328xf32, #tpu.memory_space<vmem>>, %arg3: memref<384x256xbf16, #tpu.memory_space<any>>, %arg4: memref<256x512xbf16, #tpu.memory_space<any>>, %arg5: memref<512x512xbf16, #tpu.memory_space<any>>, %arg6: memref<512x256xbf16, #tpu.memory_space<any>>, %arg7: memref<256x128xbf16, #tpu.memory_space<any>>, %arg8: memref<128x128xbf16, #tpu.memory_space<any>>, %arg9: memref<32x128xbf16, #tpu.memory_space<any>>, %arg10: memref<128x256xbf16, #tpu.memory_space<any>>, %arg11: memref<256x512xbf16, #tpu.memory_space<any>>, %arg12: memref<512x256xbf16, #tpu.memory_space<any>>, %arg13: memref<256x384xbf16, #tpu.memory_space<any>>, %arg14: memref<8x384xf32, #tpu.memory_space<vmem>>, %arg15: memref<8x128xf32, #tpu.memory_space<vmem>>, %arg16: memref<2x512x512xbf16, #tpu.memory_space<vmem>>, %arg17: memref<2x!tpu.dma_semaphore, #tpu.memory_space<semaphore_mem>>) attributes {dimension_semantics = [], scalar_prefetch = 0 : i64, scratch_operands = 2 : i64, tpu.core_type = #tpu.core_type<tc>} {
    %c0_i32 = arith.constant 0 : i32
    %c0_i32_0 = arith.constant 0 : i32
    %c0_i32_1 = arith.constant 0 : i32
    %c0_i32_2 = arith.constant 0 : i32
    %0 = tpu.memref_slice %arg16[%c0_i32, %c0_i32_1, %c0_i32_2] : memref<2x512x512xbf16, #tpu.memory_space<vmem>> -> memref<1x384x256xbf16, #tpu.memory_space<vmem>>
    %1 = tpu.memref_squeeze %0 : memref<1x384x256xbf16, #tpu.memory_space<vmem>> -> memref<384x256xbf16, #tpu.memory_space<vmem>>
    %2 = tpu.memref_slice %arg17[%c0_i32_0] : memref<2x!tpu.dma_semaphore, #tpu.memory_space<semaphore_mem>> -> memref<1x!tpu.dma_semaphore, #tpu.memory_space<semaphore_mem>>
    %3 = tpu.memref_squeeze %2 : memref<1x!tpu.dma_semaphore, #tpu.memory_space<semaphore_mem>> -> memref<!tpu.dma_semaphore, #tpu.memory_space<semaphore_mem>>
    tpu.enqueue_dma source(%arg3 : memref<384x256xbf16, #tpu.memory_space<any>>) target(%1 : memref<384x256xbf16, #tpu.memory_space<vmem>>) target_semaphore(%3 : memref<!tpu.dma_semaphore, #tpu.memory_space<semaphore_mem>>)
    %c0 = arith.constant 0 : index
    %c0_3 = arith.constant 0 : index
    %4 = vector.load %arg0[%c0, %c0_3] : memref<8x384xf32, #tpu.memory_space<vmem>>, vector<8x384xf32>
    %c1_i32 = arith.constant 1 : i32
    %c1_i32_4 = arith.constant 1 : i32
    %c0_i32_5 = arith.constant 0 : i32
    %c0_i32_6 = arith.constant 0 : i32
    %5 = tpu.memref_slice %arg16[%c1_i32, %c0_i32_5, %c0_i32_6] : memref<2x512x512xbf16, #tpu.memory_space<vmem>> -> memref<1x256x512xbf16, #tpu.memory_space<vmem>>
    %6 = tpu.memref_squeeze %5 : memref<1x256x512xbf16, #tpu.memory_space<vmem>> -> memref<256x512xbf16, #tpu.memory_space<vmem>>
    %7 = tpu.memref_slice %arg17[%c1_i32_4] : memref<2x!tpu.dma_semaphore, #tpu.memory_space<semaphore_mem>> -> memref<1x!tpu.dma_semaphore, #tpu.memory_space<semaphore_mem>>
    %8 = tpu.memref_squeeze %7 : memref<1x!tpu.dma_semaphore, #tpu.memory_space<semaphore_mem>> -> memref<!tpu.dma_semaphore, #tpu.memory_space<semaphore_mem>>
    tpu.enqueue_dma source(%arg4 : memref<256x512xbf16, #tpu.memory_space<any>>) target(%6 : memref<256x512xbf16, #tpu.memory_space<vmem>>) target_semaphore(%8 : memref<!tpu.dma_semaphore, #tpu.memory_space<semaphore_mem>>)
    %c0_i32_7 = arith.constant 0 : i32
    %c0_i32_8 = arith.constant 0 : i32
    %c0_i32_9 = arith.constant 0 : i32
    %c0_i32_10 = arith.constant 0 : i32
    %9 = tpu.memref_slice %arg16[%c0_i32_7, %c0_i32_9, %c0_i32_10] : memref<2x512x512xbf16, #tpu.memory_space<vmem>> -> memref<1x384x256xbf16, #tpu.memory_space<vmem>>
    %10 = tpu.memref_squeeze %9 : memref<1x384x256xbf16, #tpu.memory_space<vmem>> -> memref<384x256xbf16, #tpu.memory_space<vmem>>
    %11 = tpu.memref_slice %arg17[%c0_i32_8] : memref<2x!tpu.dma_semaphore, #tpu.memory_space<semaphore_mem>> -> memref<1x!tpu.dma_semaphore, #tpu.memory_space<semaphore_mem>>
    %12 = tpu.memref_squeeze %11 : memref<1x!tpu.dma_semaphore, #tpu.memory_space<semaphore_mem>> -> memref<!tpu.dma_semaphore, #tpu.memory_space<semaphore_mem>>
    tpu.wait_dma2 semaphore(%12 : memref<!tpu.dma_semaphore, #tpu.memory_space<semaphore_mem>>) src(%arg3 : memref<384x256xbf16, #tpu.memory_space<any>>) dst(%10 : memref<384x256xbf16, #tpu.memory_space<vmem>>)
    %c0_11 = arith.constant 0 : index
    %c0_12 = arith.constant 0 : index
    %c0_13 = arith.constant 0 : index
    %13 = vector.load %arg16[%c0_11, %c0_12, %c0_13] : memref<2x512x512xbf16, #tpu.memory_space<vmem>>, vector<1x384x256xbf16>
    %14 = vector.shape_cast %13 : vector<1x384x256xbf16> to vector<384x256xbf16>
    %c0_14 = arith.constant 0 : index
    %c0_15 = arith.constant 0 : index
    %15 = vector.load %arg2[%c0_14, %c0_15] : memref<1x3328xf32, #tpu.memory_space<vmem>>, vector<1x256xf32>
    %16 = arith.truncf %4 : vector<8x384xf32> to vector<8x384xbf16>
    %cst = arith.constant dense<0.000000e+00> : vector<8x256xf32>
    %17 = tpu.matmul %16, %14, %cst {dimension_numbers = #tpu.dot_dimension_numbers<[1], [0], [0], [1], [0, 0, 1, 1], [], []>} : vector<8x384xbf16>, vector<384x256xbf16>, vector<8x256xf32> -> vector<8x256xf32>
    %18 = vector.broadcast %15 : vector<1x256xf32> to vector<8x256xf32>
    %19 = arith.addf %17, %18 : vector<8x256xf32>
    %cst_16 = arith.constant 0.000000e+00 : f32
    %20 = vector.broadcast %cst_16 : f32 to vector<8x256xf32>
    %21 = arith.cmpf ogt, %19, %20 : vector<8x256xf32>
    %cst_17 = arith.constant 2.000000e-01 : f32
    %22 = vector.broadcast %cst_17 : f32 to vector<8x256xf32>
    %23 = arith.mulf %22, %19 : vector<8x256xf32>
    %24 = arith.select %21, %19, %23 : vector<8x256xi1>, vector<8x256xf32>
    %c0_i32_18 = arith.constant 0 : i32
    %c0_i32_19 = arith.constant 0 : i32
    %c0_i32_20 = arith.constant 0 : i32
    %c0_i32_21 = arith.constant 0 : i32
    %25 = tpu.memref_slice %arg16[%c0_i32_18, %c0_i32_20, %c0_i32_21] : memref<2x512x512xbf16, #tpu.memory_space<vmem>> -> memref<1x512x512xbf16, #tpu.memory_space<vmem>>
    %26 = tpu.memref_squeeze %25 : memref<1x512x512xbf16, #tpu.memory_space<vmem>> -> memref<512x512xbf16, #tpu.memory_space<vmem>>
    %27 = tpu.memref_slice %arg17[%c0_i32_19] : memref<2x!tpu.dma_semaphore, #tpu.memory_space<semaphore_mem>> -> memref<1x!tpu.dma_semaphore, #tpu.memory_space<semaphore_mem>>
    %28 = tpu.memref_squeeze %27 : memref<1x!tpu.dma_semaphore, #tpu.memory_space<semaphore_mem>> -> memref<!tpu.dma_semaphore, #tpu.memory_space<semaphore_mem>>
    tpu.enqueue_dma source(%arg5 : memref<512x512xbf16, #tpu.memory_space<any>>) target(%26 : memref<512x512xbf16, #tpu.memory_space<vmem>>) target_semaphore(%28 : memref<!tpu.dma_semaphore, #tpu.memory_space<semaphore_mem>>)
    %c1_i32_22 = arith.constant 1 : i32
    %c1_i32_23 = arith.constant 1 : i32
    %c0_i32_24 = arith.constant 0 : i32
    %c0_i32_25 = arith.constant 0 : i32
    %29 = tpu.memref_slice %arg16[%c1_i32_22, %c0_i32_24, %c0_i32_25] : memref<2x512x512xbf16, #tpu.memory_space<vmem>> -> memref<1x256x512xbf16, #tpu.memory_space<vmem>>
    %30 = tpu.memref_squeeze %29 : memref<1x256x512xbf16, #tpu.memory_space<vmem>> -> memref<256x512xbf16, #tpu.memory_space<vmem>>
    %31 = tpu.memref_slice %arg17[%c1_i32_23] : memref<2x!tpu.dma_semaphore, #tpu.memory_space<semaphore_mem>> -> memref<1x!tpu.dma_semaphore, #tpu.memory_space<semaphore_mem>>
    %32 = tpu.memref_squeeze %31 : memref<1x!tpu.dma_semaphore, #tpu.memory_space<semaphore_mem>> -> memref<!tpu.dma_semaphore, #tpu.memory_space<semaphore_mem>>
    tpu.wait_dma2 semaphore(%32 : memref<!tpu.dma_semaphore, #tpu.memory_space<semaphore_mem>>) src(%arg4 : memref<256x512xbf16, #tpu.memory_space<any>>) dst(%30 : memref<256x512xbf16, #tpu.memory_space<vmem>>)
    %c1 = arith.constant 1 : index
    %c0_26 = arith.constant 0 : index
    %c0_27 = arith.constant 0 : index
    %33 = vector.load %arg16[%c1, %c0_26, %c0_27] : memref<2x512x512xbf16, #tpu.memory_space<vmem>>, vector<1x256x512xbf16>
    %34 = vector.shape_cast %33 : vector<1x256x512xbf16> to vector<256x512xbf16>
    %c0_28 = arith.constant 0 : index
    %c256 = arith.constant 256 : index
    %35 = vector.load %arg2[%c0_28, %c256] : memref<1x3328xf32, #tpu.memory_space<vmem>>, vector<1x512xf32>
    %36 = arith.truncf %24 : vector<8x256xf32> to vector<8x256xbf16>
    %cst_29 = arith.constant dense<0.000000e+00> : vector<8x512xf32>
    %37 = tpu.matmul %36, %34, %cst_29 {dimension_numbers = #tpu.dot_dimension_numbers<[1], [0], [0], [1], [0, 0, 1, 1], [], []>} : vector<8x256xbf16>, vector<256x512xbf16>, vector<8x512xf32> -> vector<8x512xf32>
    %38 = vector.broadcast %35 : vector<1x512xf32> to vector<8x512xf32>
    %39 = arith.addf %37, %38 : vector<8x512xf32>
    %cst_30 = arith.constant 0.000000e+00 : f32
    %40 = vector.broadcast %cst_30 : f32 to vector<8x512xf32>
    %41 = arith.cmpf ogt, %39, %40 : vector<8x512xf32>
    %cst_31 = arith.constant 2.000000e-01 : f32
    %42 = vector.broadcast %cst_31 : f32 to vector<8x512xf32>
    %43 = arith.mulf %42, %39 : vector<8x512xf32>
    %44 = arith.select %41, %39, %43 : vector<8x512xi1>, vector<8x512xf32>
    %c1_i32_32 = arith.constant 1 : i32
    %c1_i32_33 = arith.constant 1 : i32
    %c0_i32_34 = arith.constant 0 : i32
    %c0_i32_35 = arith.constant 0 : i32
    %45 = tpu.memref_slice %arg16[%c1_i32_32, %c0_i32_34, %c0_i32_35] : memref<2x512x512xbf16, #tpu.memory_space<vmem>> -> memref<1x512x256xbf16, #tpu.memory_space<vmem>>
    %46 = tpu.memref_squeeze %45 : memref<1x512x256xbf16, #tpu.memory_space<vmem>> -> memref<512x256xbf16, #tpu.memory_space<vmem>>
    %47 = tpu.memref_slice %arg17[%c1_i32_33] : memref<2x!tpu.dma_semaphore, #tpu.memory_space<semaphore_mem>> -> memref<1x!tpu.dma_semaphore, #tpu.memory_space<semaphore_mem>>
    %48 = tpu.memref_squeeze %47 : memref<1x!tpu.dma_semaphore, #tpu.memory_space<semaphore_mem>> -> memref<!tpu.dma_semaphore, #tpu.memory_space<semaphore_mem>>
    tpu.enqueue_dma source(%arg6 : memref<512x256xbf16, #tpu.memory_space<any>>) target(%46 : memref<512x256xbf16, #tpu.memory_space<vmem>>) target_semaphore(%48 : memref<!tpu.dma_semaphore, #tpu.memory_space<semaphore_mem>>)
    %c0_i32_36 = arith.constant 0 : i32
    %c0_i32_37 = arith.constant 0 : i32
    %c0_i32_38 = arith.constant 0 : i32
    %c0_i32_39 = arith.constant 0 : i32
    %49 = tpu.memref_slice %arg16[%c0_i32_36, %c0_i32_38, %c0_i32_39] : memref<2x512x512xbf16, #tpu.memory_space<vmem>> -> memref<1x512x512xbf16, #tpu.memory_space<vmem>>
    %50 = tpu.memref_squeeze %49 : memref<1x512x512xbf16, #tpu.memory_space<vmem>> -> memref<512x512xbf16, #tpu.memory_space<vmem>>
    %51 = tpu.memref_slice %arg17[%c0_i32_37] : memref<2x!tpu.dma_semaphore, #tpu.memory_space<semaphore_mem>> -> memref<1x!tpu.dma_semaphore, #tpu.memory_space<semaphore_mem>>
    %52 = tpu.memref_squeeze %51 : memref<1x!tpu.dma_semaphore, #tpu.memory_space<semaphore_mem>> -> memref<!tpu.dma_semaphore, #tpu.memory_space<semaphore_mem>>
    tpu.wait_dma2 semaphore(%52 : memref<!tpu.dma_semaphore, #tpu.memory_space<semaphore_mem>>) src(%arg5 : memref<512x512xbf16, #tpu.memory_space<any>>) dst(%50 : memref<512x512xbf16, #tpu.memory_space<vmem>>)
    %c0_40 = arith.constant 0 : index
    %c0_41 = arith.constant 0 : index
    %c0_42 = arith.constant 0 : index
    %53 = vector.load %arg16[%c0_40, %c0_41, %c0_42] : memref<2x512x512xbf16, #tpu.memory_space<vmem>>, vector<1x512x512xbf16>
    %54 = vector.shape_cast %53 : vector<1x512x512xbf16> to vector<512x512xbf16>
    %c0_43 = arith.constant 0 : index
    %c768 = arith.constant 768 : index
    %55 = vector.load %arg2[%c0_43, %c768] : memref<1x3328xf32, #tpu.memory_space<vmem>>, vector<1x512xf32>
    %56 = arith.truncf %44 : vector<8x512xf32> to vector<8x512xbf16>
    %cst_44 = arith.constant dense<0.000000e+00> : vector<8x512xf32>
    %57 = tpu.matmul %56, %54, %cst_44 {dimension_numbers = #tpu.dot_dimension_numbers<[1], [0], [0], [1], [0, 0, 1, 1], [], []>} : vector<8x512xbf16>, vector<512x512xbf16>, vector<8x512xf32> -> vector<8x512xf32>
    %58 = vector.broadcast %55 : vector<1x512xf32> to vector<8x512xf32>
    %59 = arith.addf %57, %58 : vector<8x512xf32>
    %cst_45 = arith.constant 0.000000e+00 : f32
    %60 = vector.broadcast %cst_45 : f32 to vector<8x512xf32>
    %61 = arith.cmpf ogt, %59, %60 : vector<8x512xf32>
    %cst_46 = arith.constant 2.000000e-01 : f32
    %62 = vector.broadcast %cst_46 : f32 to vector<8x512xf32>
    %63 = arith.mulf %62, %59 : vector<8x512xf32>
    %64 = arith.select %61, %59, %63 : vector<8x512xi1>, vector<8x512xf32>
    %c0_i32_47 = arith.constant 0 : i32
    %c0_i32_48 = arith.constant 0 : i32
    %c0_i32_49 = arith.constant 0 : i32
    %c0_i32_50 = arith.constant 0 : i32
    %65 = tpu.memref_slice %arg16[%c0_i32_47, %c0_i32_49, %c0_i32_50] : memref<2x512x512xbf16, #tpu.memory_space<vmem>> -> memref<1x256x128xbf16, #tpu.memory_space<vmem>>
    %66 = tpu.memref_squeeze %65 : memref<1x256x128xbf16, #tpu.memory_space<vmem>> -> memref<256x128xbf16, #tpu.memory_space<vmem>>
    %67 = tpu.memref_slice %arg17[%c0_i32_48] : memref<2x!tpu.dma_semaphore, #tpu.memory_space<semaphore_mem>> -> memref<1x!tpu.dma_semaphore, #tpu.memory_space<semaphore_mem>>
    %68 = tpu.memref_squeeze %67 : memref<1x!tpu.dma_semaphore, #tpu.memory_space<semaphore_mem>> -> memref<!tpu.dma_semaphore, #tpu.memory_space<semaphore_mem>>
    tpu.enqueue_dma source(%arg7 : memref<256x128xbf16, #tpu.memory_space<any>>) target(%66 : memref<256x128xbf16, #tpu.memory_space<vmem>>) target_semaphore(%68 : memref<!tpu.dma_semaphore, #tpu.memory_space<semaphore_mem>>)
    %c1_i32_51 = arith.constant 1 : i32
    %c1_i32_52 = arith.constant 1 : i32
    %c0_i32_53 = arith.constant 0 : i32
    %c0_i32_54 = arith.constant 0 : i32
    %69 = tpu.memref_slice %arg16[%c1_i32_51, %c0_i32_53, %c0_i32_54] : memref<2x512x512xbf16, #tpu.memory_space<vmem>> -> memref<1x512x256xbf16, #tpu.memory_space<vmem>>
    %70 = tpu.memref_squeeze %69 : memref<1x512x256xbf16, #tpu.memory_space<vmem>> -> memref<512x256xbf16, #tpu.memory_space<vmem>>
    %71 = tpu.memref_slice %arg17[%c1_i32_52] : memref<2x!tpu.dma_semaphore, #tpu.memory_space<semaphore_mem>> -> memref<1x!tpu.dma_semaphore, #tpu.memory_space<semaphore_mem>>
    %72 = tpu.memref_squeeze %71 : memref<1x!tpu.dma_semaphore, #tpu.memory_space<semaphore_mem>> -> memref<!tpu.dma_semaphore, #tpu.memory_space<semaphore_mem>>
    tpu.wait_dma2 semaphore(%72 : memref<!tpu.dma_semaphore, #tpu.memory_space<semaphore_mem>>) src(%arg6 : memref<512x256xbf16, #tpu.memory_space<any>>) dst(%70 : memref<512x256xbf16, #tpu.memory_space<vmem>>)
    %c1_55 = arith.constant 1 : index
    %c0_56 = arith.constant 0 : index
    %c0_57 = arith.constant 0 : index
    %73 = vector.load %arg16[%c1_55, %c0_56, %c0_57] : memref<2x512x512xbf16, #tpu.memory_space<vmem>>, vector<1x512x256xbf16>
    %74 = vector.shape_cast %73 : vector<1x512x256xbf16> to vector<512x256xbf16>
    %c0_58 = arith.constant 0 : index
    %c1280 = arith.constant 1280 : index
    %75 = vector.load %arg2[%c0_58, %c1280] : memref<1x3328xf32, #tpu.memory_space<vmem>>, vector<1x256xf32>
    %76 = arith.truncf %64 : vector<8x512xf32> to vector<8x512xbf16>
    %cst_59 = arith.constant dense<0.000000e+00> : vector<8x256xf32>
    %77 = tpu.matmul %76, %74, %cst_59 {dimension_numbers = #tpu.dot_dimension_numbers<[1], [0], [0], [1], [0, 0, 1, 1], [], []>} : vector<8x512xbf16>, vector<512x256xbf16>, vector<8x256xf32> -> vector<8x256xf32>
    %78 = vector.broadcast %75 : vector<1x256xf32> to vector<8x256xf32>
    %79 = arith.addf %77, %78 : vector<8x256xf32>
    %cst_60 = arith.constant 0.000000e+00 : f32
    %80 = vector.broadcast %cst_60 : f32 to vector<8x256xf32>
    %81 = arith.cmpf ogt, %79, %80 : vector<8x256xf32>
    %cst_61 = arith.constant 2.000000e-01 : f32
    %82 = vector.broadcast %cst_61 : f32 to vector<8x256xf32>
    %83 = arith.mulf %82, %79 : vector<8x256xf32>
    %84 = arith.select %81, %79, %83 : vector<8x256xi1>, vector<8x256xf32>
    %c1_i32_62 = arith.constant 1 : i32
    %c1_i32_63 = arith.constant 1 : i32
    %c0_i32_64 = arith.constant 0 : i32
    %c0_i32_65 = arith.constant 0 : i32
    %85 = tpu.memref_slice %arg16[%c1_i32_62, %c0_i32_64, %c0_i32_65] : memref<2x512x512xbf16, #tpu.memory_space<vmem>> -> memref<1x128x128xbf16, #tpu.memory_space<vmem>>
    %86 = tpu.memref_squeeze %85 : memref<1x128x128xbf16, #tpu.memory_space<vmem>> -> memref<128x128xbf16, #tpu.memory_space<vmem>>
    %87 = tpu.memref_slice %arg17[%c1_i32_63] : memref<2x!tpu.dma_semaphore, #tpu.memory_space<semaphore_mem>> -> memref<1x!tpu.dma_semaphore, #tpu.memory_space<semaphore_mem>>
    %88 = tpu.memref_squeeze %87 : memref<1x!tpu.dma_semaphore, #tpu.memory_space<semaphore_mem>> -> memref<!tpu.dma_semaphore, #tpu.memory_space<semaphore_mem>>
    tpu.enqueue_dma source(%arg8 : memref<128x128xbf16, #tpu.memory_space<any>>) target(%86 : memref<128x128xbf16, #tpu.memory_space<vmem>>) target_semaphore(%88 : memref<!tpu.dma_semaphore, #tpu.memory_space<semaphore_mem>>)
    %c0_i32_66 = arith.constant 0 : i32
    %c0_i32_67 = arith.constant 0 : i32
    %c0_i32_68 = arith.constant 0 : i32
    %c0_i32_69 = arith.constant 0 : i32
    %89 = tpu.memref_slice %arg16[%c0_i32_66, %c0_i32_68, %c0_i32_69] : memref<2x512x512xbf16, #tpu.memory_space<vmem>> -> memref<1x256x128xbf16, #tpu.memory_space<vmem>>
    %90 = tpu.memref_squeeze %89 : memref<1x256x128xbf16, #tpu.memory_space<vmem>> -> memref<256x128xbf16, #tpu.memory_space<vmem>>
    %91 = tpu.memref_slice %arg17[%c0_i32_67] : memref<2x!tpu.dma_semaphore, #tpu.memory_space<semaphore_mem>> -> memref<1x!tpu.dma_semaphore, #tpu.memory_space<semaphore_mem>>
    %92 = tpu.memref_squeeze %91 : memref<1x!tpu.dma_semaphore, #tpu.memory_space<semaphore_mem>> -> memref<!tpu.dma_semaphore, #tpu.memory_space<semaphore_mem>>
    tpu.wait_dma2 semaphore(%92 : memref<!tpu.dma_semaphore, #tpu.memory_space<semaphore_mem>>) src(%arg7 : memref<256x128xbf16, #tpu.memory_space<any>>) dst(%90 : memref<256x128xbf16, #tpu.memory_space<vmem>>)
    %c0_70 = arith.constant 0 : index
    %c0_71 = arith.constant 0 : index
    %c0_72 = arith.constant 0 : index
    %93 = vector.load %arg16[%c0_70, %c0_71, %c0_72] : memref<2x512x512xbf16, #tpu.memory_space<vmem>>, vector<1x256x128xbf16>
    %94 = vector.shape_cast %93 : vector<1x256x128xbf16> to vector<256x128xbf16>
    %c0_73 = arith.constant 0 : index
    %c1536 = arith.constant 1536 : index
    %95 = vector.load %arg2[%c0_73, %c1536] : memref<1x3328xf32, #tpu.memory_space<vmem>>, vector<1x128xf32>
    %96 = arith.truncf %84 : vector<8x256xf32> to vector<8x256xbf16>
    %cst_74 = arith.constant dense<0.000000e+00> : vector<8x128xf32>
    %97 = tpu.matmul %96, %94, %cst_74 {dimension_numbers = #tpu.dot_dimension_numbers<[1], [0], [0], [1], [0, 0, 1, 1], [], []>} : vector<8x256xbf16>, vector<256x128xbf16>, vector<8x128xf32> -> vector<8x128xf32>
    %98 = vector.broadcast %95 : vector<1x128xf32> to vector<8x128xf32>
    %99 = arith.addf %97, %98 : vector<8x128xf32>
    %cst_75 = arith.constant 0.000000e+00 : f32
    %100 = vector.broadcast %cst_75 : f32 to vector<8x128xf32>
    %101 = arith.cmpf ogt, %99, %100 : vector<8x128xf32>
    %cst_76 = arith.constant 2.000000e-01 : f32
    %102 = vector.broadcast %cst_76 : f32 to vector<8x128xf32>
    %103 = arith.mulf %102, %99 : vector<8x128xf32>
    %104 = arith.select %101, %99, %103 : vector<8x128xi1>, vector<8x128xf32>
    %c0_i32_77 = arith.constant 0 : i32
    %c0_i32_78 = arith.constant 0 : i32
    %c0_i32_79 = arith.constant 0 : i32
    %c0_i32_80 = arith.constant 0 : i32
    %105 = tpu.memref_slice %arg16[%c0_i32_77, %c0_i32_79, %c0_i32_80] : memref<2x512x512xbf16, #tpu.memory_space<vmem>> -> memref<1x32x128xbf16, #tpu.memory_space<vmem>>
    %106 = tpu.memref_squeeze %105 : memref<1x32x128xbf16, #tpu.memory_space<vmem>> -> memref<32x128xbf16, #tpu.memory_space<vmem>>
    %107 = tpu.memref_slice %arg17[%c0_i32_78] : memref<2x!tpu.dma_semaphore, #tpu.memory_space<semaphore_mem>> -> memref<1x!tpu.dma_semaphore, #tpu.memory_space<semaphore_mem>>
    %108 = tpu.memref_squeeze %107 : memref<1x!tpu.dma_semaphore, #tpu.memory_space<semaphore_mem>> -> memref<!tpu.dma_semaphore, #tpu.memory_space<semaphore_mem>>
    tpu.enqueue_dma source(%arg9 : memref<32x128xbf16, #tpu.memory_space<any>>) target(%106 : memref<32x128xbf16, #tpu.memory_space<vmem>>) target_semaphore(%108 : memref<!tpu.dma_semaphore, #tpu.memory_space<semaphore_mem>>)
    %c1_i32_81 = arith.constant 1 : i32
    %c1_i32_82 = arith.constant 1 : i32
    %c0_i32_83 = arith.constant 0 : i32
    %c0_i32_84 = arith.constant 0 : i32
    %109 = tpu.memref_slice %arg16[%c1_i32_81, %c0_i32_83, %c0_i32_84] : memref<2x512x512xbf16, #tpu.memory_space<vmem>> -> memref<1x128x128xbf16, #tpu.memory_space<vmem>>
    %110 = tpu.memref_squeeze %109 : memref<1x128x128xbf16, #tpu.memory_space<vmem>> -> memref<128x128xbf16, #tpu.memory_space<vmem>>
    %111 = tpu.memref_slice %arg17[%c1_i32_82] : memref<2x!tpu.dma_semaphore, #tpu.memory_space<semaphore_mem>> -> memref<1x!tpu.dma_semaphore, #tpu.memory_space<semaphore_mem>>
    %112 = tpu.memref_squeeze %111 : memref<1x!tpu.dma_semaphore, #tpu.memory_space<semaphore_mem>> -> memref<!tpu.dma_semaphore, #tpu.memory_space<semaphore_mem>>
    tpu.wait_dma2 semaphore(%112 : memref<!tpu.dma_semaphore, #tpu.memory_space<semaphore_mem>>) src(%arg8 : memref<128x128xbf16, #tpu.memory_space<any>>) dst(%110 : memref<128x128xbf16, #tpu.memory_space<vmem>>)
    %c1_85 = arith.constant 1 : index
    %c0_86 = arith.constant 0 : index
    %c0_87 = arith.constant 0 : index
    %113 = vector.load %arg16[%c1_85, %c0_86, %c0_87] : memref<2x512x512xbf16, #tpu.memory_space<vmem>>, vector<1x128x128xbf16>
    %114 = vector.shape_cast %113 : vector<1x128x128xbf16> to vector<128x128xbf16>
    %c0_88 = arith.constant 0 : index
    %c1664 = arith.constant 1664 : index
    %115 = vector.load %arg2[%c0_88, %c1664] : memref<1x3328xf32, #tpu.memory_space<vmem>>, vector<1x128xf32>
    %116 = arith.truncf %104 : vector<8x128xf32> to vector<8x128xbf16>
    %cst_89 = arith.constant dense<0.000000e+00> : vector<8x128xf32>
    %117 = tpu.matmul %116, %114, %cst_89 {dimension_numbers = #tpu.dot_dimension_numbers<[1], [0], [0], [1], [0, 0, 1, 1], [], []>} : vector<8x128xbf16>, vector<128x128xbf16>, vector<8x128xf32> -> vector<8x128xf32>
    %118 = vector.broadcast %115 : vector<1x128xf32> to vector<8x128xf32>
    %119 = arith.addf %117, %118 : vector<8x128xf32>
    %c0_90 = arith.constant 0 : index
    %c0_91 = arith.constant 0 : index
    %120 = vector.load %arg15[%c0_90, %c0_91] : memref<8x128xf32, #tpu.memory_space<vmem>>, vector<8x128xf32>
    tpu.vector_store %arg15[%c0_90, %c0_91], %119 {strides = array<i32>} : memref<8x128xf32, #tpu.memory_space<vmem>>, vector<8x128xf32>,
    %121 = vector.extract_strided_slice %119 {offsets = [0, 0], sizes = [8, 32], strides = [1, 1]} : vector<8x128xf32> to vector<8x32xf32>
    %122 = vector.extract_strided_slice %119 {offsets = [0, 32], sizes = [8, 32], strides = [1, 1]} : vector<8x128xf32> to vector<8x32xf32>
    %c0_92 = arith.constant 0 : index
    %c0_93 = arith.constant 0 : index
    %123 = vector.load %arg1[%c0_92, %c0_93] : memref<8x32xf32, #tpu.memory_space<vmem>>, vector<8x32xf32>
    %124 = arith.mulf %122, %123 : vector<8x32xf32>
    %125 = arith.addf %121, %124 : vector<8x32xf32>
    %c1_i32_94 = arith.constant 1 : i32
    %c1_i32_95 = arith.constant 1 : i32
    %c0_i32_96 = arith.constant 0 : i32
    %c0_i32_97 = arith.constant 0 : i32
    %126 = tpu.memref_slice %arg16[%c1_i32_94, %c0_i32_96, %c0_i32_97] : memref<2x512x512xbf16, #tpu.memory_space<vmem>> -> memref<1x128x256xbf16, #tpu.memory_space<vmem>>
    %127 = tpu.memref_squeeze %126 : memref<1x128x256xbf16, #tpu.memory_space<vmem>> -> memref<128x256xbf16, #tpu.memory_space<vmem>>
    %128 = tpu.memref_slice %arg17[%c1_i32_95] : memref<2x!tpu.dma_semaphore, #tpu.memory_space<semaphore_mem>> -> memref<1x!tpu.dma_semaphore, #tpu.memory_space<semaphore_mem>>
    %129 = tpu.memref_squeeze %128 : memref<1x!tpu.dma_semaphore, #tpu.memory_space<semaphore_mem>> -> memref<!tpu.dma_semaphore, #tpu.memory_space<semaphore_mem>>
    tpu.enqueue_dma source(%arg10 : memref<128x256xbf16, #tpu.memory_space<any>>) target(%127 : memref<128x256xbf16, #tpu.memory_space<vmem>>) target_semaphore(%129 : memref<!tpu.dma_semaphore, #tpu.memory_space<semaphore_mem>>)
    %c0_i32_98 = arith.constant 0 : i32
    %c0_i32_99 = arith.constant 0 : i32
    %c0_i32_100 = arith.constant 0 : i32
    %c0_i32_101 = arith.constant 0 : i32
    %130 = tpu.memref_slice %arg16[%c0_i32_98, %c0_i32_100, %c0_i32_101] : memref<2x512x512xbf16, #tpu.memory_space<vmem>> -> memref<1x32x128xbf16, #tpu.memory_space<vmem>>
    %131 = tpu.memref_squeeze %130 : memref<1x32x128xbf16, #tpu.memory_space<vmem>> -> memref<32x128xbf16, #tpu.memory_space<vmem>>
    %132 = tpu.memref_slice %arg17[%c0_i32_99] : memref<2x!tpu.dma_semaphore, #tpu.memory_space<semaphore_mem>> -> memref<1x!tpu.dma_semaphore, #tpu.memory_space<semaphore_mem>>
    %133 = tpu.memref_squeeze %132 : memref<1x!tpu.dma_semaphore, #tpu.memory_space<semaphore_mem>> -> memref<!tpu.dma_semaphore, #tpu.memory_space<semaphore_mem>>
    tpu.wait_dma2 semaphore(%133 : memref<!tpu.dma_semaphore, #tpu.memory_space<semaphore_mem>>) src(%arg9 : memref<32x128xbf16, #tpu.memory_space<any>>) dst(%131 : memref<32x128xbf16, #tpu.memory_space<vmem>>)
    %c0_102 = arith.constant 0 : index
    %c0_103 = arith.constant 0 : index
    %c0_104 = arith.constant 0 : index
    %134 = vector.load %arg16[%c0_102, %c0_103, %c0_104] : memref<2x512x512xbf16, #tpu.memory_space<vmem>>, vector<1x32x128xbf16>
    %135 = vector.shape_cast %134 : vector<1x32x128xbf16> to vector<32x128xbf16>
    %c0_105 = arith.constant 0 : index
    %c1792 = arith.constant 1792 : index
    %136 = vector.load %arg2[%c0_105, %c1792] : memref<1x3328xf32, #tpu.memory_space<vmem>>, vector<1x128xf32>
    %137 = arith.truncf %125 : vector<8x32xf32> to vector<8x32xbf16>
    %cst_106 = arith.constant dense<0.000000e+00> : vector<8x128xf32>
    %138 = tpu.matmul %137, %135, %cst_106 {dimension_numbers = #tpu.dot_dimension_numbers<[1], [0], [0], [1], [0, 0, 1, 1], [], []>} : vector<8x32xbf16>, vector<32x128xbf16>, vector<8x128xf32> -> vector<8x128xf32>
    %139 = vector.broadcast %136 : vector<1x128xf32> to vector<8x128xf32>
    %140 = arith.addf %138, %139 : vector<8x128xf32>
    %cst_107 = arith.constant 0.000000e+00 : f32
    %141 = vector.broadcast %cst_107 : f32 to vector<8x128xf32>
    %142 = arith.cmpf ogt, %140, %141 : vector<8x128xf32>
    %cst_108 = arith.constant 2.000000e-01 : f32
    %143 = vector.broadcast %cst_108 : f32 to vector<8x128xf32>
    %144 = arith.mulf %143, %140 : vector<8x128xf32>
    %145 = arith.select %142, %140, %144 : vector<8x128xi1>, vector<8x128xf32>
    %c0_i32_109 = arith.constant 0 : i32
    %c0_i32_110 = arith.constant 0 : i32
    %c0_i32_111 = arith.constant 0 : i32
    %c0_i32_112 = arith.constant 0 : i32
    %146 = tpu.memref_slice %arg16[%c0_i32_109, %c0_i32_111, %c0_i32_112] : memref<2x512x512xbf16, #tpu.memory_space<vmem>> -> memref<1x256x512xbf16, #tpu.memory_space<vmem>>
    %147 = tpu.memref_squeeze %146 : memref<1x256x512xbf16, #tpu.memory_space<vmem>> -> memref<256x512xbf16, #tpu.memory_space<vmem>>
    %148 = tpu.memref_slice %arg17[%c0_i32_110] : memref<2x!tpu.dma_semaphore, #tpu.memory_space<semaphore_mem>> -> memref<1x!tpu.dma_semaphore, #tpu.memory_space<semaphore_mem>>
    %149 = tpu.memref_squeeze %148 : memref<1x!tpu.dma_semaphore, #tpu.memory_space<semaphore_mem>> -> memref<!tpu.dma_semaphore, #tpu.memory_space<semaphore_mem>>
    tpu.enqueue_dma source(%arg11 : memref<256x512xbf16, #tpu.memory_space<any>>) target(%147 : memref<256x512xbf16, #tpu.memory_space<vmem>>) target_semaphore(%149 : memref<!tpu.dma_semaphore, #tpu.memory_space<semaphore_mem>>)
    %c1_i32_113 = arith.constant 1 : i32
    %c1_i32_114 = arith.constant 1 : i32
    %c0_i32_115 = arith.constant 0 : i32
    %c0_i32_116 = arith.constant 0 : i32
    %150 = tpu.memref_slice %arg16[%c1_i32_113, %c0_i32_115, %c0_i32_116] : memref<2x512x512xbf16, #tpu.memory_space<vmem>> -> memref<1x128x256xbf16, #tpu.memory_space<vmem>>
    %151 = tpu.memref_squeeze %150 : memref<1x128x256xbf16, #tpu.memory_space<vmem>> -> memref<128x256xbf16, #tpu.memory_space<vmem>>
    %152 = tpu.memref_slice %arg17[%c1_i32_114] : memref<2x!tpu.dma_semaphore, #tpu.memory_space<semaphore_mem>> -> memref<1x!tpu.dma_semaphore, #tpu.memory_space<semaphore_mem>>
    %153 = tpu.memref_squeeze %152 : memref<1x!tpu.dma_semaphore, #tpu.memory_space<semaphore_mem>> -> memref<!tpu.dma_semaphore, #tpu.memory_space<semaphore_mem>>
    tpu.wait_dma2 semaphore(%153 : memref<!tpu.dma_semaphore, #tpu.memory_space<semaphore_mem>>) src(%arg10 : memref<128x256xbf16, #tpu.memory_space<any>>) dst(%151 : memref<128x256xbf16, #tpu.memory_space<vmem>>)
    %c1_117 = arith.constant 1 : index
    %c0_118 = arith.constant 0 : index
    %c0_119 = arith.constant 0 : index
    %154 = vector.load %arg16[%c1_117, %c0_118, %c0_119] : memref<2x512x512xbf16, #tpu.memory_space<vmem>>, vector<1x128x256xbf16>
    %155 = vector.shape_cast %154 : vector<1x128x256xbf16> to vector<128x256xbf16>
    %c0_120 = arith.constant 0 : index
    %c1920 = arith.constant 1920 : index
    %156 = vector.load %arg2[%c0_120, %c1920] : memref<1x3328xf32, #tpu.memory_space<vmem>>, vector<1x256xf32>
    %157 = arith.truncf %145 : vector<8x128xf32> to vector<8x128xbf16>
    %cst_121 = arith.constant dense<0.000000e+00> : vector<8x256xf32>
    %158 = tpu.matmul %157, %155, %cst_121 {dimension_numbers = #tpu.dot_dimension_numbers<[1], [0], [0], [1], [0, 0, 1, 1], [], []>} : vector<8x128xbf16>, vector<128x256xbf16>, vector<8x256xf32> -> vector<8x256xf32>
    %159 = vector.broadcast %156 : vector<1x256xf32> to vector<8x256xf32>
    %160 = arith.addf %158, %159 : vector<8x256xf32>
    %cst_122 = arith.constant 0.000000e+00 : f32
    %161 = vector.broadcast %cst_122 : f32 to vector<8x256xf32>
    %162 = arith.cmpf ogt, %160, %161 : vector<8x256xf32>
    %cst_123 = arith.constant 2.000000e-01 : f32
    %163 = vector.broadcast %cst_123 : f32 to vector<8x256xf32>
    %164 = arith.mulf %163, %160 : vector<8x256xf32>
    %165 = arith.select %162, %160, %164 : vector<8x256xi1>, vector<8x256xf32>
    %c1_i32_124 = arith.constant 1 : i32
    %c1_i32_125 = arith.constant 1 : i32
    %c0_i32_126 = arith.constant 0 : i32
    %c0_i32_127 = arith.constant 0 : i32
    %166 = tpu.memref_slice %arg16[%c1_i32_124, %c0_i32_126, %c0_i32_127] : memref<2x512x512xbf16, #tpu.memory_space<vmem>> -> memref<1x512x256xbf16, #tpu.memory_space<vmem>>
    %167 = tpu.memref_squeeze %166 : memref<1x512x256xbf16, #tpu.memory_space<vmem>> -> memref<512x256xbf16, #tpu.memory_space<vmem>>
    %168 = tpu.memref_slice %arg17[%c1_i32_125] : memref<2x!tpu.dma_semaphore, #tpu.memory_space<semaphore_mem>> -> memref<1x!tpu.dma_semaphore, #tpu.memory_space<semaphore_mem>>
    %169 = tpu.memref_squeeze %168 : memref<1x!tpu.dma_semaphore, #tpu.memory_space<semaphore_mem>> -> memref<!tpu.dma_semaphore, #tpu.memory_space<semaphore_mem>>
    tpu.enqueue_dma source(%arg12 : memref<512x256xbf16, #tpu.memory_space<any>>) target(%167 : memref<512x256xbf16, #tpu.memory_space<vmem>>) target_semaphore(%169 : memref<!tpu.dma_semaphore, #tpu.memory_space<semaphore_mem>>)
    %c0_i32_128 = arith.constant 0 : i32
    %c0_i32_129 = arith.constant 0 : i32
    %c0_i32_130 = arith.constant 0 : i32
    %c0_i32_131 = arith.constant 0 : i32
    %170 = tpu.memref_slice %arg16[%c0_i32_128, %c0_i32_130, %c0_i32_131] : memref<2x512x512xbf16, #tpu.memory_space<vmem>> -> memref<1x256x512xbf16, #tpu.memory_space<vmem>>
    %171 = tpu.memref_squeeze %170 : memref<1x256x512xbf16, #tpu.memory_space<vmem>> -> memref<256x512xbf16, #tpu.memory_space<vmem>>
    %172 = tpu.memref_slice %arg17[%c0_i32_129] : memref<2x!tpu.dma_semaphore, #tpu.memory_space<semaphore_mem>> -> memref<1x!tpu.dma_semaphore, #tpu.memory_space<semaphore_mem>>
    %173 = tpu.memref_squeeze %172 : memref<1x!tpu.dma_semaphore, #tpu.memory_space<semaphore_mem>> -> memref<!tpu.dma_semaphore, #tpu.memory_space<semaphore_mem>>
    tpu.wait_dma2 semaphore(%173 : memref<!tpu.dma_semaphore, #tpu.memory_space<semaphore_mem>>) src(%arg11 : memref<256x512xbf16, #tpu.memory_space<any>>) dst(%171 : memref<256x512xbf16, #tpu.memory_space<vmem>>)
    %c0_132 = arith.constant 0 : index
    %c0_133 = arith.constant 0 : index
    %c0_134 = arith.constant 0 : index
    %174 = vector.load %arg16[%c0_132, %c0_133, %c0_134] : memref<2x512x512xbf16, #tpu.memory_space<vmem>>, vector<1x256x512xbf16>
    %175 = vector.shape_cast %174 : vector<1x256x512xbf16> to vector<256x512xbf16>
    %c0_135 = arith.constant 0 : index
    %c2176 = arith.constant 2176 : index
    %176 = vector.load %arg2[%c0_135, %c2176] : memref<1x3328xf32, #tpu.memory_space<vmem>>, vector<1x512xf32>
    %177 = arith.truncf %165 : vector<8x256xf32> to vector<8x256xbf16>
    %cst_136 = arith.constant dense<0.000000e+00> : vector<8x512xf32>
    %178 = tpu.matmul %177, %175, %cst_136 {dimension_numbers = #tpu.dot_dimension_numbers<[1], [0], [0], [1], [0, 0, 1, 1], [], []>} : vector<8x256xbf16>, vector<256x512xbf16>, vector<8x512xf32> -> vector<8x512xf32>
    %179 = vector.broadcast %176 : vector<1x512xf32> to vector<8x512xf32>
    %180 = arith.addf %178, %179 : vector<8x512xf32>
    %cst_137 = arith.constant 0.000000e+00 : f32
    %181 = vector.broadcast %cst_137 : f32 to vector<8x512xf32>
    %182 = arith.cmpf ogt, %180, %181 : vector<8x512xf32>
    %cst_138 = arith.constant 2.000000e-01 : f32
    %183 = vector.broadcast %cst_138 : f32 to vector<8x512xf32>
    %184 = arith.mulf %183, %180 : vector<8x512xf32>
    %185 = arith.select %182, %180, %184 : vector<8x512xi1>, vector<8x512xf32>
    %c0_i32_139 = arith.constant 0 : i32
    %c0_i32_140 = arith.constant 0 : i32
    %c0_i32_141 = arith.constant 0 : i32
    %c0_i32_142 = arith.constant 0 : i32
    %186 = tpu.memref_slice %arg16[%c0_i32_139, %c0_i32_141, %c0_i32_142] : memref<2x512x512xbf16, #tpu.memory_space<vmem>> -> memref<1x256x384xbf16, #tpu.memory_space<vmem>>
    %187 = tpu.memref_squeeze %186 : memref<1x256x384xbf16, #tpu.memory_space<vmem>> -> memref<256x384xbf16, #tpu.memory_space<vmem>>
    %188 = tpu.memref_slice %arg17[%c0_i32_140] : memref<2x!tpu.dma_semaphore, #tpu.memory_space<semaphore_mem>> -> memref<1x!tpu.dma_semaphore, #tpu.memory_space<semaphore_mem>>
    %189 = tpu.memref_squeeze %188 : memref<1x!tpu.dma_semaphore, #tpu.memory_space<semaphore_mem>> -> memref<!tpu.dma_semaphore, #tpu.memory_space<semaphore_mem>>
    tpu.enqueue_dma source(%arg13 : memref<256x384xbf16, #tpu.memory_space<any>>) target(%187 : memref<256x384xbf16, #tpu.memory_space<vmem>>) target_semaphore(%189 : memref<!tpu.dma_semaphore, #tpu.memory_space<semaphore_mem>>)
    %c1_i32_143 = arith.constant 1 : i32
    %c1_i32_144 = arith.constant 1 : i32
    %c0_i32_145 = arith.constant 0 : i32
    %c0_i32_146 = arith.constant 0 : i32
    %190 = tpu.memref_slice %arg16[%c1_i32_143, %c0_i32_145, %c0_i32_146] : memref<2x512x512xbf16, #tpu.memory_space<vmem>> -> memref<1x512x256xbf16, #tpu.memory_space<vmem>>
    %191 = tpu.memref_squeeze %190 : memref<1x512x256xbf16, #tpu.memory_space<vmem>> -> memref<512x256xbf16, #tpu.memory_space<vmem>>
    %192 = tpu.memref_slice %arg17[%c1_i32_144] : memref<2x!tpu.dma_semaphore, #tpu.memory_space<semaphore_mem>> -> memref<1x!tpu.dma_semaphore, #tpu.memory_space<semaphore_mem>>
    %193 = tpu.memref_squeeze %192 : memref<1x!tpu.dma_semaphore, #tpu.memory_space<semaphore_mem>> -> memref<!tpu.dma_semaphore, #tpu.memory_space<semaphore_mem>>
    tpu.wait_dma2 semaphore(%193 : memref<!tpu.dma_semaphore, #tpu.memory_space<semaphore_mem>>) src(%arg12 : memref<512x256xbf16, #tpu.memory_space<any>>) dst(%191 : memref<512x256xbf16, #tpu.memory_space<vmem>>)
    %c1_147 = arith.constant 1 : index
    %c0_148 = arith.constant 0 : index
    %c0_149 = arith.constant 0 : index
    %194 = vector.load %arg16[%c1_147, %c0_148, %c0_149] : memref<2x512x512xbf16, #tpu.memory_space<vmem>>, vector<1x512x256xbf16>
    %195 = vector.shape_cast %194 : vector<1x512x256xbf16> to vector<512x256xbf16>
    %c0_150 = arith.constant 0 : index
    %c2688 = arith.constant 2688 : index
    %196 = vector.load %arg2[%c0_150, %c2688] : memref<1x3328xf32, #tpu.memory_space<vmem>>, vector<1x256xf32>
    %197 = arith.truncf %185 : vector<8x512xf32> to vector<8x512xbf16>
    %cst_151 = arith.constant dense<0.000000e+00> : vector<8x256xf32>
    %198 = tpu.matmul %197, %195, %cst_151 {dimension_numbers = #tpu.dot_dimension_numbers<[1], [0], [0], [1], [0, 0, 1, 1], [], []>} : vector<8x512xbf16>, vector<512x256xbf16>, vector<8x256xf32> -> vector<8x256xf32>
    %199 = vector.broadcast %196 : vector<1x256xf32> to vector<8x256xf32>
    %200 = arith.addf %198, %199 : vector<8x256xf32>
    %cst_152 = arith.constant 0.000000e+00 : f32
    %201 = vector.broadcast %cst_152 : f32 to vector<8x256xf32>
    %202 = arith.cmpf ogt, %200, %201 : vector<8x256xf32>
    %cst_153 = arith.constant 2.000000e-01 : f32
    %203 = vector.broadcast %cst_153 : f32 to vector<8x256xf32>
    %204 = arith.mulf %203, %200 : vector<8x256xf32>
    %205 = arith.select %202, %200, %204 : vector<8x256xi1>, vector<8x256xf32>
    %c0_i32_154 = arith.constant 0 : i32
    %c0_i32_155 = arith.constant 0 : i32
    %c0_i32_156 = arith.constant 0 : i32
    %c0_i32_157 = arith.constant 0 : i32
    %206 = tpu.memref_slice %arg16[%c0_i32_154, %c0_i32_156, %c0_i32_157] : memref<2x512x512xbf16, #tpu.memory_space<vmem>> -> memref<1x256x384xbf16, #tpu.memory_space<vmem>>
    %207 = tpu.memref_squeeze %206 : memref<1x256x384xbf16, #tpu.memory_space<vmem>> -> memref<256x384xbf16, #tpu.memory_space<vmem>>
    %208 = tpu.memref_slice %arg17[%c0_i32_155] : memref<2x!tpu.dma_semaphore, #tpu.memory_space<semaphore_mem>> -> memref<1x!tpu.dma_semaphore, #tpu.memory_space<semaphore_mem>>
    %209 = tpu.memref_squeeze %208 : memref<1x!tpu.dma_semaphore, #tpu.memory_space<semaphore_mem>> -> memref<!tpu.dma_semaphore, #tpu.memory_space<semaphore_mem>>
    tpu.wait_dma2 semaphore(%209 : memref<!tpu.dma_semaphore, #tpu.memory_space<semaphore_mem>>) src(%arg13 : memref<256x384xbf16, #tpu.memory_space<any>>) dst(%207 : memref<256x384xbf16, #tpu.memory_space<vmem>>)
    %c0_158 = arith.constant 0 : index
    %c0_159 = arith.constant 0 : index
    %c0_160 = arith.constant 0 : index
    %210 = vector.load %arg16[%c0_158, %c0_159, %c0_160] : memref<2x512x512xbf16, #tpu.memory_space<vmem>>, vector<1x256x384xbf16>
    %211 = vector.shape_cast %210 : vector<1x256x384xbf16> to vector<256x384xbf16>
    %c0_161 = arith.constant 0 : index
    %c2944 = arith.constant 2944 : index
    %212 = vector.load %arg2[%c0_161, %c2944] : memref<1x3328xf32, #tpu.memory_space<vmem>>, vector<1x384xf32>
    %213 = arith.truncf %205 : vector<8x256xf32> to vector<8x256xbf16>
    %cst_162 = arith.constant dense<0.000000e+00> : vector<8x384xf32>
    %214 = tpu.matmul %213, %211, %cst_162 {dimension_numbers = #tpu.dot_dimension_numbers<[1], [0], [0], [1], [0, 0, 1, 1], [], []>} : vector<8x256xbf16>, vector<256x384xbf16>, vector<8x384xf32> -> vector<8x384xf32>
    %215 = vector.broadcast %212 : vector<1x384xf32> to vector<8x384xf32>
    %216 = arith.addf %214, %215 : vector<8x384xf32>
    %c0_163 = arith.constant 0 : index
    %c0_164 = arith.constant 0 : index
    %217 = vector.load %arg14[%c0_163, %c0_164] : memref<8x384xf32, #tpu.memory_space<vmem>>, vector<8x384xf32>
    tpu.vector_store %arg14[%c0_163, %c0_164], %216 {strides = array<i32>} : memref<8x384xf32, #tpu.memory_space<vmem>>, vector<8x384xf32>,
    return
  }
}

</mosaic_0001>

<bundles_post_ra>
// kernel: vae_forward.1
= control target key start
LH: loop header
LB: loop body
LE: loop exit
PB: predicated region body
PF: predicated region fallthrough
CT: control target
= control target key end

     0   :  { %21 = vsyncpa [#allocation5], 0  ;;  %s2923_s0 = inlined_call_operand.vmem [shape: f32[8,384], index: 0, kind: input, shape index: {}]   ;;  %s2924_s1 = inlined_call_operand.hbm [shape: f32[8,32], index: 1, kind: input, shape index: {}]   ;;  %s2925_s2 = inlined_call_operand.hbm [shape: f32[1,3328], index: 2, kind: input, shape index: {}]   ;;  %s2926_s3 = inlined_call_operand.hbm [shape: bf16[384,256], index: 3, kind: input, shape index: {}]   ;;  %s2927_s4 = inlined_call_operand.hbm [shape: bf16[256,512], index: 4, kind: input, shape index: {}]   ;;  %s2928_s5 = inlined_call_operand.hbm [shape: bf16[512,512], index: 5, kind: input, shape index: {}]   ;;  %s2929_s6 = inlined_call_operand.hbm [shape: bf16[512,256], index: 6, kind: input, shape index: {}]   ;;  %s2930_s7 = inlined_call_operand.vmem [shape: bf16[256,128], index: 7, kind: input, shape index: {}]   ;;  %s2931_s8 = inlined_call_operand.hbm [shape: bf16[128,128], index: 8, kind: input, shape index: {}]   ;;  %s2932_s9 = inlined_call_operand.hbm [shape: bf16[32,128], index: 9, kind: input, shape index: {}]   ;;  %s2933_s10 = inlined_call_operand.hbm [shape: bf16[128,256], index: 10, kind: input, shape index: {}]   ;;  %s2934_s11 = inlined_call_operand.hbm [shape: bf16[256,512], index: 11, kind: input, shape index: {}]   ;;  %s2935_s12 = inlined_call_operand.hbm [shape: bf16[512,256], index: 12, kind: input, shape index: {}]   ;;  %s2936_s13 = inlined_call_operand.hbm [shape: bf16[256,384], index: 13, kind: input, shape index: {}]   ;;  %s2937_s14 = inlined_call_operand.hbm [shape: f32[8,384], index: 14, kind: output, shape index: {0}]   ;;  %s2938_s15 = inlined_call_operand.vmem [shape: f32[8,128], index: 15, kind: output, shape index: {1}]  }
   0x1   :  { %22 = vsyncpa [#allocation8], 0 }
   0x2   :  { %23 = vsyncpa [#allocation6], 0  ;;  %s2425_s18 = smov [#allocation4]   ;;  %s2426_s20 = smov [#allocation7]  }
   0x3   :  { %s32_s19 = sshll.u32 %s2425_s18, 4  ;;  %s42_s21 = sshll.u32 %s2426_s20, 4  ;;  %s33_s19 = int_to_ptr.vmem [resolvable:$true] %s32_s19  ;;  %s43_s21 = int_to_ptr.vmem [resolvable:$true] %s42_s21 }
   0x4   :  { %s2287_s24 = scalar_lea.hbm %s2924_s1, 128 }
   0x5   :  { %p2288_p0 = scmp.ne.s32.totalorder %s2924_s1, %s2287_s24  ;;  %p2291_p1 = scmp.lt.u32.totalorder %s2287_s24, %s2924_s1 }
   0x7   :  { %p2293_p2 = pnand %p2291_p1, %p2288_p0 }
   0x9   :  { %2296 = shalt.err (!%p2293_p2)
}
   0xa   :  { %s2297_s29 = scalar_lea.vmem %s33_s19, 128  ;;  %p2302_p4 = scmp.lt.s32.totalorder %s33_s19, %s33_s19 }
   0xb   :  { %p2298_p3 = scmp.ne.s32.totalorder %s33_s19, %s2297_s29  ;;  %p2303_p5 = scmp.lt.s32.totalorder %s2297_s29, %s2297_s29 }
   0xd   :  { %p2304_p6 = por %p2303_p5, %p2302_p4 }
   0xf   :  { %p2305_p7 = pnand %p2304_p6, %p2298_p3 }
  0x11   :  { %2308 = shalt.err (!%p2305_p7)
}
  0x12   :  { %35 = dma.hbm_to_vmem [thread:$0]  %s2924_s1, 128, %s33_s19, [#allocation5]  }
  0x13   :  { %s2309_s20 = scalar_lea.hbm %s2925_s2, 416 }
  0x14   :  { %p2310_p8 = scmp.ne.s32.totalorder %s2925_s2, %s2309_s20  ;;  %p2313_p9 = scmp.lt.u32.totalorder %s2309_s20, %s2925_s2 }
  0x16   :  { %p2315_p10 = pnand %p2313_p9, %p2310_p8 }
  0x18   :  { %2318 = shalt.err (!%p2315_p10)
}
  0x19   :  { %s2319_s26 = scalar_lea.vmem %s43_s21, 416  ;;  %p2324_p12 = scmp.lt.s32.totalorder %s43_s21, %s43_s21 }
  0x1a   :  { %p2320_p11 = scmp.ne.s32.totalorder %s43_s21, %s2319_s26  ;;  %p2325_p13 = scmp.lt.s32.totalorder %s2319_s26, %s2319_s26 }
  0x1c   :  { %p2326_p0 = por %p2325_p13, %p2324_p12 }
  0x1e   :  { %p2327_p1 = pnand %p2326_p0, %p2320_p11 }
  0x20   :  { %2330 = shalt.err (!%p2327_p1)
}
  0x21   :  { %45 = dma.hbm_to_vmem [thread:$0]  %s2925_s2, 416, %s43_s21, [#allocation8]  }
  0x22   :  { %2397 = dma.done.wait [#allocation5], 128  }
  0x23   :  { %2398 = vsyncadd [#allocation5], 4294967168 }
  0x24   :  { %2399 = dma.done.wait [#allocation8], 416  }
  0x25   :  { %2400 = vsyncadd [#allocation8], 4294966880  ;;  %s57_s27 = sld [smem:[#allocation0]]   ;;  %s2427_s28 = smov 256  }
  0x26   :  { %69 = sst [smem:[#allocation11]] %s2427_s28  ;;  %s2428_s29 = smov 512  }
  0x27   :  { %71 = sst [smem:[#allocation11 + $0x1]] %s2428_s29  ;;  %s2429_s30 = smov 2  }
  0x28   :  { %73 = sst [smem:[#allocation11 + $0x2]] %s2429_s30  ;;  %s2430_s16 = smov 64  }
  0x29   :  { %75 = sst [smem:[#allocation11 + $0x3]] %s2430_s16  ;;  %s2431_s17 = smov 128  }
  0x2a   :  { %77 = sst [smem:[#allocation11 + $0x4]] %s2431_s17  ;;  %s2432_s18 = smov 4  }
  0x2b   :  { %79 = sst [smem:[#allocation11 + $0x5]] %s2429_s30  ;;  %s2121_s2 = sshll.u32 %s57_s27, 26 }
  0x2c   :  { %81 = sst [smem:[#allocation11 + $0x6]] %s2431_s17  ;;  %s2566_s21 = sadd.s32 134217728, %s2121_s2 }
  0x2d   :  { %83 = sst [smem:[#allocation11 + $0x7]] %s2430_s16  ;;  %s2433_s20 = smov [#allocation2]  }
  0x2e   :  { %85 = sst [smem:[#allocation11 + $0x8]] %s2432_s18  ;;  %s65_s22 = sshll.u32 %s2433_s20, 4  ;;  %s2570_s22 = int_to_ptr.vmem [resolvable:$true] %s65_s22 }
  0x2f   :  { %s2939_s23 = smov [#allocation3]   ;;  %s2435_s24 = smov [#allocation10]  }
  0x30   :  { %87 = dma.general %s2926_s3, 6144, %s2570_s22, %s2939_s23, %s2435_s24, [#allocation11], %s2566_s21, 0  }
  0x31   :  { %108 = sst [smem:[#allocation13]] %s2428_s29  ;;  %s2436_s1 = smov [#allocation2 + $0x400]   ;;  %v2590_v0 = vld [vmem:[%s2923_s0] sm:$0xff]  ;;  %v89_v1 = vld [vmem:[%s2923_s0 + $0x8] sm:$0xff]  ;;  %v2598_v2 = vld [vmem:[%s2923_s0 + $0x10] sm:$0xff] }
  0x32   :  { %110 = sst [smem:[#allocation13 + $0x1]] %s2428_s29  ;;  %s104_s19 = sshll.u32 %s2436_s1, 4  ;;  %s2583_s19 = int_to_ptr.vmem [resolvable:$true] %s104_s19 }
  0x33   :  { %112 = sst [smem:[#allocation13 + $0x2]] %s2432_s18  ;;  %s2437_s26 = smov [#allocation3 + $0x1]  }
  0x34   :  { %114 = sst [smem:[#allocation13 + $0x3]] %s2430_s16  ;;  %s2438_s1 = smov [#allocation12]  }
  0x35   :  { %116 = sst [smem:[#allocation13 + $0x4]] %s2431_s17 }
  0x36   :  { %118 = sst [smem:[#allocation13 + $0x5]] %s2429_s30 }
  0x37   :  { %120 = sst [smem:[#allocation13 + $0x6]] %s2427_s28 }
  0x38   :  { %122 = sst [smem:[#allocation13 + $0x7]] %s2430_s16 }
  0x39   :  { %124 = sst [smem:[#allocation13 + $0x8]] %s2432_s18 }
  0x3a   :  { %126 = dma.general %s2927_s4, 8192, %s2583_s19, %s2437_s26, %s2438_s1, [#allocation13], %s2566_s21, 0  }
  0x3b   :  { %2401 = dma.done.wait [#allocation3], 6144 }
  0x3c   :  { %2402 = vsyncadd [#allocation3], 4294961152  ;;  %v181_v3 = vpack.c.bf16 %v89_v1, %v89_v1  ;;  %297 = sst [smem:[#allocation15]] %s2428_s29  ;;  %v132_v4 = vld [vmem:[#allocation2 + $0x8] sm:$0xff]  ;;  %v131_v5 = vld [vmem:[#allocation2] sm:$0xff]  ;;  %v180_v37 = vpack.c.bf16 %v2590_v0, %v2590_v0  ;;  %v2439_v40 = vmov 0   ;;  %v182_v54 = vpack.c.bf16 %v2598_v2, %v2598_v2 }
  0x3d   :  { %299 = sst [smem:[#allocation15 + $0x1]] %s2428_s29  ;;  %v134_v6 = vld [vmem:[#allocation2 + $0x28] sm:$0xff]  ;;  %194 = vmatprep.subr.bf16.mxu0 %v132_v4  ;;  %v133_v7 = vld [vmem:[#allocation2 + $0x20] sm:$0xff]  ;;  %s2440_s0 = smov [#allocation14]   ;;  %v184_v56 = vlaneseq }
  0x3e   :  { %226 = vmatprep.mubr.bf16.mxu0 %v181_v3  ;;  %301 = sst [smem:[#allocation15 + $0x2]] %s2432_s18  ;;  %195 = vmatpush1.bf16.msra.mxu0 %v131_v5  ;;  %v136_v8 = vld [vmem:[#allocation2 + $0x48] sm:$0xff]  ;;  %v135_v9 = vld [vmem:[#allocation2 + $0x40] sm:$0xff]  ;;  %s2941_s4 = smov [#allocation3]  }
  0x3f   :  { %303 = sst [smem:[#allocation15 + $0x3]] %s2430_s16  ;;  %196 = vmatprep.subr.bf16.mxu0 %v134_v6  ;;  %v138_v10 = vld [vmem:[#allocation2 + $0x68] sm:$0xff]  ;;  %v137_v11 = vld [vmem:[#allocation2 + $0x60] sm:$0xff]  ;;  %v2628_v57 = vshrl.u32 %v184_v56, 7 }
  0x40   :  { %305 = sst [smem:[#allocation15 + $0x4]] %s2431_s17  ;;  %v140_v12 = vld [vmem:[#allocation2 + $0x88] sm:$0xff]  ;;  %v139_v13 = vld [vmem:[#allocation2 + $0x80] sm:$0xff] }
  0x41   :  { %307 = sst [smem:[#allocation15 + $0x5]] %s2429_s30  ;;  %v142_v14 = vld [vmem:[#allocation2 + $0xa8] sm:$0xff]  ;;  %v141_v15 = vld [vmem:[#allocation2 + $0xa0] sm:$0xff]  ;;  %v2631_v58 = vsub.s32 0, %v2628_v57  ;;  %v2634_v59 = vsub.s32 1, %v2628_v57 }
  0x42   :  { %309 = sst [smem:[#allocation15 + $0x6]] %s2427_s28  ;;  %197 = vmatpush1.bf16.msra.mxu0 %v133_v7  ;;  %v144_v16 = vld [vmem:[#allocation2 + $0xc8] sm:$0xff]  ;;  %v143_v17 = vld [vmem:[#allocation2 + $0xc0] sm:$0xff] }
  0x43   :  { %311 = sst [smem:[#allocation15 + $0x7]] %s2430_s16  ;;  %198 = vmatprep.subr.bf16.mxu0 %v136_v8  ;;  %v146_v18 = vld [vmem:[#allocation2 + $0xe8] sm:$0xff]  ;;  %v145_v19 = vld [vmem:[#allocation2 + $0xe0] sm:$0xff] }
  0x44   :  { %313 = sst [smem:[#allocation15 + $0x8]] %s2432_s18  ;;  %v148_v20 = vld [vmem:[#allocation2 + $0x108] sm:$0xff]  ;;  %v147_v21 = vld [vmem:[#allocation2 + $0x100] sm:$0xff] }
  0x45   :  { %v150_v22 = vld [vmem:[#allocation2 + $0x128] sm:$0xff]  ;;  %v149_v23 = vld [vmem:[#allocation2 + $0x120] sm:$0xff] }
  0x46   :  { %199 = vmatpush1.bf16.msra.mxu0 %v135_v9  ;;  %v152_v24 = vld [vmem:[#allocation2 + $0x148] sm:$0xff]  ;;  %v151_v25 = vld [vmem:[#allocation2 + $0x140] sm:$0xff] }
  0x47   :  { %200 = vmatprep.subr.bf16.mxu0 %v138_v10  ;;  %v154_v26 = vld [vmem:[#allocation2 + $0x168] sm:$0xff]  ;;  %v153_v27 = vld [vmem:[#allocation2 + $0x160] sm:$0xff] }
  0x48   :  { %v156_v28 = vld [vmem:[#allocation2 + $0x188] sm:$0xff]  ;;  %v155_v29 = vld [vmem:[#allocation2 + $0x180] sm:$0xff] }
  0x49   :  { %v158_v30 = vld [vmem:[#allocation2 + $0x1a8] sm:$0xff]  ;;  %v157_v31 = vld [vmem:[#allocation2 + $0x1a0] sm:$0xff] }
  0x4a   :  { %201 = vmatpush1.bf16.msra.mxu0 %v137_v11  ;;  %v160_v32 = vld [vmem:[#allocation2 + $0x1c8] sm:$0xff]  ;;  %v159_v33 = vld [vmem:[#allocation2 + $0x1c0] sm:$0xff] }
  0x4b   :  { %202 = vmatprep.subr.bf16.mxu0 %v140_v12  ;;  %v162_v34 = vld [vmem:[#allocation2 + $0x1e8] sm:$0xff]  ;;  %v161_v35 = vld [vmem:[#allocation2 + $0x1e0] sm:$0xff] }
  0x4c   :  { %v164_v36 = vld [vmem:[#allocation2 + $0x208] sm:$0xff]  ;;  %v163_v38 = vld [vmem:[#allocation2 + $0x200] sm:$0xff] }
  0x4d   :  { %v166_v39 = vld [vmem:[#allocation2 + $0x228] sm:$0xff]  ;;  %v165_v41 = vld [vmem:[#allocation2 + $0x220] sm:$0xff] }
  0x4e   :  { %203 = vmatpush1.bf16.msra.mxu0 %v139_v13  ;;  %v168_v42 = vld [vmem:[#allocation2 + $0x248] sm:$0xff]  ;;  %v167_v43 = vld [vmem:[#allocation2 + $0x240] sm:$0xff] }
  0x4f   :  { %204 = vmatprep.subr.bf16.mxu0 %v142_v14  ;;  %v170_v44 = vld [vmem:[#allocation2 + $0x268] sm:$0xff]  ;;  %v169_v45 = vld [vmem:[#allocation2 + $0x260] sm:$0xff] }
  0x50   :  { %v172_v46 = vld [vmem:[#allocation2 + $0x288] sm:$0xff]  ;;  %v171_v47 = vld [vmem:[#allocation2 + $0x280] sm:$0xff] }
  0x51   :  { %v174_v48 = vld [vmem:[#allocation2 + $0x2a8] sm:$0xff]  ;;  %v173_v49 = vld [vmem:[#allocation2 + $0x2a0] sm:$0xff] }
  0x52   :  { %205 = vmatpush1.bf16.msra.mxu0 %v141_v15  ;;  %v176_v50 = vld [vmem:[#allocation2 + $0x2c8] sm:$0xff]  ;;  %v175_v51 = vld [vmem:[#allocation2 + $0x2c0] sm:$0xff] }
  0x53   :  { %206 = vmatprep.subr.bf16.mxu0 %v144_v16  ;;  %v178_v52 = vld [vmem:[#allocation2 + $0x2e8] sm:$0xff]  ;;  %v177_v53 = vld [vmem:[#allocation2 + $0x2e0] sm:$0xff] }
  0x54   :  { %v179_v55 = vld [vmem:[#allocation7] sm:$0x3] }
  0x55   :  { %315 = dma.general %s2928_s5, 16384, %s2570_s22, %s2941_s4, %s2440_s0, [#allocation15], %s2566_s21, 0   ;;  %v187_v60 = vrot.slane %v179_v55, %v2631_v58  ;;  %v191_v61 = vrot.slane %v179_v55, %v2634_v59 }
  0x56   :  { %207 = vmatpush1.bf16.msra.mxu0 %v143_v17 }
  0x57   :  { %208 = vmatprep.subr.bf16.mxu0 %v146_v18 }
  0x5a   :  { %209 = vmatpush1.bf16.msra.mxu0 %v145_v19 }
  0x5b   :  { %210 = vmatprep.subr.bf16.mxu0 %v148_v20 }
  0x5e   :  { %211 = vmatpush1.bf16.msra.mxu0 %v147_v21 }
  0x5f   :  { %212 = vmatprep.subr.bf16.mxu0 %v150_v22 }
  0x62   :  { %213 = vmatpush1.bf16.msra.mxu0 %v149_v23 }
  0x63   :  { %214 = vmatprep.subr.bf16.mxu0 %v152_v24 }
  0x66   :  { %215 = vmatpush1.bf16.msra.mxu0 %v151_v25 }
  0x67   :  { %216 = vmatprep.subr.bf16.mxu0 %v154_v26 }
  0x6a   :  { %217 = vmatpush1.bf16.msra.mxu0 %v153_v27 }
  0x6b   :  { %218 = vmatprep.subr.bf16.mxu0 %v156_v28 }
  0x6e   :  { %219 = vmatpush1.bf16.msra.mxu0 %v155_v29 }
  0x6f   :  { %220 = vmatprep.subr.bf16.mxu0 %v158_v30 }
  0x72   :  { %221 = vmatpush1.bf16.msra.mxu0 %v157_v31 }
  0x73   :  { %222 = vmatprep.subr.bf16.mxu0 %v160_v32 }
  0x76   :  { %223 = vmatpush1.bf16.msra.mxu0 %v159_v33 }
  0x77   :  { %224 = vmatprep.subr.bf16.mxu0 %v162_v34 }
  0x7a   :  { %225 = vmatpush1.bf16.msra.mxu0 %v161_v35 }
  0x7b   :  { %235 = vmatprep.subr.bf16.mxu0 %v164_v36 }
  0x7d   :  { %227 = vmatmul.mubr.bf16.vlgmr.msra.gmra.mrb[0].mxu0 %v180_v37 }
  0x7e   :  { %236 = vmatpush1.bf16.msra.mxu0 %v163_v38  ;;  %267 = vmatprep.mubr.bf16.mxu0 %v2439_v40 }
  0x7f   :  { %237 = vmatprep.subr.bf16.mxu0 %v166_v39 }
  0x82   :  { %238 = vmatpush1.bf16.msra.mxu0 %v165_v41 }
  0x83   :  { %239 = vmatprep.subr.bf16.mxu0 %v168_v42 }
  0x86   :  { %240 = vmatpush1.bf16.msra.mxu0 %v167_v43 }
  0x87   :  { %241 = vmatprep.subr.bf16.mxu0 %v170_v44 }
  0x8a   :  { %242 = vmatpush1.bf16.msra.mxu0 %v169_v45 }
  0x8b   :  { %243 = vmatprep.subr.bf16.mxu0 %v172_v46 }
  0x8e   :  { %244 = vmatpush1.bf16.msra.mxu0 %v171_v47 }
  0x8f   :  { %245 = vmatprep.subr.bf16.mxu0 %v174_v48 }
  0x92   :  { %246 = vmatpush1.bf16.msra.mxu0 %v173_v49 }
  0x93   :  { %247 = vmatprep.subr.bf16.mxu0 %v176_v50 }
  0x96   :  { %248 = vmatpush1.bf16.msra.mxu0 %v175_v51 }
  0x97   :  { %249 = vmatprep.subr.bf16.mxu0 %v178_v52 }
  0x9a   :  { %250 = vmatpush1.bf16.msra.mxu0 %v177_v53 }
  0x9d   :  { %268 = vmatmul.mubr.bf16.vlgmr.msra.gmra.mrb[0].mxu0 %v182_v54 }
 0x170   :  { %v269_v62 = vpop.f32.mrb[0].mxu0 }
 0x171   :  { %v2227_v63 = vadd.f32 %v269_v62, %v187_v60  ;;  %v271_v0 = vpop.f32.mrb[1].mxu0 }
 0x172   :  { %v2228_v1 = vadd.f32 %v271_v0, %v191_v61  ;;  %v273_v2 = vpop.f32.mrb[2].mxu0 }
 0x173   :  { %vm276_vm0 = vcmp.gt.f32.partialorder %v2227_v63, 0.0  ;;  %v278_v3 = vmul.f32 0.2, %v2227_v63  ;;  %v274_v4 = vpop.f32.mrb[3].mxu0 }
 0x174   :  { %vm277_vm1 = vcmp.gt.f32.partialorder %v2228_v1, 0.0  ;;  %v279_v5 = vmul.f32 0.2, %v2228_v1 }
 0x175   :  { %v2638_v6 = vsel %vm276_vm0, %v2227_v63, %v278_v3 }
 0x176   :  { %v281_v7 = vsel %vm277_vm1, %v2228_v1, %v279_v5 }
 0x177   :  { %2403 = dma.done.wait [#allocation3 + $0x1], 8192 }
 0x178   :  { %2404 = vsyncadd [#allocation3 + $0x1], 4294959104  ;;  %v2640_v8 = vpack.c.bf16 %v281_v7, %v281_v7  ;;  %517 = sst [smem:[#allocation17]] %s2427_s28  ;;  %v321_v9 = vld [vmem:[#allocation2 + $0x408] sm:$0xff]  ;;  %v320_v10 = vld [vmem:[#allocation2 + $0x400] sm:$0xff]  ;;  %v2654_v43 = vpack.c.bf16 %v2638_v6, %v2638_v6  ;;  %s2441_s5 = smov [#allocation16]  }
 0x179   :  { %519 = sst [smem:[#allocation17 + $0x1]] %s2428_s29  ;;  %v325_v11 = vld [vmem:[#allocation2 + $0x428] sm:$0xff]  ;;  %408 = vmatprep.subr.bf16.mxu1 %v321_v9  ;;  %v324_v12 = vld [vmem:[#allocation2 + $0x420] sm:$0xff]  ;;  %v323_v42 = vld [vmem:[#allocation2 + $0x418] sm:$0xff] }
 0x17a   :  { %440 = vmatprep.mubr.bf16.mxu1 %v2640_v8  ;;  %521 = sst [smem:[#allocation17 + $0x2]] %s2429_s30  ;;  %409 = vmatpush1.bf16.msra.mxu1 %v320_v10  ;;  %v329_v13 = vld [vmem:[#allocation2 + $0x448] sm:$0xff]  ;;  %v328_v14 = vld [vmem:[#allocation2 + $0x440] sm:$0xff]  ;;  %v322_v44 = vld [vmem:[#allocation2 + $0x410] sm:$0xff] }
 0x17b   :  { %523 = sst [smem:[#allocation17 + $0x3]] %s2430_s16  ;;  %410 = vmatprep.subr.bf16.mxu1 %v325_v11  ;;  %v333_v15 = vld [vmem:[#allocation2 + $0x468] sm:$0xff]  ;;  %v332_v16 = vld [vmem:[#allocation2 + $0x460] sm:$0xff]  ;;  %v327_v45 = vld [vmem:[#allocation2 + $0x438] sm:$0xff] }
 0x17c   :  { %525 = sst [smem:[#allocation17 + $0x4]] %s2431_s17  ;;  %v337_v17 = vld [vmem:[#allocation2 + $0x488] sm:$0xff]  ;;  %v336_v18 = vld [vmem:[#allocation2 + $0x480] sm:$0xff]  ;;  %v326_v46 = vld [vmem:[#allocation2 + $0x430] sm:$0xff] }
 0x17d   :  { %527 = sst [smem:[#allocation17 + $0x5]] %s2429_s30  ;;  %v341_v19 = vld [vmem:[#allocation2 + $0x4a8] sm:$0xff]  ;;  %v340_v20 = vld [vmem:[#allocation2 + $0x4a0] sm:$0xff]  ;;  %v331_v47 = vld [vmem:[#allocation2 + $0x458] sm:$0xff] }
 0x17e   :  { %529 = sst [smem:[#allocation17 + $0x6]] %s2431_s17  ;;  %411 = vmatpush1.bf16.msra.mxu1 %v324_v12  ;;  %v345_v21 = vld [vmem:[#allocation2 + $0x4c8] sm:$0xff]  ;;  %v344_v22 = vld [vmem:[#allocation2 + $0x4c0] sm:$0xff]  ;;  %v330_v48 = vld [vmem:[#allocation2 + $0x450] sm:$0xff] }
 0x17f   :  { %531 = sst [smem:[#allocation17 + $0x7]] %s2430_s16  ;;  %412 = vmatprep.subr.bf16.mxu1 %v329_v13  ;;  %v349_v23 = vld [vmem:[#allocation2 + $0x4e8] sm:$0xff]  ;;  %v348_v24 = vld [vmem:[#allocation2 + $0x4e0] sm:$0xff]  ;;  %v335_v49 = vld [vmem:[#allocation2 + $0x478] sm:$0xff] }
 0x180   :  { %533 = sst [smem:[#allocation17 + $0x8]] %s2432_s18  ;;  %v353_v25 = vld [vmem:[#allocation2 + $0x508] sm:$0xff]  ;;  %v352_v26 = vld [vmem:[#allocation2 + $0x500] sm:$0xff]  ;;  %v334_v50 = vld [vmem:[#allocation2 + $0x470] sm:$0xff] }
 0x181   :  { %v357_v27 = vld [vmem:[#allocation2 + $0x528] sm:$0xff]  ;;  %v356_v28 = vld [vmem:[#allocation2 + $0x520] sm:$0xff]  ;;  %v339_v51 = vld [vmem:[#allocation2 + $0x498] sm:$0xff] }
 0x182   :  { %413 = vmatpush1.bf16.msra.mxu1 %v328_v14  ;;  %v361_v29 = vld [vmem:[#allocation2 + $0x548] sm:$0xff]  ;;  %v360_v30 = vld [vmem:[#allocation2 + $0x540] sm:$0xff]  ;;  %v338_v52 = vld [vmem:[#allocation2 + $0x490] sm:$0xff] }
 0x183   :  { %414 = vmatprep.subr.bf16.mxu1 %v333_v15  ;;  %v365_v31 = vld [vmem:[#allocation2 + $0x568] sm:$0xff]  ;;  %v364_v32 = vld [vmem:[#allocation2 + $0x560] sm:$0xff]  ;;  %v343_v53 = vld [vmem:[#allocation2 + $0x4b8] sm:$0xff] }
 0x184   :  { %v369_v33 = vld [vmem:[#allocation2 + $0x588] sm:$0xff]  ;;  %v368_v34 = vld [vmem:[#allocation2 + $0x580] sm:$0xff]  ;;  %v342_v54 = vld [vmem:[#allocation2 + $0x4b0] sm:$0xff] }
 0x185   :  { %v373_v35 = vld [vmem:[#allocation2 + $0x5a8] sm:$0xff]  ;;  %v372_v36 = vld [vmem:[#allocation2 + $0x5a0] sm:$0xff]  ;;  %v347_v55 = vld [vmem:[#allocation2 + $0x4d8] sm:$0xff] }
 0x186   :  { %415 = vmatpush1.bf16.msra.mxu1 %v332_v16  ;;  %v377_v37 = vld [vmem:[#allocation2 + $0x5c8] sm:$0xff]  ;;  %v376_v38 = vld [vmem:[#allocation2 + $0x5c0] sm:$0xff]  ;;  %v346_v56 = vld [vmem:[#allocation2 + $0x4d0] sm:$0xff] }
 0x187   :  { %416 = vmatprep.subr.bf16.mxu1 %v337_v17  ;;  %v381_v39 = vld [vmem:[#allocation2 + $0x5e8] sm:$0xff]  ;;  %v380_v41 = vld [vmem:[#allocation2 + $0x5e0] sm:$0xff]  ;;  %v351_v60 = vld [vmem:[#allocation2 + $0x4f8] sm:$0xff] }
 0x188   :  { %v350_v61 = vld [vmem:[#allocation2 + $0x4f0] sm:$0xff]  ;;  %v355_v62 = vld [vmem:[#allocation2 + $0x518] sm:$0xff]  ;;  %v384_v14 = vld [vmem:[#allocation7 + $0x2] sm:$0xf] }
 0x189   :  { %v354_v63 = vld [vmem:[#allocation2 + $0x510] sm:$0xff]  ;;  %v359_v0 = vld [vmem:[#allocation2 + $0x538] sm:$0xff]  ;;  %v391_v15 = vrot.slane %v384_v14, %v2631_v58  ;;  %v395_v16 = vrot.slane %v384_v14, %v2634_v59 }
 0x18a   :  { %417 = vmatpush1.bf16.msra.mxu1 %v336_v18  ;;  %v358_v1 = vld [vmem:[#allocation2 + $0x530] sm:$0xff]  ;;  %v363_v2 = vld [vmem:[#allocation2 + $0x558] sm:$0xff] }
 0x18b   :  { %418 = vmatprep.subr.bf16.mxu1 %v341_v19  ;;  %v362_v3 = vld [vmem:[#allocation2 + $0x550] sm:$0xff]  ;;  %v367_v4 = vld [vmem:[#allocation2 + $0x578] sm:$0xff] }
 0x18c   :  { %v366_v5 = vld [vmem:[#allocation2 + $0x570] sm:$0xff]  ;;  %v371_v6 = vld [vmem:[#allocation2 + $0x598] sm:$0xff] }
 0x18d   :  { %v370_v7 = vld [vmem:[#allocation2 + $0x590] sm:$0xff]  ;;  %v379_v10 = vld [vmem:[#allocation2 + $0x5d8] sm:$0xff] }
 0x18e   :  { %419 = vmatpush1.bf16.msra.mxu1 %v340_v20  ;;  %v374_v9 = vld [vmem:[#allocation2 + $0x5b0] sm:$0xff]  ;;  %v383_v12 = vld [vmem:[#allocation2 + $0x5f8] sm:$0xff] }
 0x18f   :  { %420 = vmatprep.subr.bf16.mxu1 %v345_v21  ;;  %v378_v11 = vld [vmem:[#allocation2 + $0x5d0] sm:$0xff] }
 0x190   :  { %v382_v13 = vld [vmem:[#allocation2 + $0x5f0] sm:$0xff] }
 0x192   :  { %421 = vmatpush1.bf16.msra.mxu1 %v344_v22 }
 0x193   :  { %422 = vmatprep.subr.bf16.mxu1 %v349_v23 }
 0x196   :  { %423 = vmatpush1.bf16.msra.mxu1 %v348_v24 }
 0x197   :  { %424 = vmatprep.subr.bf16.mxu1 %v353_v25 }
 0x19a   :  { %425 = vmatpush1.bf16.msra.mxu1 %v352_v26 }
 0x19b   :  { %426 = vmatprep.subr.bf16.mxu1 %v357_v27  ;;  %v2670_v27 = vsub.s32 2, %v2628_v57 }
 0x19e   :  { %427 = vmatpush1.bf16.msra.mxu1 %v356_v28  ;;  %v2673_v28 = vsub.s32 3, %v2628_v57 }
 0x19f   :  { %428 = vmatprep.subr.bf16.mxu1 %v361_v29  ;;  %v399_v29 = vrot.slane %v384_v14, %v2670_v27 }
 0x1a2   :  { %429 = vmatpush1.bf16.msra.mxu1 %v360_v30  ;;  %v403_v30 = vrot.slane %v384_v14, %v2673_v28 }
 0x1a3   :  { %430 = vmatprep.subr.bf16.mxu1 %v365_v31 }
 0x1a6   :  { %431 = vmatpush1.bf16.msra.mxu1 %v364_v32 }
 0x1a7   :  { %432 = vmatprep.subr.bf16.mxu1 %v369_v33 }
 0x1aa   :  { %433 = vmatpush1.bf16.msra.mxu1 %v368_v34 }
 0x1ab   :  { %434 = vmatprep.subr.bf16.mxu1 %v373_v35 }
 0x1ae   :  { %435 = vmatpush1.bf16.msra.mxu1 %v372_v36 }
 0x1af   :  { %436 = vmatprep.subr.bf16.mxu1 %v377_v37 }
 0x1b2   :  { %437 = vmatpush1.bf16.msra.mxu1 %v376_v38 }
 0x1b3   :  { %438 = vmatprep.subr.bf16.mxu1 %v381_v39 }
 0x1b6   :  { %439 = vmatpush1.bf16.msra.mxu1 %v380_v41 }
 0x1b7   :  { %449 = vmatprep.subr.bf16.mxu1 %v323_v42 }
 0x1b9   :  { %441 = vmatmul.mubr.bf16.vlgmr.msra.gmra.mrb[0].mxu1 %v2654_v43 }
 0x1ba   :  { %450 = vmatpush1.bf16.msra.mxu1 %v322_v44  ;;  %481 = vmatprep.mubr.bf16.mxu1 %v2640_v8  ;;  %v375_v8 = vld [vmem:[#allocation2 + $0x5b8] sm:$0xff] }
 0x1bb   :  { %451 = vmatprep.subr.bf16.mxu1 %v327_v45  ;;  %535 = dma.general %s2929_s6, 8192, %s2583_s19, %s2437_s26, %s2441_s5, [#allocation17], %s2566_s21, 0  }
 0x1be   :  { %452 = vmatpush1.bf16.msra.mxu1 %v326_v46 }
 0x1bf   :  { %453 = vmatprep.subr.bf16.mxu1 %v331_v47 }
 0x1c2   :  { %454 = vmatpush1.bf16.msra.mxu1 %v330_v48 }
 0x1c3   :  { %455 = vmatprep.subr.bf16.mxu1 %v335_v49 }
 0x1c6   :  { %456 = vmatpush1.bf16.msra.mxu1 %v334_v50 }
 0x1c7   :  { %457 = vmatprep.subr.bf16.mxu1 %v339_v51 }
 0x1ca   :  { %458 = vmatpush1.bf16.msra.mxu1 %v338_v52 }
 0x1cb   :  { %459 = vmatprep.subr.bf16.mxu1 %v343_v53 }
 0x1ce   :  { %460 = vmatpush1.bf16.msra.mxu1 %v342_v54 }
 0x1cf   :  { %461 = vmatprep.subr.bf16.mxu1 %v347_v55 }
 0x1d2   :  { %462 = vmatpush1.bf16.msra.mxu1 %v346_v56 }
 0x1d3   :  { %463 = vmatprep.subr.bf16.mxu1 %v351_v60 }
 0x1d6   :  { %464 = vmatpush1.bf16.msra.mxu1 %v350_v61 }
 0x1d7   :  { %465 = vmatprep.subr.bf16.mxu1 %v355_v62 }
 0x1da   :  { %466 = vmatpush1.bf16.msra.mxu1 %v354_v63 }
 0x1db   :  { %467 = vmatprep.subr.bf16.mxu1 %v359_v0 }
 0x1de   :  { %468 = vmatpush1.bf16.msra.mxu1 %v358_v1 }
 0x1df   :  { %469 = vmatprep.subr.bf16.mxu1 %v363_v2 }
 0x1e2   :  { %470 = vmatpush1.bf16.msra.mxu1 %v362_v3 }
 0x1e3   :  { %471 = vmatprep.subr.bf16.mxu1 %v367_v4 }
 0x1e6   :  { %472 = vmatpush1.bf16.msra.mxu1 %v366_v5 }
 0x1e7   :  { %473 = vmatprep.subr.bf16.mxu1 %v371_v6 }
 0x1ea   :  { %474 = vmatpush1.bf16.msra.mxu1 %v370_v7 }
 0x1eb   :  { %475 = vmatprep.subr.bf16.mxu1 %v375_v8 }
 0x1ee   :  { %476 = vmatpush1.bf16.msra.mxu1 %v374_v9 }
 0x1ef   :  { %477 = vmatprep.subr.bf16.mxu1 %v379_v10 }
 0x1f2   :  { %478 = vmatpush1.bf16.msra.mxu1 %v378_v11 }
 0x1f3   :  { %479 = vmatprep.subr.bf16.mxu1 %v383_v12 }
 0x1f6   :  { %480 = vmatpush1.bf16.msra.mxu1 %v382_v13 }
 0x1f9   :  { %482 = vmatmul.mubr.bf16.vlgmr.msra.gmra.mrb[4].mxu1 %v2654_v43 }
 0x28c   :  { %v442_v17 = vpop.f32.mrb[0].mxu1 }
 0x28d   :  { %v443_v18 = vadd.f32 %v442_v17, %v391_v15  ;;  %v444_v19 = vpop.f32.mrb[1].mxu1 }
 0x28e   :  { %v445_v20 = vadd.f32 %v444_v19, %v395_v16  ;;  %v446_v21 = vpop.f32.mrb[2].mxu1 }
 0x28f   :  { %vm490_vm2 = vcmp.gt.f32.partialorder %v443_v18, 0.0  ;;  %v494_v22 = vmul.f32 0.2, %v443_v18  ;;  %v447_v23 = vpop.f32.mrb[3].mxu1 }
 0x290   :  { %vm491_vm3 = vcmp.gt.f32.partialorder %v445_v20, 0.0  ;;  %v495_v24 = vmul.f32 0.2, %v445_v20 }
 0x291   :  { %v2667_v25 = vsel %vm490_vm2, %v443_v18, %v494_v22 }
 0x292   :  { %v499_v26 = vsel %vm491_vm3, %v445_v20, %v495_v24 }
 0x2cc   :  { %v483_v31 = vpop.f32.mrb[4].mxu1 }
 0x2cd   :  { %v484_v32 = vadd.f32 %v483_v31, %v399_v29  ;;  %v485_v33 = vpop.f32.mrb[5].mxu1 }
 0x2ce   :  { %v486_v34 = vadd.f32 %v485_v33, %v403_v30  ;;  %v487_v35 = vpop.f32.mrb[6].mxu1 }
 0x2cf   :  { %vm492_vm4 = vcmp.gt.f32.partialorder %v484_v32, 0.0  ;;  %v496_v36 = vmul.f32 0.2, %v484_v32  ;;  %v488_v37 = vpop.f32.mrb[7].mxu1 }
 0x2d0   :  { %vm493_vm5 = vcmp.gt.f32.partialorder %v486_v34, 0.0  ;;  %v497_v38 = vmul.f32 0.2, %v486_v34 }
 0x2d1   :  { %v2677_v39 = vsel %vm492_vm4, %v484_v32, %v496_v36 }
 0x2d2   :  { %v2679_v41 = vsel %vm493_vm5, %v486_v34, %v497_v38 }
 0x2d3   :  { %2405 = dma.done.wait [#allocation3], 16384 }
 0x2d4   :  { %2406 = vsyncadd [#allocation3], 4294950912  ;;  %v670_v57 = vpack.c.bf16 %v499_v26, %v499_v26  ;;  %v541_v42 = vld [vmem:[#allocation2 + $0x8] sm:$0xff]  ;;  %v543_v43 = vld [vmem:[#allocation2 + $0x18] sm:$0xff] }
 0x2d5   :  { %v540_v44 = vld [vmem:[#allocation2] sm:$0xff]  ;;  %694 = vmatprep.subr.bf16.mxu0 %v541_v42  ;;  %776 = vmatprep.subr.bf16.mxu1 %v543_v43  ;;  %v542_v46 = vld [vmem:[#allocation2 + $0x10] sm:$0xff]  ;;  %v545_v47 = vld [vmem:[#allocation2 + $0x28] sm:$0xff] }
 0x2d6   :  { %726 = vmatprep.mubr.bf16.mxu0 %v670_v57  ;;  %808 = vmatprep.mubr.bf16.mxu1 %v670_v57  ;;  %v932_v45 = vld [vmem:[%s2930_s7] sm:$0xff]  ;;  %v547_v48 = vld [vmem:[#allocation2 + $0x38] sm:$0xff]  ;;  %v934_v50 = vld [vmem:[%s2930_s7 + $0x8] sm:$0xff] }
 0x2d7   :  { %695 = vmatpush1.bf16.msra.mxu0 %v540_v44  ;;  %933 = vst [vmem:[#allocation2] sm:$0xff] %v932_v45  ;;  %777 = vmatpush1.bf16.msra.mxu1 %v542_v46  ;;  %v544_v49 = vld [vmem:[#allocation2 + $0x20] sm:$0xff]  ;;  %v546_v51 = vld [vmem:[#allocation2 + $0x30] sm:$0xff]  ;;  %v549_v52 = vld [vmem:[#allocation2 + $0x48] sm:$0xff] }
 0x2d8   :  { %696 = vmatprep.subr.bf16.mxu0 %v545_v47  ;;  %778 = vmatprep.subr.bf16.mxu1 %v547_v48  ;;  %935 = vst [vmem:[#allocation2 + $0x20] sm:$0xff] %v934_v50  ;;  %v551_v53 = vld [vmem:[#allocation2 + $0x58] sm:$0xff]  ;;  %v548_v54 = vld [vmem:[#allocation2 + $0x40] sm:$0xff]  ;;  %v936_v55 = vld [vmem:[%s2930_s7 + $0x10] sm:$0xff] }
 0x2d9   :  { %937 = vst [vmem:[#allocation2 + $0x40] sm:$0xff] %v936_v55  ;;  %v552_v56 = vld [vmem:[#allocation2 + $0x60] sm:$0xff]  ;;  %v938_v60 = vld [vmem:[%s2930_s7 + $0x18] sm:$0xff]  ;;  %v550_v61 = vld [vmem:[#allocation2 + $0x50] sm:$0xff] }
 0x2da   :  { %939 = vst [vmem:[#allocation2 + $0x60] sm:$0xff] %v938_v60  ;;  %v556_v62 = vld [vmem:[#allocation2 + $0x80] sm:$0xff]  ;;  %v553_v0 = vld [vmem:[#allocation2 + $0x68] sm:$0xff]  ;;  %v555_v1 = vld [vmem:[#allocation2 + $0x78] sm:$0xff] }
 0x2db   :  { %697 = vmatpush1.bf16.msra.mxu0 %v544_v49  ;;  %779 = vmatpush1.bf16.msra.mxu1 %v546_v51  ;;  %v940_v63 = vld [vmem:[%s2930_s7 + $0x20] sm:$0xff]  ;;  %v942_v3 = vld [vmem:[%s2930_s7 + $0x28] sm:$0xff]  ;;  %v554_v4 = vld [vmem:[#allocation2 + $0x70] sm:$0xff] }
 0x2dc   :  { %698 = vmatprep.subr.bf16.mxu0 %v549_v52  ;;  %780 = vmatprep.subr.bf16.mxu1 %v551_v53  ;;  %941 = vst [vmem:[#allocation2 + $0x80] sm:$0xff] %v940_v63  ;;  %v560_v2 = vld [vmem:[#allocation2 + $0xa0] sm:$0xff]  ;;  %v557_v5 = vld [vmem:[#allocation2 + $0x88] sm:$0xff]  ;;  %v944_v7 = vld [vmem:[%s2930_s7 + $0x30] sm:$0xff] }
 0x2dd   :  { %943 = vst [vmem:[#allocation2 + $0xa0] sm:$0xff] %v942_v3  ;;  %v564_v6 = vld [vmem:[#allocation2 + $0xc0] sm:$0xff]  ;;  %v559_v8 = vld [vmem:[#allocation2 + $0x98] sm:$0xff]  ;;  %v558_v13 = vld [vmem:[#allocation2 + $0x90] sm:$0xff] }
 0x2de   :  { %945 = vst [vmem:[#allocation2 + $0xc0] sm:$0xff] %v944_v7  ;;  %v568_v9 = vld [vmem:[#allocation2 + $0xe0] sm:$0xff]  ;;  %v946_v10 = vld [vmem:[%s2930_s7 + $0x38] sm:$0xff]  ;;  %v561_v14 = vld [vmem:[#allocation2 + $0xa8] sm:$0xff]  ;;  %v669_v7 = vpack.c.bf16 %v2667_v25, %v2667_v25 }
 0x2df   :  { %699 = vmatpush1.bf16.msra.mxu0 %v548_v54  ;;  %781 = vmatpush1.bf16.msra.mxu1 %v550_v61  ;;  %947 = vst [vmem:[#allocation2 + $0xe0] sm:$0xff] %v946_v10  ;;  %v572_v11 = vld [vmem:[#allocation2 + $0x100] sm:$0xff]  ;;  %v563_v15 = vld [vmem:[#allocation2 + $0xb8] sm:$0xff]  ;;  %v950_v17 = vld [vmem:[%s2930_s7 + $0x48] sm:$0xff] }
 0x2e0   :  { %700 = vmatprep.subr.bf16.mxu0 %v553_v0  ;;  %782 = vmatprep.subr.bf16.mxu1 %v555_v1  ;;  %v948_v12 = vld [vmem:[%s2930_s7 + $0x40] sm:$0xff]  ;;  %v952_v19 = vld [vmem:[%s2930_s7 + $0x50] sm:$0xff]  ;;  %v954_v22 = vld [vmem:[%s2930_s7 + $0x58] sm:$0xff] }
 0x2e1   :  { %949 = vst [vmem:[#allocation2 + $0x100] sm:$0xff] %v948_v12  ;;  %v576_v16 = vld [vmem:[#allocation2 + $0x120] sm:$0xff]  ;;  %v562_v20 = vld [vmem:[#allocation2 + $0xb0] sm:$0xff]  ;;  %v565_v23 = vld [vmem:[#allocation2 + $0xc8] sm:$0xff]  ;;  %v672_v12 = vpack.c.bf16 %v2679_v41, %v2679_v41 }
 0x2e2   :  { %951 = vst [vmem:[#allocation2 + $0x120] sm:$0xff] %v950_v17  ;;  %v580_v18 = vld [vmem:[#allocation2 + $0x140] sm:$0xff]  ;;  %v567_v24 = vld [vmem:[#allocation2 + $0xd8] sm:$0xff]  ;;  %v958_v31 = vld [vmem:[%s2930_s7 + $0x68] sm:$0xff] }
 0x2e3   :  { %701 = vmatpush1.bf16.msra.mxu0 %v552_v56  ;;  %783 = vmatpush1.bf16.msra.mxu1 %v554_v4  ;;  %953 = vst [vmem:[#allocation2 + $0x140] sm:$0xff] %v952_v19  ;;  %v584_v21 = vld [vmem:[#allocation2 + $0x160] sm:$0xff]  ;;  %v566_v32 = vld [vmem:[#allocation2 + $0xd0] sm:$0xff]  ;;  %v569_v33 = vld [vmem:[#allocation2 + $0xe8] sm:$0xff] }
 0x2e4   :  { %702 = vmatprep.subr.bf16.mxu0 %v557_v5  ;;  %784 = vmatprep.subr.bf16.mxu1 %v559_v8  ;;  %955 = vst [vmem:[#allocation2 + $0x160] sm:$0xff] %v954_v22  ;;  %v588_v26 = vld [vmem:[#allocation2 + $0x180] sm:$0xff]  ;;  %v571_v34 = vld [vmem:[#allocation2 + $0xf8] sm:$0xff]  ;;  %v960_v36 = vld [vmem:[%s2930_s7 + $0x70] sm:$0xff] }
 0x2e5   :  { %v956_v29 = vld [vmem:[%s2930_s7 + $0x60] sm:$0xff]  ;;  %v962_v38 = vld [vmem:[%s2930_s7 + $0x78] sm:$0xff]  ;;  %v570_v57 = vld [vmem:[#allocation2 + $0xf0] sm:$0xff] }
 0x2e6   :  { %957 = vst [vmem:[#allocation2 + $0x180] sm:$0xff] %v956_v29  ;;  %v592_v30 = vld [vmem:[#allocation2 + $0x1a0] sm:$0xff]  ;;  %v573_v42 = vld [vmem:[#allocation2 + $0x108] sm:$0xff]  ;;  %v575_v43 = vld [vmem:[#allocation2 + $0x118] sm:$0xff] }
 0x2e7   :  { %703 = vmatpush1.bf16.msra.mxu0 %v556_v62  ;;  %785 = vmatpush1.bf16.msra.mxu1 %v558_v13  ;;  %959 = vst [vmem:[#allocation2 + $0x1a0] sm:$0xff] %v958_v31  ;;  %v596_v35 = vld [vmem:[#allocation2 + $0x1c0] sm:$0xff]  ;;  %v574_v44 = vld [vmem:[#allocation2 + $0x110] sm:$0xff]  ;;  %v577_v45 = vld [vmem:[#allocation2 + $0x128] sm:$0xff] }
 0x2e8   :  { %704 = vmatprep.subr.bf16.mxu0 %v561_v14  ;;  %786 = vmatprep.subr.bf16.mxu1 %v563_v15  ;;  %961 = vst [vmem:[#allocation2 + $0x1c0] sm:$0xff] %v960_v36  ;;  %v2726_v37 = vld [vmem:[#allocation2 + $0x1e0] sm:$0xff]  ;;  %v579_v46 = vld [vmem:[#allocation2 + $0x138] sm:$0xff]  ;;  %v578_v47 = vld [vmem:[#allocation2 + $0x130] sm:$0xff] }
 0x2e9   :  { %963 = vst [vmem:[#allocation2 + $0x1e0] sm:$0xff] %v962_v38  ;;  %v581_v48 = vld [vmem:[#allocation2 + $0x148] sm:$0xff]  ;;  %v583_v49 = vld [vmem:[#allocation2 + $0x158] sm:$0xff]  ;;  %v582_v50 = vld [vmem:[#allocation2 + $0x150] sm:$0xff] }
 0x2ea   :  { %v585_v51 = vld [vmem:[#allocation2 + $0x168] sm:$0xff]  ;;  %v587_v52 = vld [vmem:[#allocation2 + $0x178] sm:$0xff]  ;;  %v586_v53 = vld [vmem:[#allocation2 + $0x170] sm:$0xff] }
 0x2eb   :  { %705 = vmatpush1.bf16.msra.mxu0 %v560_v2  ;;  %787 = vmatpush1.bf16.msra.mxu1 %v562_v20  ;;  %v589_v54 = vld [vmem:[#allocation2 + $0x188] sm:$0xff]  ;;  %v591_v55 = vld [vmem:[#allocation2 + $0x198] sm:$0xff]  ;;  %v590_v56 = vld [vmem:[#allocation2 + $0x190] sm:$0xff] }
 0x2ec   :  { %706 = vmatprep.subr.bf16.mxu0 %v565_v23  ;;  %788 = vmatprep.subr.bf16.mxu1 %v567_v24  ;;  %v593_v60 = vld [vmem:[#allocation2 + $0x1a8] sm:$0xff]  ;;  %v595_v61 = vld [vmem:[#allocation2 + $0x1b8] sm:$0xff]  ;;  %v594_v62 = vld [vmem:[#allocation2 + $0x1b0] sm:$0xff] }
 0x2ed   :  { %v597_v63 = vld [vmem:[#allocation2 + $0x1c8] sm:$0xff]  ;;  %v599_v0 = vld [vmem:[#allocation2 + $0x1d8] sm:$0xff]  ;;  %v598_v1 = vld [vmem:[#allocation2 + $0x1d0] sm:$0xff] }
 0x2ee   :  { %v601_v2 = vld [vmem:[#allocation2 + $0x1e8] sm:$0xff]  ;;  %v603_v3 = vld [vmem:[#allocation2 + $0x1f8] sm:$0xff]  ;;  %v602_v4 = vld [vmem:[#allocation2 + $0x1f0] sm:$0xff] }
 0x2ef   :  { %707 = vmatpush1.bf16.msra.mxu0 %v564_v6  ;;  %789 = vmatpush1.bf16.msra.mxu1 %v566_v32  ;;  %v605_v5 = vld [vmem:[#allocation2 + $0x208] sm:$0xff]  ;;  %v607_v6 = vld [vmem:[#allocation2 + $0x218] sm:$0xff]  ;;  %v604_v8 = vld [vmem:[#allocation2 + $0x200] sm:$0xff] }
 0x2f0   :  { %708 = vmatprep.subr.bf16.mxu0 %v569_v33  ;;  %790 = vmatprep.subr.bf16.mxu1 %v571_v34  ;;  %v609_v10 = vld [vmem:[#allocation2 + $0x228] sm:$0xff]  ;;  %v608_v13 = vld [vmem:[#allocation2 + $0x220] sm:$0xff]  ;;  %v610_v25 = vld [vmem:[#allocation2 + $0x230] sm:$0xff] }
 0x2f1   :  { %v613_v14 = vld [vmem:[#allocation2 + $0x248] sm:$0xff]  ;;  %v615_v15 = vld [vmem:[#allocation2 + $0x258] sm:$0xff]  ;;  %v614_v17 = vld [vmem:[#allocation2 + $0x250] sm:$0xff] }
 0x2f2   :  { %v619_v41 = vld [vmem:[#allocation2 + $0x278] sm:$0xff]  ;;  %v616_v19 = vld [vmem:[#allocation2 + $0x260] sm:$0xff]  ;;  %v618_v20 = vld [vmem:[#allocation2 + $0x270] sm:$0xff] }
 0x2f3   :  { %709 = vmatpush1.bf16.msra.mxu0 %v568_v9  ;;  %791 = vmatpush1.bf16.msra.mxu1 %v570_v57  ;;  %v606_v9 = vld [vmem:[#allocation2 + $0x210] sm:$0xff]  ;;  %v623_v22 = vld [vmem:[#allocation2 + $0x298] sm:$0xff]  ;;  %v620_v23 = vld [vmem:[#allocation2 + $0x280] sm:$0xff] }
 0x2f4   :  { %710 = vmatprep.subr.bf16.mxu0 %v573_v42  ;;  %792 = vmatprep.subr.bf16.mxu1 %v575_v43  ;;  %v622_v24 = vld [vmem:[#allocation2 + $0x290] sm:$0xff]  ;;  %v627_v29 = vld [vmem:[#allocation2 + $0x2b8] sm:$0xff]  ;;  %v629_v32 = vld [vmem:[#allocation2 + $0x2c8] sm:$0xff] }
 0x2f5   :  { %v626_v31 = vld [vmem:[#allocation2 + $0x2b0] sm:$0xff]  ;;  %v631_v33 = vld [vmem:[#allocation2 + $0x2d8] sm:$0xff]  ;;  %v628_v34 = vld [vmem:[#allocation2 + $0x2c0] sm:$0xff] }
 0x2f6   :  { %v633_v36 = vld [vmem:[#allocation2 + $0x2e8] sm:$0xff]  ;;  %v632_v38 = vld [vmem:[#allocation2 + $0x2e0] sm:$0xff]  ;;  %v634_v57 = vld [vmem:[#allocation2 + $0x2f0] sm:$0xff] }
 0x2f7   :  { %711 = vmatpush1.bf16.msra.mxu0 %v572_v11  ;;  %793 = vmatpush1.bf16.msra.mxu1 %v574_v44  ;;  %v611_v11 = vld [vmem:[#allocation2 + $0x238] sm:$0xff]  ;;  %v637_v42 = vld [vmem:[#allocation2 + $0x308] sm:$0xff]  ;;  %v636_v44 = vld [vmem:[#allocation2 + $0x300] sm:$0xff] }
 0x2f8   :  { %712 = vmatprep.subr.bf16.mxu0 %v577_v45  ;;  %794 = vmatprep.subr.bf16.mxu1 %v579_v46  ;;  %v639_v43 = vld [vmem:[#allocation2 + $0x318] sm:$0xff]  ;;  %v638_v45 = vld [vmem:[#allocation2 + $0x310] sm:$0xff]  ;;  %v641_v46 = vld [vmem:[#allocation2 + $0x328] sm:$0xff] }
 0x2fb   :  { %713 = vmatpush1.bf16.msra.mxu0 %v576_v16  ;;  %795 = vmatpush1.bf16.msra.mxu1 %v578_v47  ;;  %v612_v16 = vld [vmem:[#allocation2 + $0x240] sm:$0xff]  ;;  %v643_v47 = vld [vmem:[#allocation2 + $0x338] sm:$0xff] }
 0x2fc   :  { %714 = vmatprep.subr.bf16.mxu0 %v581_v48  ;;  %796 = vmatprep.subr.bf16.mxu1 %v583_v49  ;;  %v640_v48 = vld [vmem:[#allocation2 + $0x320] sm:$0xff]  ;;  %v642_v49 = vld [vmem:[#allocation2 + $0x330] sm:$0xff] }
 0x2ff   :  { %715 = vmatpush1.bf16.msra.mxu0 %v580_v18  ;;  %797 = vmatpush1.bf16.msra.mxu1 %v582_v50  ;;  %v617_v18 = vld [vmem:[#allocation2 + $0x268] sm:$0xff] }
 0x300   :  { %716 = vmatprep.subr.bf16.mxu0 %v585_v51  ;;  %798 = vmatprep.subr.bf16.mxu1 %v587_v52  ;;  %v645_v50 = vld [vmem:[#allocation2 + $0x348] sm:$0xff]  ;;  %v647_v51 = vld [vmem:[#allocation2 + $0x358] sm:$0xff]  ;;  %v644_v52 = vld [vmem:[#allocation2 + $0x340] sm:$0xff] }
 0x303   :  { %717 = vmatpush1.bf16.msra.mxu0 %v584_v21  ;;  %799 = vmatpush1.bf16.msra.mxu1 %v586_v53  ;;  %v621_v21 = vld [vmem:[#allocation2 + $0x288] sm:$0xff]  ;;  %v646_v53 = vld [vmem:[#allocation2 + $0x350] sm:$0xff] }
 0x304   :  { %718 = vmatprep.subr.bf16.mxu0 %v589_v54  ;;  %800 = vmatprep.subr.bf16.mxu1 %v591_v55  ;;  %v649_v54 = vld [vmem:[#allocation2 + $0x368] sm:$0xff]  ;;  %v651_v55 = vld [vmem:[#allocation2 + $0x378] sm:$0xff] }
 0x307   :  { %719 = vmatpush1.bf16.msra.mxu0 %v588_v26  ;;  %801 = vmatpush1.bf16.msra.mxu1 %v590_v56  ;;  %v625_v26 = vld [vmem:[#allocation2 + $0x2a8] sm:$0xff]  ;;  %v648_v56 = vld [vmem:[#allocation2 + $0x360] sm:$0xff] }
 0x308   :  { %720 = vmatprep.subr.bf16.mxu0 %v593_v60  ;;  %802 = vmatprep.subr.bf16.mxu1 %v595_v61  ;;  %v650_v60 = vld [vmem:[#allocation2 + $0x370] sm:$0xff]  ;;  %v653_v61 = vld [vmem:[#allocation2 + $0x388] sm:$0xff] }
 0x30b   :  { %721 = vmatpush1.bf16.msra.mxu0 %v592_v30  ;;  %803 = vmatpush1.bf16.msra.mxu1 %v594_v62  ;;  %v624_v30 = vld [vmem:[#allocation2 + $0x2a0] sm:$0xff]  ;;  %v655_v62 = vld [vmem:[#allocation2 + $0x398] sm:$0xff] }
 0x30c   :  { %722 = vmatprep.subr.bf16.mxu0 %v597_v63  ;;  %804 = vmatprep.subr.bf16.mxu1 %v599_v0  ;;  %v652_v63 = vld [vmem:[#allocation2 + $0x380] sm:$0xff]  ;;  %v654_v0 = vld [vmem:[#allocation2 + $0x390] sm:$0xff] }
 0x30f   :  { %723 = vmatpush1.bf16.msra.mxu0 %v596_v35  ;;  %805 = vmatpush1.bf16.msra.mxu1 %v598_v1  ;;  %v630_v35 = vld [vmem:[#allocation2 + $0x2d0] sm:$0xff]  ;;  %v657_v1 = vld [vmem:[#allocation2 + $0x3a8] sm:$0xff] }
 0x310   :  { %724 = vmatprep.subr.bf16.mxu0 %v601_v2  ;;  %806 = vmatprep.subr.bf16.mxu1 %v603_v3  ;;  %v659_v2 = vld [vmem:[#allocation2 + $0x3b8] sm:$0xff]  ;;  %v656_v3 = vld [vmem:[#allocation2 + $0x3a0] sm:$0xff] }
 0x313   :  { %725 = vmatpush1.bf16.msra.mxu0 %v2726_v37  ;;  %807 = vmatpush1.bf16.msra.mxu1 %v602_v4  ;;  %v635_v37 = vld [vmem:[#allocation2 + $0x2f8] sm:$0xff]  ;;  %v658_v4 = vld [vmem:[#allocation2 + $0x3b0] sm:$0xff] }
 0x314   :  { %735 = vmatprep.subr.bf16.mxu0 %v605_v5  ;;  %817 = vmatprep.subr.bf16.mxu1 %v607_v6  ;;  %v661_v5 = vld [vmem:[#allocation2 + $0x3c8] sm:$0xff]  ;;  %v663_v6 = vld [vmem:[#allocation2 + $0x3d8] sm:$0xff] }
 0x316   :  { %727 = vmatmul.mubr.bf16.vlgmr.msra.gmra.mrb[4].mxu0 %v669_v7  ;;  %809 = vmatmul.mubr.bf16.vlgmr.msra.gmra.mrb[8].mxu1 %v669_v7  ;;  %v660_v7 = vld [vmem:[#allocation2 + $0x3c0] sm:$0xff] }
 0x317   :  { %736 = vmatpush1.bf16.msra.mxu0 %v604_v8  ;;  %818 = vmatpush1.bf16.msra.mxu1 %v606_v9  ;;  %v662_v8 = vld [vmem:[#allocation2 + $0x3d0] sm:$0xff]  ;;  %v665_v9 = vld [vmem:[#allocation2 + $0x3e8] sm:$0xff] }
 0x318   :  { %737 = vmatprep.subr.bf16.mxu0 %v609_v10  ;;  %819 = vmatprep.subr.bf16.mxu1 %v611_v11  ;;  %v667_v10 = vld [vmem:[#allocation2 + $0x3f8] sm:$0xff]  ;;  %v664_v11 = vld [vmem:[#allocation2 + $0x3e0] sm:$0xff] }
 0x319   :  { %767 = vmatprep.mubr.bf16.mxu0 %v672_v12  ;;  %849 = vmatprep.mubr.bf16.mxu1 %v672_v12  ;;  %v666_v12 = vld [vmem:[#allocation2 + $0x3f0] sm:$0xff] }
 0x31b   :  { %738 = vmatpush1.bf16.msra.mxu0 %v608_v13  ;;  %820 = vmatpush1.bf16.msra.mxu1 %v610_v25  ;;  %v671_v13 = vpack.c.bf16 %v2677_v39, %v2677_v39  ;;  %v668_v25 = vld [vmem:[#allocation7 + $0x6] sm:$0xf] }
 0x31c   :  { %739 = vmatprep.subr.bf16.mxu0 %v613_v14  ;;  %821 = vmatprep.subr.bf16.mxu1 %v615_v15  ;;  %v677_v14 = vrot.slane %v668_v25, %v2631_v58  ;;  %v685_v15 = vrot.slane %v668_v25, %v2670_v27 }
 0x31f   :  { %740 = vmatpush1.bf16.msra.mxu0 %v612_v16  ;;  %822 = vmatpush1.bf16.msra.mxu1 %v614_v17  ;;  %v681_v16 = vrot.slane %v668_v25, %v2634_v59  ;;  %v689_v17 = vrot.slane %v668_v25, %v2673_v28 }
 0x320   :  { %741 = vmatprep.subr.bf16.mxu0 %v617_v18  ;;  %823 = vmatprep.subr.bf16.mxu1 %v619_v41 }
 0x323   :  { %742 = vmatpush1.bf16.msra.mxu0 %v616_v19  ;;  %824 = vmatpush1.bf16.msra.mxu1 %v618_v20 }
 0x324   :  { %743 = vmatprep.subr.bf16.mxu0 %v621_v21  ;;  %825 = vmatprep.subr.bf16.mxu1 %v623_v22 }
 0x327   :  { %744 = vmatpush1.bf16.msra.mxu0 %v620_v23  ;;  %826 = vmatpush1.bf16.msra.mxu1 %v622_v24 }
 0x328   :  { %745 = vmatprep.subr.bf16.mxu0 %v625_v26  ;;  %827 = vmatprep.subr.bf16.mxu1 %v627_v29 }
 0x32b   :  { %746 = vmatpush1.bf16.msra.mxu0 %v624_v30  ;;  %828 = vmatpush1.bf16.msra.mxu1 %v626_v31 }
 0x32c   :  { %747 = vmatprep.subr.bf16.mxu0 %v629_v32  ;;  %829 = vmatprep.subr.bf16.mxu1 %v631_v33 }
 0x32f   :  { %748 = vmatpush1.bf16.msra.mxu0 %v628_v34  ;;  %830 = vmatpush1.bf16.msra.mxu1 %v630_v35 }
 0x330   :  { %749 = vmatprep.subr.bf16.mxu0 %v633_v36  ;;  %831 = vmatprep.subr.bf16.mxu1 %v635_v37 }
 0x333   :  { %750 = vmatpush1.bf16.msra.mxu0 %v632_v38  ;;  %832 = vmatpush1.bf16.msra.mxu1 %v634_v57 }
 0x334   :  { %751 = vmatprep.subr.bf16.mxu0 %v637_v42  ;;  %833 = vmatprep.subr.bf16.mxu1 %v639_v43 }
 0x337   :  { %752 = vmatpush1.bf16.msra.mxu0 %v636_v44  ;;  %834 = vmatpush1.bf16.msra.mxu1 %v638_v45 }
 0x338   :  { %753 = vmatprep.subr.bf16.mxu0 %v641_v46  ;;  %835 = vmatprep.subr.bf16.mxu1 %v643_v47 }
 0x33b   :  { %754 = vmatpush1.bf16.msra.mxu0 %v640_v48  ;;  %836 = vmatpush1.bf16.msra.mxu1 %v642_v49 }
 0x33c   :  { %755 = vmatprep.subr.bf16.mxu0 %v645_v50  ;;  %837 = vmatprep.subr.bf16.mxu1 %v647_v51 }
 0x33f   :  { %756 = vmatpush1.bf16.msra.mxu0 %v644_v52  ;;  %838 = vmatpush1.bf16.msra.mxu1 %v646_v53 }
 0x340   :  { %757 = vmatprep.subr.bf16.mxu0 %v649_v54  ;;  %839 = vmatprep.subr.bf16.mxu1 %v651_v55 }
 0x343   :  { %758 = vmatpush1.bf16.msra.mxu0 %v648_v56  ;;  %840 = vmatpush1.bf16.msra.mxu1 %v650_v60 }
 0x344   :  { %759 = vmatprep.subr.bf16.mxu0 %v653_v61  ;;  %841 = vmatprep.subr.bf16.mxu1 %v655_v62 }
 0x347   :  { %760 = vmatpush1.bf16.msra.mxu0 %v652_v63  ;;  %842 = vmatpush1.bf16.msra.mxu1 %v654_v0 }
 0x348   :  { %761 = vmatprep.subr.bf16.mxu0 %v657_v1  ;;  %843 = vmatprep.subr.bf16.mxu1 %v659_v2 }
 0x34b   :  { %762 = vmatpush1.bf16.msra.mxu0 %v656_v3  ;;  %844 = vmatpush1.bf16.msra.mxu1 %v658_v4 }
 0x34c   :  { %763 = vmatprep.subr.bf16.mxu0 %v661_v5  ;;  %845 = vmatprep.subr.bf16.mxu1 %v663_v6 }
 0x34f   :  { %764 = vmatpush1.bf16.msra.mxu0 %v660_v7  ;;  %846 = vmatpush1.bf16.msra.mxu1 %v662_v8 }
 0x350   :  { %765 = vmatprep.subr.bf16.mxu0 %v665_v9  ;;  %847 = vmatprep.subr.bf16.mxu1 %v667_v10 }
 0x353   :  { %766 = vmatpush1.bf16.msra.mxu0 %v664_v11  ;;  %848 = vmatpush1.bf16.msra.mxu1 %v666_v12 }
 0x356   :  { %768 = vmatmul.mubr.bf16.vlgmr.msra.gmra.mrb[4].mxu0 %v671_v13  ;;  %850 = vmatmul.mubr.bf16.vlgmr.msra.gmra.mrb[8].mxu1 %v671_v13 }
 0x429   :  { %v769_v18 = vpop.f32.mrb[4].mxu0  ;;  %v851_v41 = vpop.f32.mrb[8].mxu1 }
 0x42a   :  { %v2229_v19 = vadd.f32 %v769_v18, %v677_v14  ;;  %v2231_v20 = vadd.f32 %v851_v41, %v685_v15  ;;  %v771_v21 = vpop.f32.mrb[5].mxu0  ;;  %v853_v22 = vpop.f32.mrb[9].mxu1 }
 0x42b   :  { %v2230_v39 = vadd.f32 %v771_v21, %v681_v16  ;;  %v2232_v23 = vadd.f32 %v853_v22, %v689_v17  ;;  %v773_v24 = vpop.f32.mrb[6].mxu0  ;;  %v855_v26 = vpop.f32.mrb[10].mxu1 }
 0x42c   :  { %vm858_vm6 = vcmp.gt.f32.partialorder %v2229_v19, 0.0  ;;  %v862_v29 = vmul.f32 0.2, %v2229_v19  ;;  %vm860_vm7 = vcmp.gt.f32.partialorder %v2231_v20, 0.0  ;;  %v864_v30 = vmul.f32 0.2, %v2231_v20 }
 0x42d   :  { %vm859_vm8 = vcmp.gt.f32.partialorder %v2230_v39, 0.0  ;;  %v863_v31 = vmul.f32 0.2, %v2230_v39  ;;  %vm861_vm9 = vcmp.gt.f32.partialorder %v2232_v23, 0.0  ;;  %v865_v32 = vmul.f32 0.2, %v2232_v23 }
 0x42e   :  { %v2742_v33 = vsel %vm858_vm6, %v2229_v19, %v862_v29  ;;  %v2744_v34 = vsel %vm860_vm7, %v2231_v20, %v864_v30  ;;  %v774_v35 = vpop.f32.mrb[7].mxu0  ;;  %v856_v36 = vpop.f32.mrb[11].mxu1 }
 0x42f   :  { %v867_v37 = vsel %vm859_vm8, %v2230_v39, %v863_v31  ;;  %v2746_v38 = vsel %vm861_vm9, %v2232_v23, %v865_v32 }
 0x430   :  { %971 = vsyncadd [#allocation3], 2048 }
 0x431   :  { %2407 = dma.done.wait [#allocation3 + $0x1], 8192 }
 0x432   :  { %2408 = vsyncadd [#allocation3 + $0x1], 4294959104  ;;  %v1041_v57 = vpack.c.bf16 %v867_v37, %v867_v37  ;;  %v976_v42 = vld [vmem:[#allocation2 + $0x408] sm:$0xff]  ;;  %v975_v43 = vld [vmem:[#allocation2 + $0x400] sm:$0xff]  ;;  %v1040_v25 = vpack.c.bf16 %v2742_v33, %v2742_v33  ;;  %v1043_v14 = vpack.c.bf16 %v2746_v38, %v2746_v38  ;;  %s2331_s6 = scalar_lea.hbm %s2931_s8, 1024 }
 0x433   :  { %v978_v44 = vld [vmem:[#allocation2 + $0x428] sm:$0xff]  ;;  %1055 = vmatprep.subr.bf16.mxu0 %v976_v42  ;;  %v977_v45 = vld [vmem:[#allocation2 + $0x420] sm:$0xff]  ;;  %p2332_p2 = scmp.ne.s32.totalorder %s2931_s8, %s2331_s6  ;;  %p2335_p3 = scmp.lt.u32.totalorder %s2331_s6, %s2931_s8 }
 0x434   :  { %1087 = vmatprep.mubr.bf16.mxu0 %v1041_v57  ;;  %1056 = vmatpush1.bf16.msra.mxu0 %v975_v43  ;;  %v980_v46 = vld [vmem:[#allocation2 + $0x448] sm:$0xff]  ;;  %v979_v47 = vld [vmem:[#allocation2 + $0x440] sm:$0xff] }
 0x435   :  { %1057 = vmatprep.subr.bf16.mxu0 %v978_v44  ;;  %v982_v48 = vld [vmem:[#allocation2 + $0x468] sm:$0xff]  ;;  %v981_v49 = vld [vmem:[#allocation2 + $0x460] sm:$0xff]  ;;  %p2337_p4 = pnand %p2335_p3, %p2332_p2 }
 0x436   :  { %v984_v50 = vld [vmem:[#allocation2 + $0x488] sm:$0xff]  ;;  %v983_v51 = vld [vmem:[#allocation2 + $0x480] sm:$0xff] }
 0x437   :  { %v986_v52 = vld [vmem:[#allocation2 + $0x4a8] sm:$0xff]  ;;  %v985_v53 = vld [vmem:[#allocation2 + $0x4a0] sm:$0xff] }
 0x438   :  { %1058 = vmatpush1.bf16.msra.mxu0 %v977_v45  ;;  %v988_v54 = vld [vmem:[#allocation2 + $0x4c8] sm:$0xff]  ;;  %v987_v55 = vld [vmem:[#allocation2 + $0x4c0] sm:$0xff] }
 0x439   :  { %1059 = vmatprep.subr.bf16.mxu0 %v980_v46  ;;  %v990_v56 = vld [vmem:[#allocation2 + $0x4e8] sm:$0xff]  ;;  %v989_v60 = vld [vmem:[#allocation2 + $0x4e0] sm:$0xff] }
 0x43a   :  { %v992_v61 = vld [vmem:[#allocation2 + $0x508] sm:$0xff]  ;;  %v991_v62 = vld [vmem:[#allocation2 + $0x500] sm:$0xff] }
 0x43b   :  { %v994_v63 = vld [vmem:[#allocation2 + $0x528] sm:$0xff]  ;;  %v993_v0 = vld [vmem:[#allocation2 + $0x520] sm:$0xff] }
 0x43c   :  { %1060 = vmatpush1.bf16.msra.mxu0 %v979_v47  ;;  %v996_v1 = vld [vmem:[#allocation2 + $0x548] sm:$0xff]  ;;  %v995_v2 = vld [vmem:[#allocation2 + $0x540] sm:$0xff] }
 0x43d   :  { %1061 = vmatprep.subr.bf16.mxu0 %v982_v48  ;;  %v998_v3 = vld [vmem:[#allocation2 + $0x568] sm:$0xff]  ;;  %v997_v4 = vld [vmem:[#allocation2 + $0x560] sm:$0xff] }
 0x43e   :  { %v1000_v5 = vld [vmem:[#allocation2 + $0x588] sm:$0xff]  ;;  %v999_v6 = vld [vmem:[#allocation2 + $0x580] sm:$0xff] }
 0x43f   :  { %v1002_v7 = vld [vmem:[#allocation2 + $0x5a8] sm:$0xff]  ;;  %v1001_v8 = vld [vmem:[#allocation2 + $0x5a0] sm:$0xff] }
 0x440   :  { %1062 = vmatpush1.bf16.msra.mxu0 %v981_v49  ;;  %v1004_v9 = vld [vmem:[#allocation2 + $0x5c8] sm:$0xff]  ;;  %v1003_v10 = vld [vmem:[#allocation2 + $0x5c0] sm:$0xff] }
 0x441   :  { %1063 = vmatprep.subr.bf16.mxu0 %v984_v50  ;;  %v1006_v11 = vld [vmem:[#allocation2 + $0x5e8] sm:$0xff]  ;;  %v1005_v12 = vld [vmem:[#allocation2 + $0x5e0] sm:$0xff]  ;;  %v1042_v50 = vpack.c.bf16 %v2744_v34, %v2744_v34 }
 0x442   :  { %v1008_v13 = vld [vmem:[#allocation2 + $0x608] sm:$0xff]  ;;  %v1007_v15 = vld [vmem:[#allocation2 + $0x600] sm:$0xff] }
 0x443   :  { %v1010_v16 = vld [vmem:[#allocation2 + $0x628] sm:$0xff]  ;;  %v1009_v17 = vld [vmem:[#allocation2 + $0x620] sm:$0xff] }
 0x444   :  { %1064 = vmatpush1.bf16.msra.mxu0 %v983_v51  ;;  %v1012_v18 = vld [vmem:[#allocation2 + $0x648] sm:$0xff]  ;;  %v1011_v41 = vld [vmem:[#allocation2 + $0x640] sm:$0xff] }
 0x445   :  { %1065 = vmatprep.subr.bf16.mxu0 %v986_v52  ;;  %v1014_v19 = vld [vmem:[#allocation2 + $0x668] sm:$0xff]  ;;  %v1013_v20 = vld [vmem:[#allocation2 + $0x660] sm:$0xff] }
 0x446   :  { %v1016_v21 = vld [vmem:[#allocation2 + $0x688] sm:$0xff]  ;;  %v1015_v22 = vld [vmem:[#allocation2 + $0x680] sm:$0xff] }
 0x447   :  { %v1018_v39 = vld [vmem:[#allocation2 + $0x6a8] sm:$0xff]  ;;  %v1017_v23 = vld [vmem:[#allocation2 + $0x6a0] sm:$0xff] }
 0x448   :  { %1066 = vmatpush1.bf16.msra.mxu0 %v985_v53  ;;  %v1020_v24 = vld [vmem:[#allocation2 + $0x6c8] sm:$0xff]  ;;  %v1019_v26 = vld [vmem:[#allocation2 + $0x6c0] sm:$0xff] }
 0x449   :  { %1067 = vmatprep.subr.bf16.mxu0 %v988_v54  ;;  %v1022_v29 = vld [vmem:[#allocation2 + $0x6e8] sm:$0xff]  ;;  %v1021_v30 = vld [vmem:[#allocation2 + $0x6e0] sm:$0xff] }
 0x44a   :  { %v1024_v31 = vld [vmem:[#allocation2 + $0x708] sm:$0xff]  ;;  %v1023_v32 = vld [vmem:[#allocation2 + $0x700] sm:$0xff] }
 0x44b   :  { %v1026_v33 = vld [vmem:[#allocation2 + $0x728] sm:$0xff]  ;;  %v1025_v35 = vld [vmem:[#allocation2 + $0x720] sm:$0xff] }
 0x44c   :  { %1068 = vmatpush1.bf16.msra.mxu0 %v987_v55  ;;  %v1028_v36 = vld [vmem:[#allocation2 + $0x748] sm:$0xff]  ;;  %v1027_v37 = vld [vmem:[#allocation2 + $0x740] sm:$0xff] }
 0x44d   :  { %1069 = vmatprep.subr.bf16.mxu0 %v990_v56  ;;  %v1030_v38 = vld [vmem:[#allocation2 + $0x768] sm:$0xff]  ;;  %v1029_v57 = vld [vmem:[#allocation2 + $0x760] sm:$0xff] }
 0x44e   :  { %v1032_v42 = vld [vmem:[#allocation2 + $0x788] sm:$0xff]  ;;  %v1031_v43 = vld [vmem:[#allocation2 + $0x780] sm:$0xff] }
 0x44f   :  { %v1034_v44 = vld [vmem:[#allocation2 + $0x7a8] sm:$0xff]  ;;  %v1033_v45 = vld [vmem:[#allocation2 + $0x7a0] sm:$0xff] }
 0x450   :  { %1070 = vmatpush1.bf16.msra.mxu0 %v989_v60  ;;  %v1036_v46 = vld [vmem:[#allocation2 + $0x7c8] sm:$0xff]  ;;  %v1035_v47 = vld [vmem:[#allocation2 + $0x7c0] sm:$0xff] }
 0x451   :  { %1071 = vmatprep.subr.bf16.mxu0 %v992_v61  ;;  %v1038_v48 = vld [vmem:[#allocation2 + $0x7e8] sm:$0xff]  ;;  %v1037_v49 = vld [vmem:[#allocation2 + $0x7e0] sm:$0xff] }
 0x454   :  { %1072 = vmatpush1.bf16.msra.mxu0 %v991_v62 }
 0x455   :  { %1073 = vmatprep.subr.bf16.mxu0 %v994_v63 }
 0x458   :  { %1074 = vmatpush1.bf16.msra.mxu0 %v993_v0 }
 0x459   :  { %1075 = vmatprep.subr.bf16.mxu0 %v996_v1 }
 0x45c   :  { %1076 = vmatpush1.bf16.msra.mxu0 %v995_v2 }
 0x45d   :  { %1077 = vmatprep.subr.bf16.mxu0 %v998_v3 }
 0x460   :  { %1078 = vmatpush1.bf16.msra.mxu0 %v997_v4 }
 0x461   :  { %1079 = vmatprep.subr.bf16.mxu0 %v1000_v5 }
 0x464   :  { %1080 = vmatpush1.bf16.msra.mxu0 %v999_v6 }
 0x465   :  { %1081 = vmatprep.subr.bf16.mxu0 %v1002_v7 }
 0x468   :  { %1082 = vmatpush1.bf16.msra.mxu0 %v1001_v8 }
 0x469   :  { %1083 = vmatprep.subr.bf16.mxu0 %v1004_v9 }
 0x46c   :  { %1084 = vmatpush1.bf16.msra.mxu0 %v1003_v10 }
 0x46d   :  { %1085 = vmatprep.subr.bf16.mxu0 %v1006_v11 }
 0x470   :  { %1086 = vmatpush1.bf16.msra.mxu0 %v1005_v12 }
 0x471   :  { %1096 = vmatprep.subr.bf16.mxu0 %v1008_v13 }
 0x473   :  { %1088 = vmatmul.mubr.bf16.vlgmr.msra.gmra.mrb[8].mxu0 %v1040_v25 }
 0x474   :  { %1097 = vmatpush1.bf16.msra.mxu0 %v1007_v15  ;;  %1128 = vmatprep.mubr.bf16.mxu0 %v1043_v14 }
 0x475   :  { %1098 = vmatprep.subr.bf16.mxu0 %v1010_v16 }
 0x478   :  { %1099 = vmatpush1.bf16.msra.mxu0 %v1009_v17 }
 0x479   :  { %1100 = vmatprep.subr.bf16.mxu0 %v1012_v18 }
 0x47c   :  { %1101 = vmatpush1.bf16.msra.mxu0 %v1011_v41 }
 0x47d   :  { %1102 = vmatprep.subr.bf16.mxu0 %v1014_v19 }
 0x480   :  { %1103 = vmatpush1.bf16.msra.mxu0 %v1013_v20 }
 0x481   :  { %1104 = vmatprep.subr.bf16.mxu0 %v1016_v21 }
 0x484   :  { %1105 = vmatpush1.bf16.msra.mxu0 %v1015_v22 }
 0x485   :  { %1106 = vmatprep.subr.bf16.mxu0 %v1018_v39 }
 0x488   :  { %1107 = vmatpush1.bf16.msra.mxu0 %v1017_v23 }
 0x489   :  { %1108 = vmatprep.subr.bf16.mxu0 %v1020_v24 }
 0x48c   :  { %1109 = vmatpush1.bf16.msra.mxu0 %v1019_v26 }
 0x48d   :  { %1110 = vmatprep.subr.bf16.mxu0 %v1022_v29 }
 0x490   :  { %1111 = vmatpush1.bf16.msra.mxu0 %v1021_v30 }
 0x491   :  { %1112 = vmatprep.subr.bf16.mxu0 %v1024_v31 }
 0x494   :  { %1113 = vmatpush1.bf16.msra.mxu0 %v1023_v32 }
 0x495   :  { %1114 = vmatprep.subr.bf16.mxu0 %v1026_v33 }
 0x498   :  { %1115 = vmatpush1.bf16.msra.mxu0 %v1025_v35 }
 0x499   :  { %1116 = vmatprep.subr.bf16.mxu0 %v1028_v36 }
 0x49c   :  { %1117 = vmatpush1.bf16.msra.mxu0 %v1027_v37 }
 0x49d   :  { %1118 = vmatprep.subr.bf16.mxu0 %v1030_v38 }
 0x4a0   :  { %1119 = vmatpush1.bf16.msra.mxu0 %v1029_v57 }
 0x4a1   :  { %1120 = vmatprep.subr.bf16.mxu0 %v1032_v42 }
 0x4a4   :  { %1121 = vmatpush1.bf16.msra.mxu0 %v1031_v43 }
 0x4a5   :  { %1122 = vmatprep.subr.bf16.mxu0 %v1034_v44 }
 0x4a8   :  { %1123 = vmatpush1.bf16.msra.mxu0 %v1033_v45 }
 0x4a9   :  { %1124 = vmatprep.subr.bf16.mxu0 %v1036_v46 }
 0x4ac   :  { %1125 = vmatpush1.bf16.msra.mxu0 %v1035_v47 }
 0x4ad   :  { %1126 = vmatprep.subr.bf16.mxu0 %v1038_v48 }
 0x4b0   :  { %1127 = vmatpush1.bf16.msra.mxu0 %v1037_v49 }
 0x4b3   :  { %1129 = vmatmul.mubr.bf16.vlgmr.msra.gmra.mrb[8].mxu0 %v1042_v50 }
 0x4b4   :  { %2340 = shalt.err (!%p2337_p4)  }
 0x4b5   :  { %s2341_s0 = scalar_lea.vmem %s2583_s19, 1024  ;;  %s2345_s23 = scalar_lea.vmem %s2570_s22, 32768 }
 0x4b6   :  { %p2342_p5 = scmp.ne.s32.totalorder %s2583_s19, %s2341_s0  ;;  %p2346_p6 = scmp.lt.s32.totalorder %s2583_s19, %s2570_s22 }
 0x4b7   :  { %p2347_p7 = scmp.lt.s32.totalorder %s2345_s23, %s2341_s0 }
 0x4b9   :  { %p2348_p8 = por %p2347_p7, %p2346_p6 }
 0x4bb   :  { %p2349_p9 = pnand %p2348_p8, %p2342_p5 }
 0x4bd   :  { %2352 = shalt.err (!%p2349_p9)  }
 0x4be   :  { %s2442_s27 = smov 8   ;;  %v1039_v34 = vld [vmem:[#allocation7 + $0xa] sm:$0x3] }
 0x4bf   :  { %1147 = dma.hbm_to_vmem [thread:$0]  %s2931_s8, 1024, %s2583_s19, [#allocation3 + $0x1], %s2431_s17, %s2428_s29, %s2442_s27  ;;  %v1048_v51 = vrot.slane %v1039_v34, %v2631_v58  ;;  %v1052_v52 = vrot.slane %v1039_v34, %v2634_v59 }
 0x586   :  { %v1130_v53 = vpop.f32.mrb[8].mxu0 }
 0x587   :  { %v2233_v54 = vadd.f32 %v1130_v53, %v1048_v51  ;;  %v1132_v55 = vpop.f32.mrb[9].mxu0 }
 0x588   :  { %v2234_v56 = vadd.f32 %v1132_v55, %v1052_v52  ;;  %v1134_v60 = vpop.f32.mrb[10].mxu0 }
 0x589   :  { %vm1137_vm10 = vcmp.gt.f32.partialorder %v2233_v54, 0.0  ;;  %v1139_v61 = vmul.f32 0.2, %v2233_v54  ;;  %v1135_v62 = vpop.f32.mrb[11].mxu0 }
 0x58a   :  { %vm1138_vm11 = vcmp.gt.f32.partialorder %v2234_v56, 0.0  ;;  %v1140_v63 = vmul.f32 0.2, %v2234_v56 }
 0x58b   :  { %v1141_v0 = vsel %vm1137_vm10, %v2233_v54, %v1139_v61 }
 0x58c   :  { %v1142_v1 = vsel %vm1138_vm11, %v2234_v56, %v1140_v63 }
 0x58d   :  { %2409 = dma.done.wait [#allocation3], 2048 }
 0x58e   :  { %2410 = vsyncadd [#allocation3], 4294965248  ;;  %v1169_v2 = vpack.c.bf16 %v1142_v1, %v1142_v1  ;;  %v1159_v3 = vld [vmem:[#allocation2 + $0x100] sm:$0xff]  ;;  %s2353_s20 = scalar_lea.hbm %s2932_s9, 256 }
 0x58f   :  { %v1151_v4 = vld [vmem:[#allocation2] sm:$0xff]  ;;  %2143 = vmatprep.subr.bf16.mxu1 %v1159_v3  ;;  %p2354_p10 = scmp.ne.s32.totalorder %s2932_s9, %s2353_s20  ;;  %p2357_p11 = scmp.lt.u32.totalorder %s2353_s20, %s2932_s9 }
 0x590   :  { %1208 = vmatprep.mubr.bf16.mxu1 %v1169_v2  ;;  %v1160_v5 = vld [vmem:[#allocation2 + $0x120] sm:$0xff]  ;;  %2144 = vmatpush3.bf16.msra.mxu1 %v1151_v4 }
 0x591   :  { %v1152_v6 = vld [vmem:[#allocation2 + $0x20] sm:$0xff]  ;;  %2145 = vmatprep.subr.bf16.mxu1 %v1160_v5  ;;  %p2359_p12 = pnand %p2357_p11, %p2354_p10 }
 0x592   :  { %v1161_v7 = vld [vmem:[#allocation2 + $0x140] sm:$0xff] }
 0x593   :  { %v1153_v8 = vld [vmem:[#allocation2 + $0x40] sm:$0xff] }
 0x594   :  { %v1162_v9 = vld [vmem:[#allocation2 + $0x160] sm:$0xff]  ;;  %2146 = vmatpush3.bf16.msra.mxu1 %v1152_v6 }
 0x595   :  { %v1154_v10 = vld [vmem:[#allocation2 + $0x60] sm:$0xff] }
 0x596   :  { %v1163_v11 = vld [vmem:[#allocation2 + $0x180] sm:$0xff] }
 0x597   :  { %v1155_v12 = vld [vmem:[#allocation2 + $0x80] sm:$0xff] }
 0x598   :  { %v1164_v13 = vld [vmem:[#allocation2 + $0x1a0] sm:$0xff] }
 0x599   :  { %v1156_v25 = vld [vmem:[#allocation2 + $0xa0] sm:$0xff] }
 0x59a   :  { %v1165_v14 = vld [vmem:[#allocation2 + $0x1c0] sm:$0xff] }
 0x59b   :  { %v1157_v15 = vld [vmem:[#allocation2 + $0xc0] sm:$0xff] }
 0x59c   :  { %v1166_v16 = vld [vmem:[#allocation2 + $0x1e0] sm:$0xff] }
 0x59d   :  { %v1158_v17 = vld [vmem:[#allocation2 + $0xe0] sm:$0xff] }
 0x59e   :  { %2362 = shalt.err (!%p2359_p12)  }
 0x59f   :  { %s2363_s3 = scalar_lea.vmem %s2570_s22, 256  ;;  %p2368_p0 = scmp.lt.s32.totalorder %s2570_s22, %s2570_s22 }
 0x5a0   :  { %p2364_p13 = scmp.ne.s32.totalorder %s2570_s22, %s2363_s3  ;;  %p2369_p1 = scmp.lt.s32.totalorder %s2345_s23, %s2363_s3 }
 0x5a2   :  { %p2370_p2 = por %p2369_p1, %p2368_p0 }
 0x5a4   :  { %p2371_p3 = pnand %p2370_p2, %p2364_p13 }
 0x5a6   :  { %2374 = shalt.err (!%p2371_p3)  }
 0x5a7   :  { %1223 = dma.hbm_to_vmem [thread:$0]  %s2932_s9, 256, %s2570_s22, [#allocation3], %s2431_s17, %s2428_s29, %s2442_s27  ;;  %2147 = vmatprep.subr.bf16.mxu1 %v1161_v7  ;;  %v1168_v18 = vpack.c.bf16 %v1141_v0, %v1141_v0  ;;  %v2129_v19 = vld [vmem:[#allocation7 + $0xc] ss:$0 sm:$0xff] }
 0x5a8   :  { %2148 = vmatpush3.bf16.msra.mxu1 %v1153_v8 }
 0x5a9   :  { %2149 = vmatprep.subr.bf16.mxu1 %v1162_v9 }
 0x5ac   :  { %2150 = vmatpush3.bf16.msra.mxu1 %v1154_v10 }
 0x5ad   :  { %2151 = vmatprep.subr.bf16.mxu1 %v1163_v11 }
 0x5b0   :  { %2152 = vmatpush3.bf16.msra.mxu1 %v1155_v12 }
 0x5b1   :  { %2153 = vmatprep.subr.bf16.mxu1 %v1164_v13 }
 0x5b4   :  { %2154 = vmatpush3.bf16.msra.mxu1 %v1156_v25 }
 0x5b5   :  { %2155 = vmatprep.subr.bf16.mxu1 %v1165_v14 }
 0x5b8   :  { %2156 = vmatpush3.bf16.msra.mxu1 %v1157_v15 }
 0x5b9   :  { %2157 = vmatprep.subr.bf16.mxu1 %v1166_v16 }
 0x5bc   :  { %2158 = vmatpush3.bf16.msra.mxu1 %v1158_v17 }
 0x5bf   :  { %1209 = vmatmul.mubr.bf16.vlgmr.msra.gmra.mrb[12].mxu1 %v1168_v18 }
 0x692   :  { %v2159_v41 = vpop.f32.mrb[12].mxu1 }
 0x693   :  { %v2160_v20 = vpop.f32.mrb[13].mxu1 }
 0x694   :  { %v2161_v21 = vadd.f32 %v2160_v20, %v2159_v41  ;;  %v2162_v22 = vpop.f32.mrb[14].mxu1 }
 0x695   :  { %v2163_v39 = vpop.f32.mrb[15].mxu1 }
 0x696   :  { %v1211_v23 = vadd.f32 %v2161_v21, %v2129_v19 }
 0x698   :  { %vm1216_vm12 = vcmp.gt.f32.partialorder %v1211_v23, 0.0  ;;  %v1217_v24 = vmul.f32 0.2, %v1211_v23 }
 0x69a   :  { %v1218_v26 = vsel %vm1216_vm12, %v1211_v23, %v1217_v24 }
 0x69b   :  { %2411 = dma.done.wait [#allocation3 + $0x1], 1024 }
 0x69c   :  { %2412 = vsyncadd [#allocation3 + $0x1], 4294966272  ;;  %1311 = sst [smem:[#allocation22]] %s2427_s28  ;;  %v2443_v29 = vmov 0.0   ;;  %vm2444_vm13 = vmmov 0   ;;  %v1228_v30 = vld [vmem:[#allocation2 + $0x400] sm:$0xff]  ;;  %v1237_v42 = vpack.c.bf16 %v1218_v26, %v1218_v26 }
 0x69d   :  { %2199 = vmatprep.subr.bf16.mxu1 %v2443_v29  ;;  %2215 = vmatprep.mubr.msk.bf16.mxu1 %vm2444_vm13, %v2443_v29  ;;  %1313 = sst [smem:[#allocation22 + $0x1]] %s2428_s29  ;;  %v1229_v31 = vld [vmem:[#allocation2 + $0x420] sm:$0xff]  ;;  %s2445_s9 = smov 32   ;;  %v2130_v43 = vld [vmem:[#allocation7 + $0xd] ss:$0 sm:$0xff] }
 0x69e   :  { %1315 = sst [smem:[#allocation22 + $0x2]] %s2429_s30  ;;  %2200 = vmatpush3.bf16.msra.mxu1 %v1228_v30  ;;  %v1285_v32 = vld [vmem:[#allocation4] sm:$0xff]  ;;  %s2446_s2 = smov [#allocation21]  }
 0x69f   :  { %1317 = sst [smem:[#allocation22 + $0x3]] %s2430_s16  ;;  %2201 = vmatprep.subr.bf16.mxu1 %v2443_v29  ;;  %1287 = vrot.lane.b32.xlu0 %v1285_v32, %s2445_s9  ;;  %v1230_v33 = vld [vmem:[#allocation2 + $0x440] sm:$0xff]  ;;  %s2447_s20 = smov 96  }
 0x6a0   :  { %1319 = sst [smem:[#allocation22 + $0x4]] %s2431_s17  ;;  %v1231_v35 = vld [vmem:[#allocation2 + $0x460] sm:$0xff] }
 0x6a1   :  { %1321 = sst [smem:[#allocation22 + $0x5]] %s2429_s30  ;;  %v1232_v36 = vld [vmem:[#allocation2 + $0x480] sm:$0xff] }
 0x6a2   :  { %1323 = sst [smem:[#allocation22 + $0x6]] %s2431_s17  ;;  %2202 = vmatpush3.bf16.msra.mxu1 %v1229_v31  ;;  %v1233_v37 = vld [vmem:[#allocation2 + $0x4a0] sm:$0xff] }
 0x6a3   :  { %1325 = sst [smem:[#allocation22 + $0x7]] %s2430_s16  ;;  %2203 = vmatprep.subr.bf16.mxu1 %v2443_v29  ;;  %v1234_v38 = vld [vmem:[#allocation2 + $0x4c0] sm:$0xff] }
 0x6a4   :  { %1327 = sst [smem:[#allocation22 + $0x8]] %s2432_s18  ;;  %v1235_v57 = vld [vmem:[#allocation2 + $0x4e0] sm:$0xff] }
 0x6a6   :  { %2204 = vmatpush3.bf16.msra.mxu1 %v1230_v33 }
 0x6a7   :  { %2205 = vmatprep.subr.bf16.mxu1 %v2443_v29 }
 0x6aa   :  { %2206 = vmatpush3.bf16.msra.mxu1 %v1231_v35 }
 0x6ab   :  { %2207 = vmatprep.subr.bf16.mxu1 %v2443_v29 }
 0x6ae   :  { %2208 = vmatpush3.bf16.msra.mxu1 %v1232_v36 }
 0x6af   :  { %2209 = vmatprep.subr.bf16.mxu1 %v2443_v29 }
 0x6b2   :  { %2210 = vmatpush3.bf16.msra.mxu1 %v1233_v37 }
 0x6b3   :  { %2211 = vmatprep.subr.bf16.mxu1 %v2443_v29 }
 0x6b6   :  { %2212 = vmatpush3.bf16.msra.mxu1 %v1234_v38 }
 0x6b7   :  { %2213 = vmatprep.subr.bf16.mxu1 %v2443_v29 }
 0x6ba   :  { %2214 = vmatpush3.bf16.msra.mxu1 %v1235_v57 }
 0x6bd   :  { %2216 = vmatmul.mubr.bf16.vlgmr.msra.gmra.mrb[16].mxu1 %v1237_v42 }
 0x711   :  { %v1288_v45 = vpop.permute.xlu0 %1287 }
 0x790   :  { %v1278_v44 = vpop.f32.mrb[16].mxu1 }
 0x791   :  { %v1279_v46 = vadd.f32 %v2130_v43, %v1278_v44  ;;  %v2217_v47 = vpop.f32.mrb[17].mxu1 }
 0x792   :  { %v1281_v48 = vpop.f32.mrb[18].mxu1 }
 0x793   :  { %1284 = vst [vmem:[%s2938_s15] sm:$0xff] %v1279_v46  ;;  %v1290_v49 = vmul.f32 %v1288_v45, %v1279_v46  ;;  %v2218_v50 = vpop.f32.mrb[19].mxu1 }
 0x794   :  { %1329 = dma.general %s2933_s10, 2048, %s2583_s19, %s2437_s26, %s2446_s2, [#allocation22], %s2566_s21, 0  }
 0x795   :  { %1292 = vrot.lane.b32.xlu0 %v1290_v49, %s2447_s20 }
 0x807   :  { %v1293_v34 = vpop.permute.xlu0 %1292 }
 0x808   :  { %v1295_v51 = vadd.f32 %v1293_v34, %v1279_v46 }
 0x809   :  { %2413 = dma.done.wait [#allocation3], 256 }
 0x80a   :  { %2414 = vsyncadd [#allocation3], 4294967040  ;;  %2219 = vmatprep.subr.bf16.mxu1 %v2443_v29  ;;  %2223 = vmatprep.mubr.msk.bf16.mxu1 %vm2444_vm13, %v2443_v29  ;;  %1406 = sst [smem:[#allocation24]] %s2428_s29  ;;  %v1334_v52 = vld [vmem:[#allocation2] sm:$0xff]  ;;  %v1337_v54 = vpack.c.bf16 %v1295_v51, %v1295_v51  ;;  %vm1344_vm14 = vcmask 261120   ;;  %s2448_s10 = smov [#allocation23]  }
 0x80b   :  { %1408 = sst [smem:[#allocation24 + $0x1]] %s2428_s29  ;;  %2220 = vmatpush3.bf16.msra.mxu1 %v1334_v52  ;;  %v1335_v53 = vld [vmem:[#allocation2 + $0x20] sm:$0xff]  ;;  %v2133_v55 = vld [vmem:[#allocation7 + $0xe] ss:$0 sm:$0xff] }
 0x80c   :  { %1410 = sst [smem:[#allocation24 + $0x2]] %s2432_s18  ;;  %2221 = vmatprep.subr.bf16.mxu1 %v2443_v29 }
 0x80d   :  { %1412 = sst [smem:[#allocation24 + $0x3]] %s2430_s16 }
 0x80e   :  { %1414 = sst [smem:[#allocation24 + $0x4]] %s2431_s17 }
 0x80f   :  { %1416 = sst [smem:[#allocation24 + $0x5]] %s2429_s30  ;;  %2222 = vmatpush3.bf16.msra.mxu1 %v1335_v53 }
 0x810   :  { %1418 = sst [smem:[#allocation24 + $0x6]] %s2427_s28 }
 0x811   :  { %1420 = sst [smem:[#allocation24 + $0x7]] %s2430_s16 }
 0x812   :  { %1422 = sst [smem:[#allocation24 + $0x8]] %s2432_s18  ;;  %2224 = vmatmul.mubr.msk.bf16.vlgmr.msra.gmra.mrb[20].mxu1 %vm1344_vm14, %v1337_v54 }
 0x813   :  { %1424 = dma.general %s2934_s11, 8192, %s2570_s22, %s2941_s4, %s2448_s10, [#allocation24], %s2566_s21, 0  }
 0x8e5   :  { %v1382_v56 = vpop.f32.mrb[20].mxu1 }
 0x8e6   :  { %v1383_v60 = vadd.f32 %v2133_v55, %v1382_v56  ;;  %v2225_v61 = vpop.f32.mrb[21].mxu1 }
 0x8e7   :  { %v1385_v62 = vpop.f32.mrb[22].mxu1 }
 0x8e8   :  { %vm1388_vm15 = vcmp.gt.f32.partialorder %v1383_v60, 0.0  ;;  %v1389_v63 = vmul.f32 0.2, %v1383_v60  ;;  %v2226_v0 = vpop.f32.mrb[23].mxu1 }
 0x8ea   :  { %v1390_v1 = vsel %vm1388_vm15, %v1383_v60, %v1389_v63 }
 0x8eb   :  { %2415 = dma.done.wait [#allocation3 + $0x1], 2048 }
 0x8ec   :  { %2416 = vsyncadd [#allocation3 + $0x1], 4294965248  ;;  %1489 = vmatprep.mubr.bf16.mxu1 %v2439_v40  ;;  %1519 = sst [smem:[#allocation26]] %s2427_s28  ;;  %v1429_v2 = vld [vmem:[#allocation2 + $0x408] sm:$0xff]  ;;  %v1428_v3 = vld [vmem:[#allocation2 + $0x400] sm:$0xff]  ;;  %v1445_v16 = vpack.c.bf16 %v1390_v1, %v1390_v1  ;;  %s2449_s11 = smov [#allocation25]  }
 0x8ed   :  { %1521 = sst [smem:[#allocation26 + $0x1]] %s2428_s29  ;;  %v1431_v4 = vld [vmem:[#allocation2 + $0x428] sm:$0xff]  ;;  %1457 = vmatprep.subr.bf16.mxu1 %v1429_v2  ;;  %v1430_v40 = vld [vmem:[#allocation2 + $0x420] sm:$0xff]  ;;  %v1444_v17 = vld [vmem:[#allocation7 + $0xf] sm:$0x3] }
 0x8ee   :  { %1523 = sst [smem:[#allocation26 + $0x2]] %s2429_s30  ;;  %1458 = vmatpush1.bf16.msra.mxu1 %v1428_v3  ;;  %v1433_v5 = vld [vmem:[#allocation2 + $0x448] sm:$0xff]  ;;  %v1432_v6 = vld [vmem:[#allocation2 + $0x440] sm:$0xff]  ;;  %v1450_v18 = vrot.slane %v1444_v17, %v2631_v58  ;;  %v1454_v41 = vrot.slane %v1444_v17, %v2634_v59 }
 0x8ef   :  { %1525 = sst [smem:[#allocation26 + $0x3]] %s2430_s16  ;;  %1459 = vmatprep.subr.bf16.mxu1 %v1431_v4  ;;  %v1435_v7 = vld [vmem:[#allocation2 + $0x468] sm:$0xff]  ;;  %v1434_v8 = vld [vmem:[#allocation2 + $0x460] sm:$0xff] }
 0x8f0   :  { %1527 = sst [smem:[#allocation26 + $0x4]] %s2431_s17  ;;  %v1437_v9 = vld [vmem:[#allocation2 + $0x488] sm:$0xff]  ;;  %v1436_v10 = vld [vmem:[#allocation2 + $0x480] sm:$0xff] }
 0x8f1   :  { %1529 = sst [smem:[#allocation26 + $0x5]] %s2429_s30  ;;  %v1439_v11 = vld [vmem:[#allocation2 + $0x4a8] sm:$0xff]  ;;  %v1438_v12 = vld [vmem:[#allocation2 + $0x4a0] sm:$0xff] }
 0x8f2   :  { %1531 = sst [smem:[#allocation26 + $0x6]] %s2431_s17  ;;  %1460 = vmatpush1.bf16.msra.mxu1 %v1430_v40  ;;  %v1441_v13 = vld [vmem:[#allocation2 + $0x4c8] sm:$0xff]  ;;  %v1440_v25 = vld [vmem:[#allocation2 + $0x4c0] sm:$0xff] }
 0x8f3   :  { %1533 = sst [smem:[#allocation26 + $0x7]] %s2430_s16  ;;  %1461 = vmatprep.subr.bf16.mxu1 %v1433_v5  ;;  %v1443_v14 = vld [vmem:[#allocation2 + $0x4e8] sm:$0xff]  ;;  %v1442_v15 = vld [vmem:[#allocation2 + $0x4e0] sm:$0xff] }
 0x8f4   :  { %1535 = sst [smem:[#allocation26 + $0x8]] %s2432_s18 }
 0x8f5   :  { %1537 = dma.general %s2935_s12, 8192, %s2583_s19, %s2437_s26, %s2449_s11, [#allocation26], %s2566_s21, 0  }
 0x8f6   :  { %1462 = vmatpush1.bf16.msra.mxu1 %v1432_v6 }
 0x8f7   :  { %1463 = vmatprep.subr.bf16.mxu1 %v1435_v7 }
 0x8fa   :  { %1464 = vmatpush1.bf16.msra.mxu1 %v1434_v8 }
 0x8fb   :  { %1465 = vmatprep.subr.bf16.mxu1 %v1437_v9 }
 0x8fe   :  { %1466 = vmatpush1.bf16.msra.mxu1 %v1436_v10 }
 0x8ff   :  { %1467 = vmatprep.subr.bf16.mxu1 %v1439_v11 }
 0x902   :  { %1468 = vmatpush1.bf16.msra.mxu1 %v1438_v12 }
 0x903   :  { %1469 = vmatprep.subr.bf16.mxu1 %v1441_v13 }
 0x906   :  { %1470 = vmatpush1.bf16.msra.mxu1 %v1440_v25 }
 0x907   :  { %1471 = vmatprep.subr.bf16.mxu1 %v1443_v14 }
 0x90a   :  { %1472 = vmatpush1.bf16.msra.mxu1 %v1442_v15 }
 0x90d   :  { %1490 = vmatmul.mubr.bf16.vlgmr.msra.gmra.mrb[24].mxu1 %v1445_v16 }
 0x9e0   :  { %v1491_v19 = vpop.f32.mrb[24].mxu1 }
 0x9e1   :  { %v1492_v20 = vadd.f32 %v1491_v19, %v1450_v18  ;;  %v1493_v21 = vpop.f32.mrb[25].mxu1 }
 0x9e2   :  { %v1494_v22 = vadd.f32 %v1493_v21, %v1454_v41  ;;  %v1495_v39 = vpop.f32.mrb[26].mxu1 }
 0x9e3   :  { %vm1498_vm0 = vcmp.gt.f32.partialorder %v1492_v20, 0.0  ;;  %v1500_v23 = vmul.f32 0.2, %v1492_v20  ;;  %v1496_v24 = vpop.f32.mrb[27].mxu1 }
 0x9e4   :  { %vm1499_vm1 = vcmp.gt.f32.partialorder %v1494_v22, 0.0  ;;  %v1501_v26 = vmul.f32 0.2, %v1494_v22 }
 0x9e5   :  { %v2866_v29 = vsel %vm1498_vm0, %v1492_v20, %v1500_v23 }
 0x9e6   :  { %v1503_v30 = vsel %vm1499_vm1, %v1494_v22, %v1501_v26 }
 0x9e7   :  { %2417 = dma.done.wait [#allocation3], 8192 }
 0x9e8   :  { %2418 = vsyncadd [#allocation3], 4294959104  ;;  %v1606_v31 = vpack.c.bf16 %v1503_v30, %v1503_v30  ;;  %s2450_s12 = smov 384   ;;  %1739 = sst [smem:[#allocation28 + $0x1]] %s2428_s29  ;;  %v1541_v32 = vld [vmem:[#allocation2 + $0x8] sm:$0xff]  ;;  %v1543_v33 = vld [vmem:[#allocation2 + $0x18] sm:$0xff] }
 0x9e9   :  { %1737 = sst [smem:[#allocation28]] %s2450_s12  ;;  %s2451_s19 = smov 3   ;;  %v1540_v35 = vld [vmem:[#allocation2] sm:$0xff]  ;;  %1628 = vmatprep.subr.bf16.mxu0 %v1541_v32  ;;  %1669 = vmatprep.subr.bf16.mxu1 %v1543_v33  ;;  %v1542_v36 = vld [vmem:[#allocation2 + $0x10] sm:$0xff]  ;;  %v1545_v37 = vld [vmem:[#allocation2 + $0x28] sm:$0xff] }
 0x9ea   :  { %1660 = vmatprep.mubr.bf16.mxu0 %v1606_v31  ;;  %1701 = vmatprep.mubr.bf16.mxu1 %v1606_v31  ;;  %1741 = sst [smem:[#allocation28 + $0x2]] %s2451_s19  ;;  %s2452_s26 = smov 192   ;;  %v1547_v38 = vld [vmem:[#allocation2 + $0x38] sm:$0xff]  ;;  %v1544_v57 = vld [vmem:[#allocation2 + $0x20] sm:$0xff]  ;;  %v1546_v42 = vld [vmem:[#allocation2 + $0x30] sm:$0xff] }
 0x9eb   :  { %1743 = sst [smem:[#allocation28 + $0x3]] %s2430_s16  ;;  %1629 = vmatpush1.bf16.msra.mxu0 %v1540_v35  ;;  %1670 = vmatpush1.bf16.msra.mxu1 %v1542_v36  ;;  %v1549_v43 = vld [vmem:[#allocation2 + $0x48] sm:$0xff]  ;;  %v1551_v44 = vld [vmem:[#allocation2 + $0x58] sm:$0xff]  ;;  %v1548_v45 = vld [vmem:[#allocation2 + $0x40] sm:$0xff]  ;;  %s2453_s29 = smov [#allocation27]  }
 0x9ec   :  { %1745 = sst [smem:[#allocation28 + $0x4]] %s2431_s17  ;;  %1630 = vmatprep.subr.bf16.mxu0 %v1545_v37  ;;  %1671 = vmatprep.subr.bf16.mxu1 %v1547_v38  ;;  %v1550_v46 = vld [vmem:[#allocation2 + $0x50] sm:$0xff]  ;;  %v1553_v47 = vld [vmem:[#allocation2 + $0x68] sm:$0xff]  ;;  %v1555_v48 = vld [vmem:[#allocation2 + $0x78] sm:$0xff]  ;;  %v1605_v38 = vpack.c.bf16 %v2866_v29, %v2866_v29 }
 0x9ed   :  { %1747 = sst [smem:[#allocation28 + $0x5]] %s2429_s30  ;;  %v1552_v49 = vld [vmem:[#allocation2 + $0x60] sm:$0xff]  ;;  %v1554_v50 = vld [vmem:[#allocation2 + $0x70] sm:$0xff]  ;;  %v1557_v34 = vld [vmem:[#allocation2 + $0x88] sm:$0xff] }
 0x9ee   :  { %1749 = sst [smem:[#allocation28 + $0x6]] %s2452_s26  ;;  %v1559_v51 = vld [vmem:[#allocation2 + $0x98] sm:$0xff]  ;;  %v1556_v52 = vld [vmem:[#allocation2 + $0x80] sm:$0xff]  ;;  %v1558_v53 = vld [vmem:[#allocation2 + $0x90] sm:$0xff] }
 0x9ef   :  { %1751 = sst [smem:[#allocation28 + $0x7]] %s2430_s16  ;;  %1631 = vmatpush1.bf16.msra.mxu0 %v1544_v57  ;;  %1672 = vmatpush1.bf16.msra.mxu1 %v1546_v42  ;;  %v1561_v54 = vld [vmem:[#allocation2 + $0xa8] sm:$0xff]  ;;  %v1563_v55 = vld [vmem:[#allocation2 + $0xb8] sm:$0xff]  ;;  %v1560_v56 = vld [vmem:[#allocation2 + $0xa0] sm:$0xff] }
 0x9f0   :  { %1753 = sst [smem:[#allocation28 + $0x8]] %s2432_s18  ;;  %1632 = vmatprep.subr.bf16.mxu0 %v1549_v43  ;;  %1673 = vmatprep.subr.bf16.mxu1 %v1551_v44  ;;  %v1562_v60 = vld [vmem:[#allocation2 + $0xb0] sm:$0xff]  ;;  %v1565_v61 = vld [vmem:[#allocation2 + $0xc8] sm:$0xff]  ;;  %v1567_v62 = vld [vmem:[#allocation2 + $0xd8] sm:$0xff] }
 0x9f1   :  { %v1564_v63 = vld [vmem:[#allocation2 + $0xc0] sm:$0xff]  ;;  %v1566_v0 = vld [vmem:[#allocation2 + $0xd0] sm:$0xff]  ;;  %v1569_v1 = vld [vmem:[#allocation2 + $0xe8] sm:$0xff] }
 0x9f2   :  { %v1571_v2 = vld [vmem:[#allocation2 + $0xf8] sm:$0xff]  ;;  %v1568_v3 = vld [vmem:[#allocation2 + $0xe0] sm:$0xff]  ;;  %v1570_v4 = vld [vmem:[#allocation2 + $0xf0] sm:$0xff] }
 0x9f3   :  { %1633 = vmatpush1.bf16.msra.mxu0 %v1548_v45  ;;  %1674 = vmatpush1.bf16.msra.mxu1 %v1550_v46  ;;  %v1573_v40 = vld [vmem:[#allocation2 + $0x108] sm:$0xff]  ;;  %v1575_v5 = vld [vmem:[#allocation2 + $0x118] sm:$0xff]  ;;  %v1572_v6 = vld [vmem:[#allocation2 + $0x100] sm:$0xff] }
 0x9f4   :  { %1634 = vmatprep.subr.bf16.mxu0 %v1553_v47  ;;  %1675 = vmatprep.subr.bf16.mxu1 %v1555_v48  ;;  %v1574_v7 = vld [vmem:[#allocation2 + $0x110] sm:$0xff]  ;;  %v1577_v8 = vld [vmem:[#allocation2 + $0x128] sm:$0xff]  ;;  %v1579_v9 = vld [vmem:[#allocation2 + $0x138] sm:$0xff] }
 0x9f5   :  { %v1576_v10 = vld [vmem:[#allocation2 + $0x120] sm:$0xff]  ;;  %v1578_v11 = vld [vmem:[#allocation2 + $0x130] sm:$0xff]  ;;  %v1581_v12 = vld [vmem:[#allocation2 + $0x148] sm:$0xff] }
 0x9f6   :  { %v1583_v13 = vld [vmem:[#allocation2 + $0x158] sm:$0xff]  ;;  %v1580_v25 = vld [vmem:[#allocation2 + $0x140] sm:$0xff]  ;;  %v1582_v14 = vld [vmem:[#allocation2 + $0x150] sm:$0xff] }
 0x9f7   :  { %1635 = vmatpush1.bf16.msra.mxu0 %v1552_v49  ;;  %1676 = vmatpush1.bf16.msra.mxu1 %v1554_v50  ;;  %v1585_v15 = vld [vmem:[#allocation2 + $0x168] sm:$0xff]  ;;  %v1587_v16 = vld [vmem:[#allocation2 + $0x178] sm:$0xff]  ;;  %v1584_v17 = vld [vmem:[#allocation2 + $0x160] sm:$0xff] }
 0x9f8   :  { %1636 = vmatprep.subr.bf16.mxu0 %v1557_v34  ;;  %1677 = vmatprep.subr.bf16.mxu1 %v1559_v51  ;;  %v1586_v18 = vld [vmem:[#allocation2 + $0x170] sm:$0xff]  ;;  %v1589_v41 = vld [vmem:[#allocation2 + $0x188] sm:$0xff]  ;;  %v1591_v19 = vld [vmem:[#allocation2 + $0x198] sm:$0xff] }
 0x9f9   :  { %v1588_v20 = vld [vmem:[#allocation2 + $0x180] sm:$0xff]  ;;  %v1590_v21 = vld [vmem:[#allocation2 + $0x190] sm:$0xff]  ;;  %v1593_v22 = vld [vmem:[#allocation2 + $0x1a8] sm:$0xff] }
 0x9fa   :  { %v1595_v39 = vld [vmem:[#allocation2 + $0x1b8] sm:$0xff]  ;;  %v1592_v23 = vld [vmem:[#allocation2 + $0x1a0] sm:$0xff]  ;;  %v1594_v24 = vld [vmem:[#allocation2 + $0x1b0] sm:$0xff] }
 0x9fb   :  { %1637 = vmatpush1.bf16.msra.mxu0 %v1556_v52  ;;  %1678 = vmatpush1.bf16.msra.mxu1 %v1558_v53  ;;  %v1597_v26 = vld [vmem:[#allocation2 + $0x1c8] sm:$0xff]  ;;  %v1599_v30 = vld [vmem:[#allocation2 + $0x1d8] sm:$0xff]  ;;  %v1596_v31 = vld [vmem:[#allocation2 + $0x1c0] sm:$0xff] }
 0x9fc   :  { %1638 = vmatprep.subr.bf16.mxu0 %v1561_v54  ;;  %1679 = vmatprep.subr.bf16.mxu1 %v1563_v55  ;;  %v1598_v32 = vld [vmem:[#allocation2 + $0x1d0] sm:$0xff]  ;;  %v1601_v33 = vld [vmem:[#allocation2 + $0x1e8] sm:$0xff]  ;;  %v1603_v35 = vld [vmem:[#allocation2 + $0x1f8] sm:$0xff] }
 0x9fd   :  { %v1600_v36 = vld [vmem:[#allocation2 + $0x1e0] sm:$0xff]  ;;  %v1602_v37 = vld [vmem:[#allocation2 + $0x1f0] sm:$0xff]  ;;  %v1604_v57 = vld [vmem:[#allocation7 + $0x11] sm:$0xf] }
 0x9fe   :  { %1755 = dma.general %s2936_s13, 6144, %s2570_s22, %s2941_s4, %s2453_s29, [#allocation28], %s2566_s21, 0   ;;  %v1611_v42 = vrot.slane %v1604_v57, %v2631_v58  ;;  %v1619_v43 = vrot.slane %v1604_v57, %v2670_v27  ;;  %v1615_v44 = vrot.slane %v1604_v57, %v2634_v59  ;;  %v1623_v45 = vrot.slane %v1604_v57, %v2673_v28 }
 0x9ff   :  { %1639 = vmatpush1.bf16.msra.mxu0 %v1560_v56  ;;  %1680 = vmatpush1.bf16.msra.mxu1 %v1562_v60 }
 0xa00   :  { %1640 = vmatprep.subr.bf16.mxu0 %v1565_v61  ;;  %1681 = vmatprep.subr.bf16.mxu1 %v1567_v62 }
 0xa03   :  { %1641 = vmatpush1.bf16.msra.mxu0 %v1564_v63  ;;  %1682 = vmatpush1.bf16.msra.mxu1 %v1566_v0 }
 0xa04   :  { %1642 = vmatprep.subr.bf16.mxu0 %v1569_v1  ;;  %1683 = vmatprep.subr.bf16.mxu1 %v1571_v2 }
 0xa07   :  { %1643 = vmatpush1.bf16.msra.mxu0 %v1568_v3  ;;  %1684 = vmatpush1.bf16.msra.mxu1 %v1570_v4 }
 0xa08   :  { %1644 = vmatprep.subr.bf16.mxu0 %v1573_v40  ;;  %1685 = vmatprep.subr.bf16.mxu1 %v1575_v5 }
 0xa0b   :  { %1645 = vmatpush1.bf16.msra.mxu0 %v1572_v6  ;;  %1686 = vmatpush1.bf16.msra.mxu1 %v1574_v7 }
 0xa0c   :  { %1646 = vmatprep.subr.bf16.mxu0 %v1577_v8  ;;  %1687 = vmatprep.subr.bf16.mxu1 %v1579_v9 }
 0xa0f   :  { %1647 = vmatpush1.bf16.msra.mxu0 %v1576_v10  ;;  %1688 = vmatpush1.bf16.msra.mxu1 %v1578_v11 }
 0xa10   :  { %1648 = vmatprep.subr.bf16.mxu0 %v1581_v12  ;;  %1689 = vmatprep.subr.bf16.mxu1 %v1583_v13 }
 0xa13   :  { %1649 = vmatpush1.bf16.msra.mxu0 %v1580_v25  ;;  %1690 = vmatpush1.bf16.msra.mxu1 %v1582_v14 }
 0xa14   :  { %1650 = vmatprep.subr.bf16.mxu0 %v1585_v15  ;;  %1691 = vmatprep.subr.bf16.mxu1 %v1587_v16 }
 0xa17   :  { %1651 = vmatpush1.bf16.msra.mxu0 %v1584_v17  ;;  %1692 = vmatpush1.bf16.msra.mxu1 %v1586_v18 }
 0xa18   :  { %1652 = vmatprep.subr.bf16.mxu0 %v1589_v41  ;;  %1693 = vmatprep.subr.bf16.mxu1 %v1591_v19 }
 0xa1b   :  { %1653 = vmatpush1.bf16.msra.mxu0 %v1588_v20  ;;  %1694 = vmatpush1.bf16.msra.mxu1 %v1590_v21 }
 0xa1c   :  { %1654 = vmatprep.subr.bf16.mxu0 %v1593_v22  ;;  %1695 = vmatprep.subr.bf16.mxu1 %v1595_v39 }
 0xa1f   :  { %1655 = vmatpush1.bf16.msra.mxu0 %v1592_v23  ;;  %1696 = vmatpush1.bf16.msra.mxu1 %v1594_v24 }
 0xa20   :  { %1656 = vmatprep.subr.bf16.mxu0 %v1597_v26  ;;  %1697 = vmatprep.subr.bf16.mxu1 %v1599_v30 }
 0xa23   :  { %1657 = vmatpush1.bf16.msra.mxu0 %v1596_v31  ;;  %1698 = vmatpush1.bf16.msra.mxu1 %v1598_v32 }
 0xa24   :  { %1658 = vmatprep.subr.bf16.mxu0 %v1601_v33  ;;  %1699 = vmatprep.subr.bf16.mxu1 %v1603_v35 }
 0xa27   :  { %1659 = vmatpush1.bf16.msra.mxu0 %v1600_v36  ;;  %1700 = vmatpush1.bf16.msra.mxu1 %v1602_v37 }
 0xa2a   :  { %1661 = vmatmul.mubr.bf16.vlgmr.msra.gmra.mrb[12].mxu0 %v1605_v38  ;;  %1702 = vmatmul.mubr.bf16.vlgmr.msra.gmra.mrb[28].mxu1 %v1605_v38 }
 0xafd   :  { %v1662_v29 = vpop.f32.mrb[12].mxu0  ;;  %v1703_v46 = vpop.f32.mrb[28].mxu1 }
 0xafe   :  { %v1663_v47 = vadd.f32 %v1662_v29, %v1611_v42  ;;  %v1704_v48 = vadd.f32 %v1703_v46, %v1619_v43  ;;  %v1664_v49 = vpop.f32.mrb[13].mxu0  ;;  %v1705_v50 = vpop.f32.mrb[29].mxu1 }
 0xaff   :  { %v1665_v34 = vadd.f32 %v1664_v49, %v1615_v44  ;;  %v1706_v51 = vadd.f32 %v1705_v50, %v1623_v45  ;;  %v1666_v52 = vpop.f32.mrb[14].mxu0  ;;  %v1707_v53 = vpop.f32.mrb[30].mxu1 }
 0xb00   :  { %vm1710_vm2 = vcmp.gt.f32.partialorder %v1663_v47, 0.0  ;;  %v1714_v54 = vmul.f32 0.2, %v1663_v47  ;;  %vm1712_vm3 = vcmp.gt.f32.partialorder %v1704_v48, 0.0  ;;  %v1716_v55 = vmul.f32 0.2, %v1704_v48 }
 0xb01   :  { %vm1711_vm4 = vcmp.gt.f32.partialorder %v1665_v34, 0.0  ;;  %v1715_v56 = vmul.f32 0.2, %v1665_v34  ;;  %vm1713_vm5 = vcmp.gt.f32.partialorder %v1706_v51, 0.0  ;;  %v1717_v60 = vmul.f32 0.2, %v1706_v51 }
 0xb02   :  { %v2886_v61 = vsel %vm1710_vm2, %v1663_v47, %v1714_v54  ;;  %v2888_v28 = vsel %vm1712_vm3, %v1704_v48, %v1716_v55  ;;  %v1667_v62 = vpop.f32.mrb[15].mxu0  ;;  %v1708_v63 = vpop.f32.mrb[31].mxu1 }
 0xb03   :  { %v1719_v0 = vsel %vm1711_vm4, %v1665_v34, %v1715_v56  ;;  %v2890_v1 = vsel %vm1713_vm5, %v1706_v51, %v1717_v60 }
 0xb04   :  { %2419 = dma.done.wait [#allocation3 + $0x1], 8192 }
 0xb05   :  { %2420 = vsyncadd [#allocation3 + $0x1], 4294959104  ;;  %v1824_v2 = vpack.c.bf16 %v1719_v0, %v1719_v0  ;;  %v1759_v3 = vld [vmem:[#allocation2 + $0x408] sm:$0xff]  ;;  %v1758_v4 = vld [vmem:[#allocation2 + $0x400] sm:$0xff]  ;;  %v1823_v37 = vpack.c.bf16 %v2886_v61, %v2886_v61  ;;  %v1826_v38 = vpack.c.bf16 %v2890_v1, %v2890_v1 }
 0xb06   :  { %v1761_v40 = vld [vmem:[#allocation2 + $0x428] sm:$0xff]  ;;  %1838 = vmatprep.subr.bf16.mxu0 %v1759_v3  ;;  %v1760_v5 = vld [vmem:[#allocation2 + $0x420] sm:$0xff] }
 0xb07   :  { %1870 = vmatprep.mubr.bf16.mxu0 %v1824_v2  ;;  %1839 = vmatpush1.bf16.msra.mxu0 %v1758_v4  ;;  %v1763_v6 = vld [vmem:[#allocation2 + $0x448] sm:$0xff]  ;;  %v1762_v7 = vld [vmem:[#allocation2 + $0x440] sm:$0xff] }
 0xb08   :  { %1840 = vmatprep.subr.bf16.mxu0 %v1761_v40  ;;  %v1765_v8 = vld [vmem:[#allocation2 + $0x468] sm:$0xff]  ;;  %v1764_v9 = vld [vmem:[#allocation2 + $0x460] sm:$0xff] }
 0xb09   :  { %v1767_v10 = vld [vmem:[#allocation2 + $0x488] sm:$0xff]  ;;  %v1766_v11 = vld [vmem:[#allocation2 + $0x480] sm:$0xff] }
 0xb0a   :  { %v1769_v12 = vld [vmem:[#allocation2 + $0x4a8] sm:$0xff]  ;;  %v1768_v13 = vld [vmem:[#allocation2 + $0x4a0] sm:$0xff] }
 0xb0b   :  { %1841 = vmatpush1.bf16.msra.mxu0 %v1760_v5  ;;  %v1771_v25 = vld [vmem:[#allocation2 + $0x4c8] sm:$0xff]  ;;  %v1770_v14 = vld [vmem:[#allocation2 + $0x4c0] sm:$0xff] }
 0xb0c   :  { %1842 = vmatprep.subr.bf16.mxu0 %v1763_v6  ;;  %v1773_v15 = vld [vmem:[#allocation2 + $0x4e8] sm:$0xff]  ;;  %v1772_v16 = vld [vmem:[#allocation2 + $0x4e0] sm:$0xff] }
 0xb0d   :  { %v1775_v17 = vld [vmem:[#allocation2 + $0x508] sm:$0xff]  ;;  %v1774_v18 = vld [vmem:[#allocation2 + $0x500] sm:$0xff] }
 0xb0e   :  { %v1777_v41 = vld [vmem:[#allocation2 + $0x528] sm:$0xff]  ;;  %v1776_v19 = vld [vmem:[#allocation2 + $0x520] sm:$0xff] }
 0xb0f   :  { %1843 = vmatpush1.bf16.msra.mxu0 %v1762_v7  ;;  %v1779_v20 = vld [vmem:[#allocation2 + $0x548] sm:$0xff]  ;;  %v1778_v21 = vld [vmem:[#allocation2 + $0x540] sm:$0xff] }
 0xb10   :  { %1844 = vmatprep.subr.bf16.mxu0 %v1765_v8  ;;  %v1781_v22 = vld [vmem:[#allocation2 + $0x568] sm:$0xff]  ;;  %v1780_v39 = vld [vmem:[#allocation2 + $0x560] sm:$0xff]  ;;  %v1825_v8 = vpack.c.bf16 %v2888_v28, %v2888_v28 }
 0xb11   :  { %v1783_v23 = vld [vmem:[#allocation2 + $0x588] sm:$0xff]  ;;  %v1782_v24 = vld [vmem:[#allocation2 + $0x580] sm:$0xff] }
 0xb12   :  { %v1785_v26 = vld [vmem:[#allocation2 + $0x5a8] sm:$0xff]  ;;  %v1784_v30 = vld [vmem:[#allocation2 + $0x5a0] sm:$0xff] }
 0xb13   :  { %1845 = vmatpush1.bf16.msra.mxu0 %v1764_v9  ;;  %v1787_v31 = vld [vmem:[#allocation2 + $0x5c8] sm:$0xff]  ;;  %v1786_v32 = vld [vmem:[#allocation2 + $0x5c0] sm:$0xff]  ;;  %v1822_v9 = vld [vmem:[#allocation7 + $0x15] sm:$0x3] }
 0xb14   :  { %1846 = vmatprep.subr.bf16.mxu0 %v1767_v10  ;;  %v1789_v33 = vld [vmem:[#allocation2 + $0x5e8] sm:$0xff]  ;;  %v1788_v35 = vld [vmem:[#allocation2 + $0x5e0] sm:$0xff]  ;;  %v1831_v10 = vrot.slane %v1822_v9, %v2631_v58 }
 0xb15   :  { %v1791_v36 = vld [vmem:[#allocation2 + $0x608] sm:$0xff]  ;;  %v1790_v57 = vld [vmem:[#allocation2 + $0x600] sm:$0xff] }
 0xb16   :  { %v1793_v42 = vld [vmem:[#allocation2 + $0x628] sm:$0xff]  ;;  %v1792_v43 = vld [vmem:[#allocation2 + $0x620] sm:$0xff] }
 0xb17   :  { %1847 = vmatpush1.bf16.msra.mxu0 %v1766_v11  ;;  %v1795_v44 = vld [vmem:[#allocation2 + $0x648] sm:$0xff]  ;;  %v1794_v45 = vld [vmem:[#allocation2 + $0x640] sm:$0xff]  ;;  %v1835_v11 = vrot.slane %v1822_v9, %v2634_v59 }
 0xb18   :  { %1848 = vmatprep.subr.bf16.mxu0 %v1769_v12  ;;  %v1797_v29 = vld [vmem:[#allocation2 + $0x668] sm:$0xff]  ;;  %v1796_v46 = vld [vmem:[#allocation2 + $0x660] sm:$0xff] }
 0xb19   :  { %v1799_v47 = vld [vmem:[#allocation2 + $0x688] sm:$0xff]  ;;  %v1798_v48 = vld [vmem:[#allocation2 + $0x680] sm:$0xff] }
 0xb1a   :  { %v1801_v49 = vld [vmem:[#allocation2 + $0x6a8] sm:$0xff]  ;;  %v1800_v50 = vld [vmem:[#allocation2 + $0x6a0] sm:$0xff] }
 0xb1b   :  { %1849 = vmatpush1.bf16.msra.mxu0 %v1768_v13  ;;  %v1803_v34 = vld [vmem:[#allocation2 + $0x6c8] sm:$0xff]  ;;  %v1802_v51 = vld [vmem:[#allocation2 + $0x6c0] sm:$0xff] }
 0xb1c   :  { %1850 = vmatprep.subr.bf16.mxu0 %v1771_v25  ;;  %v1805_v52 = vld [vmem:[#allocation2 + $0x6e8] sm:$0xff]  ;;  %v1804_v53 = vld [vmem:[#allocation2 + $0x6e0] sm:$0xff] }
 0xb1d   :  { %v1807_v54 = vld [vmem:[#allocation2 + $0x708] sm:$0xff]  ;;  %v1806_v55 = vld [vmem:[#allocation2 + $0x700] sm:$0xff] }
 0xb1e   :  { %v1809_v56 = vld [vmem:[#allocation2 + $0x728] sm:$0xff]  ;;  %v1808_v60 = vld [vmem:[#allocation2 + $0x720] sm:$0xff] }
 0xb1f   :  { %1851 = vmatpush1.bf16.msra.mxu0 %v1770_v14  ;;  %v1811_v61 = vld [vmem:[#allocation2 + $0x748] sm:$0xff]  ;;  %v1810_v62 = vld [vmem:[#allocation2 + $0x740] sm:$0xff] }
 0xb20   :  { %1852 = vmatprep.subr.bf16.mxu0 %v1773_v15  ;;  %v1813_v63 = vld [vmem:[#allocation2 + $0x768] sm:$0xff]  ;;  %v1812_v0 = vld [vmem:[#allocation2 + $0x760] sm:$0xff] }
 0xb21   :  { %v1815_v1 = vld [vmem:[#allocation2 + $0x788] sm:$0xff]  ;;  %v1814_v2 = vld [vmem:[#allocation2 + $0x780] sm:$0xff] }
 0xb22   :  { %v1817_v3 = vld [vmem:[#allocation2 + $0x7a8] sm:$0xff]  ;;  %v1816_v4 = vld [vmem:[#allocation2 + $0x7a0] sm:$0xff] }
 0xb23   :  { %1853 = vmatpush1.bf16.msra.mxu0 %v1772_v16  ;;  %v1819_v40 = vld [vmem:[#allocation2 + $0x7c8] sm:$0xff]  ;;  %v1818_v5 = vld [vmem:[#allocation2 + $0x7c0] sm:$0xff] }
 0xb24   :  { %1854 = vmatprep.subr.bf16.mxu0 %v1775_v17  ;;  %v1821_v6 = vld [vmem:[#allocation2 + $0x7e8] sm:$0xff]  ;;  %v1820_v7 = vld [vmem:[#allocation2 + $0x7e0] sm:$0xff] }
 0xb27   :  { %1855 = vmatpush1.bf16.msra.mxu0 %v1774_v18 }
 0xb28   :  { %1856 = vmatprep.subr.bf16.mxu0 %v1777_v41 }
 0xb2b   :  { %1857 = vmatpush1.bf16.msra.mxu0 %v1776_v19 }
 0xb2c   :  { %1858 = vmatprep.subr.bf16.mxu0 %v1779_v20 }
 0xb2f   :  { %1859 = vmatpush1.bf16.msra.mxu0 %v1778_v21 }
 0xb30   :  { %1860 = vmatprep.subr.bf16.mxu0 %v1781_v22 }
 0xb33   :  { %1861 = vmatpush1.bf16.msra.mxu0 %v1780_v39 }
 0xb34   :  { %1862 = vmatprep.subr.bf16.mxu0 %v1783_v23 }
 0xb37   :  { %1863 = vmatpush1.bf16.msra.mxu0 %v1782_v24 }
 0xb38   :  { %1864 = vmatprep.subr.bf16.mxu0 %v1785_v26 }
 0xb3b   :  { %1865 = vmatpush1.bf16.msra.mxu0 %v1784_v30 }
 0xb3c   :  { %1866 = vmatprep.subr.bf16.mxu0 %v1787_v31 }
 0xb3f   :  { %1867 = vmatpush1.bf16.msra.mxu0 %v1786_v32 }
 0xb40   :  { %1868 = vmatprep.subr.bf16.mxu0 %v1789_v33 }
 0xb43   :  { %1869 = vmatpush1.bf16.msra.mxu0 %v1788_v35 }
 0xb44   :  { %1879 = vmatprep.subr.bf16.mxu0 %v1791_v36 }
 0xb46   :  { %1871 = vmatmul.mubr.bf16.vlgmr.msra.gmra.mrb[16].mxu0 %v1823_v37 }
 0xb47   :  { %1880 = vmatpush1.bf16.msra.mxu0 %v1790_v57  ;;  %1911 = vmatprep.mubr.bf16.mxu0 %v1826_v38 }
 0xb48   :  { %1881 = vmatprep.subr.bf16.mxu0 %v1793_v42 }
 0xb4b   :  { %1882 = vmatpush1.bf16.msra.mxu0 %v1792_v43 }
 0xb4c   :  { %1883 = vmatprep.subr.bf16.mxu0 %v1795_v44 }
 0xb4f   :  { %1884 = vmatpush1.bf16.msra.mxu0 %v1794_v45 }
 0xb50   :  { %1885 = vmatprep.subr.bf16.mxu0 %v1797_v29 }
 0xb53   :  { %1886 = vmatpush1.bf16.msra.mxu0 %v1796_v46 }
 0xb54   :  { %1887 = vmatprep.subr.bf16.mxu0 %v1799_v47 }
 0xb57   :  { %1888 = vmatpush1.bf16.msra.mxu0 %v1798_v48 }
 0xb58   :  { %1889 = vmatprep.subr.bf16.mxu0 %v1801_v49 }
 0xb5b   :  { %1890 = vmatpush1.bf16.msra.mxu0 %v1800_v50 }
 0xb5c   :  { %1891 = vmatprep.subr.bf16.mxu0 %v1803_v34 }
 0xb5f   :  { %1892 = vmatpush1.bf16.msra.mxu0 %v1802_v51 }
 0xb60   :  { %1893 = vmatprep.subr.bf16.mxu0 %v1805_v52 }
 0xb63   :  { %1894 = vmatpush1.bf16.msra.mxu0 %v1804_v53 }
 0xb64   :  { %1895 = vmatprep.subr.bf16.mxu0 %v1807_v54 }
 0xb67   :  { %1896 = vmatpush1.bf16.msra.mxu0 %v1806_v55 }
 0xb68   :  { %1897 = vmatprep.subr.bf16.mxu0 %v1809_v56 }
 0xb6b   :  { %1898 = vmatpush1.bf16.msra.mxu0 %v1808_v60 }
 0xb6c   :  { %1899 = vmatprep.subr.bf16.mxu0 %v1811_v61 }
 0xb6f   :  { %1900 = vmatpush1.bf16.msra.mxu0 %v1810_v62 }
 0xb70   :  { %1901 = vmatprep.subr.bf16.mxu0 %v1813_v63 }
 0xb73   :  { %1902 = vmatpush1.bf16.msra.mxu0 %v1812_v0 }
 0xb74   :  { %1903 = vmatprep.subr.bf16.mxu0 %v1815_v1 }
 0xb77   :  { %1904 = vmatpush1.bf16.msra.mxu0 %v1814_v2 }
 0xb78   :  { %1905 = vmatprep.subr.bf16.mxu0 %v1817_v3 }
 0xb7b   :  { %1906 = vmatpush1.bf16.msra.mxu0 %v1816_v4 }
 0xb7c   :  { %1907 = vmatprep.subr.bf16.mxu0 %v1819_v40 }
 0xb7f   :  { %1908 = vmatpush1.bf16.msra.mxu0 %v1818_v5 }
 0xb80   :  { %1909 = vmatprep.subr.bf16.mxu0 %v1821_v6 }
 0xb83   :  { %1910 = vmatpush1.bf16.msra.mxu0 %v1820_v7 }
 0xb86   :  { %1912 = vmatmul.mubr.bf16.vlgmr.msra.gmra.mrb[16].mxu0 %v1825_v8 }
 0xc59   :  { %v1913_v12 = vpop.f32.mrb[16].mxu0 }
 0xc5a   :  { %v2235_v13 = vadd.f32 %v1913_v12, %v1831_v10  ;;  %v1915_v25 = vpop.f32.mrb[17].mxu0 }
 0xc5b   :  { %v2236_v14 = vadd.f32 %v1915_v25, %v1835_v11  ;;  %v1917_v15 = vpop.f32.mrb[18].mxu0 }
 0xc5c   :  { %vm1920_vm6 = vcmp.gt.f32.partialorder %v2235_v13, 0.0  ;;  %v1922_v16 = vmul.f32 0.2, %v2235_v13  ;;  %v1918_v17 = vpop.f32.mrb[19].mxu0 }
 0xc5d   :  { %vm1921_vm7 = vcmp.gt.f32.partialorder %v2236_v14, 0.0  ;;  %v1923_v18 = vmul.f32 0.2, %v2236_v14 }
 0xc5e   :  { %v2900_v41 = vsel %vm1920_vm6, %v2235_v13, %v1922_v16 }
 0xc5f   :  { %v1925_v28 = vsel %vm1921_vm7, %v2236_v14, %v1923_v18 }
 0xc60   :  { %2421 = dma.done.wait [#allocation3], 6144 }
 0xc61   :  { %2422 = vsyncadd [#allocation3], 4294961152  ;;  %v2902_v19 = vpack.c.bf16 %v1925_v28, %v1925_v28  ;;  %v1930_v20 = vld [vmem:[#allocation2 + $0x8] sm:$0xff]  ;;  %v1929_v21 = vld [vmem:[#allocation2] sm:$0xff]  ;;  %v1978_v60 = vpack.c.bf16 %v2900_v41, %v2900_v41  ;;  %s2454_s13 = smov [#allocation9]  }
 0xc62   :  { %v1933_v22 = vld [vmem:[#allocation2 + $0x28] sm:$0xff]  ;;  %1996 = vmatprep.subr.bf16.mxu1 %v1930_v20  ;;  %v1932_v39 = vld [vmem:[#allocation2 + $0x20] sm:$0xff]  ;;  %v1955_v56 = vld [vmem:[#allocation2 + $0x110] sm:$0xff]  ;;  %s2086_s17 = sshll.u32 %s2454_s13, 4  ;;  %s2087_s17 = int_to_ptr.vmem [resolvable:$true] %s2086_s17 }
 0xc63   :  { %2028 = vmatprep.mubr.bf16.mxu1 %v2902_v19  ;;  %1997 = vmatpush1.bf16.msra.mxu1 %v1929_v21  ;;  %v1936_v23 = vld [vmem:[#allocation2 + $0x48] sm:$0xff]  ;;  %v1935_v24 = vld [vmem:[#allocation2 + $0x40] sm:$0xff]  ;;  %v1931_v61 = vld [vmem:[#allocation2 + $0x10] sm:$0xff]  ;;  %s2375_s21 = scalar_lea.vmem %s2087_s17, 384  ;;  %p2380_p5 = scmp.lt.s32.totalorder %s2087_s17, %s2087_s17 }
 0xc64   :  { %1998 = vmatprep.subr.bf16.mxu1 %v1933_v22  ;;  %v1939_v26 = vld [vmem:[#allocation2 + $0x68] sm:$0xff]  ;;  %v1938_v30 = vld [vmem:[#allocation2 + $0x60] sm:$0xff]  ;;  %v1958_v62 = vld [vmem:[#allocation2 + $0x130] sm:$0xff]  ;;  %p2376_p4 = scmp.ne.s32.totalorder %s2087_s17, %s2375_s21  ;;  %p2381_p6 = scmp.lt.s32.totalorder %s2375_s21, %s2375_s21 }
 0xc65   :  { %v1942_v31 = vld [vmem:[#allocation2 + $0x88] sm:$0xff]  ;;  %v1941_v32 = vld [vmem:[#allocation2 + $0x80] sm:$0xff]  ;;  %v1934_v63 = vld [vmem:[#allocation2 + $0x30] sm:$0xff] }
 0xc66   :  { %v1945_v33 = vld [vmem:[#allocation2 + $0xa8] sm:$0xff]  ;;  %v1944_v35 = vld [vmem:[#allocation2 + $0xa0] sm:$0xff]  ;;  %v1961_v0 = vld [vmem:[#allocation2 + $0x150] sm:$0xff]  ;;  %p2382_p7 = por %p2381_p6, %p2380_p5 }
 0xc67   :  { %1999 = vmatpush1.bf16.msra.mxu1 %v1932_v39  ;;  %v1948_v36 = vld [vmem:[#allocation2 + $0xc8] sm:$0xff]  ;;  %v1947_v37 = vld [vmem:[#allocation2 + $0xc0] sm:$0xff]  ;;  %v1937_v1 = vld [vmem:[#allocation2 + $0x50] sm:$0xff] }
 0xc68   :  { %2000 = vmatprep.subr.bf16.mxu1 %v1936_v23  ;;  %v1951_v38 = vld [vmem:[#allocation2 + $0xe8] sm:$0xff]  ;;  %v1950_v57 = vld [vmem:[#allocation2 + $0xe0] sm:$0xff]  ;;  %v1964_v2 = vld [vmem:[#allocation2 + $0x170] sm:$0xff]  ;;  %p2383_p8 = pnand %p2382_p7, %p2376_p4 }
 0xc69   :  { %v1954_v42 = vld [vmem:[#allocation2 + $0x108] sm:$0xff]  ;;  %v1953_v43 = vld [vmem:[#allocation2 + $0x100] sm:$0xff]  ;;  %v1940_v3 = vld [vmem:[#allocation2 + $0x70] sm:$0xff] }
 0xc6a   :  { %v1957_v44 = vld [vmem:[#allocation2 + $0x128] sm:$0xff]  ;;  %v1956_v45 = vld [vmem:[#allocation2 + $0x120] sm:$0xff]  ;;  %v1967_v4 = vld [vmem:[#allocation2 + $0x190] sm:$0xff] }
 0xc6b   :  { %2001 = vmatpush1.bf16.msra.mxu1 %v1935_v24  ;;  %v1960_v29 = vld [vmem:[#allocation2 + $0x148] sm:$0xff]  ;;  %v1959_v46 = vld [vmem:[#allocation2 + $0x140] sm:$0xff]  ;;  %v1943_v40 = vld [vmem:[#allocation2 + $0x90] sm:$0xff] }
 0xc6c   :  { %2002 = vmatprep.subr.bf16.mxu1 %v1939_v26  ;;  %v1963_v47 = vld [vmem:[#allocation2 + $0x168] sm:$0xff]  ;;  %v1962_v48 = vld [vmem:[#allocation2 + $0x160] sm:$0xff]  ;;  %v1970_v5 = vld [vmem:[#allocation2 + $0x1b0] sm:$0xff] }
 0xc6d   :  { %v1966_v49 = vld [vmem:[#allocation2 + $0x188] sm:$0xff]  ;;  %v1965_v50 = vld [vmem:[#allocation2 + $0x180] sm:$0xff]  ;;  %v1946_v6 = vld [vmem:[#allocation2 + $0xb0] sm:$0xff] }
 0xc6e   :  { %v1969_v34 = vld [vmem:[#allocation2 + $0x1a8] sm:$0xff]  ;;  %v1968_v51 = vld [vmem:[#allocation2 + $0x1a0] sm:$0xff]  ;;  %v1973_v7 = vld [vmem:[#allocation2 + $0x1d0] sm:$0xff] }
 0xc6f   :  { %2003 = vmatpush1.bf16.msra.mxu1 %v1938_v30  ;;  %v1972_v52 = vld [vmem:[#allocation2 + $0x1c8] sm:$0xff]  ;;  %v1971_v53 = vld [vmem:[#allocation2 + $0x1c0] sm:$0xff]  ;;  %v1949_v8 = vld [vmem:[#allocation2 + $0xd0] sm:$0xff] }
 0xc70   :  { %2004 = vmatprep.subr.bf16.mxu1 %v1942_v31  ;;  %v1975_v54 = vld [vmem:[#allocation2 + $0x1e8] sm:$0xff]  ;;  %v1974_v55 = vld [vmem:[#allocation2 + $0x1e0] sm:$0xff]  ;;  %v1976_v9 = vld [vmem:[#allocation2 + $0x1f0] sm:$0xff] }
 0xc71   :  { %v1952_v10 = vld [vmem:[#allocation2 + $0xf0] sm:$0xff]  ;;  %v1977_v11 = vld [vmem:[#allocation7 + $0x17] sm:$0x7] }
 0xc72   :  { %v1984_v12 = vrot.slane %v1977_v11, %v2631_v58  ;;  %v1988_v13 = vrot.slane %v1977_v11, %v2634_v59  ;;  %v1992_v28 = vrot.slane %v1977_v11, %v2670_v27 }
 0xc73   :  { %2005 = vmatpush1.bf16.msra.mxu1 %v1941_v32 }
 0xc74   :  { %2006 = vmatprep.subr.bf16.mxu1 %v1945_v33 }
 0xc77   :  { %2007 = vmatpush1.bf16.msra.mxu1 %v1944_v35 }
 0xc78   :  { %2008 = vmatprep.subr.bf16.mxu1 %v1948_v36 }
 0xc7b   :  { %2009 = vmatpush1.bf16.msra.mxu1 %v1947_v37 }
 0xc7c   :  { %2010 = vmatprep.subr.bf16.mxu1 %v1951_v38 }
 0xc7f   :  { %2011 = vmatpush1.bf16.msra.mxu1 %v1950_v57 }
 0xc80   :  { %2012 = vmatprep.subr.bf16.mxu1 %v1954_v42 }
 0xc83   :  { %2013 = vmatpush1.bf16.msra.mxu1 %v1953_v43 }
 0xc84   :  { %2014 = vmatprep.subr.bf16.mxu1 %v1957_v44 }
 0xc87   :  { %2015 = vmatpush1.bf16.msra.mxu1 %v1956_v45 }
 0xc88   :  { %2016 = vmatprep.subr.bf16.mxu1 %v1960_v29 }
 0xc8b   :  { %2017 = vmatpush1.bf16.msra.mxu1 %v1959_v46 }
 0xc8c   :  { %2018 = vmatprep.subr.bf16.mxu1 %v1963_v47 }
 0xc8f   :  { %2019 = vmatpush1.bf16.msra.mxu1 %v1962_v48 }
 0xc90   :  { %2020 = vmatprep.subr.bf16.mxu1 %v1966_v49 }
 0xc93   :  { %2021 = vmatpush1.bf16.msra.mxu1 %v1965_v50 }
 0xc94   :  { %2022 = vmatprep.subr.bf16.mxu1 %v1969_v34 }
 0xc97   :  { %2023 = vmatpush1.bf16.msra.mxu1 %v1968_v51 }
 0xc98   :  { %2024 = vmatprep.subr.bf16.mxu1 %v1972_v52 }
 0xc9b   :  { %2025 = vmatpush1.bf16.msra.mxu1 %v1971_v53 }
 0xc9c   :  { %2026 = vmatprep.subr.bf16.mxu1 %v1975_v54 }
 0xc9f   :  { %2027 = vmatpush1.bf16.msra.mxu1 %v1974_v55 }
 0xca0   :  { %2177 = vmatprep.subr.bf16.mxu1 %v1955_v56 }
 0xca2   :  { %2029 = vmatmul.mubr.bf16.vlgmr.msra.gmra.mrb[32].mxu1 %v1978_v60 }
 0xca3   :  { %2178 = vmatpush3.bf16.msra.mxu1 %v1931_v61  ;;  %2069 = vmatprep.mubr.bf16.mxu1 %v2902_v19 }
 0xca4   :  { %2179 = vmatprep.subr.bf16.mxu1 %v1958_v62 }
 0xca7   :  { %2180 = vmatpush3.bf16.msra.mxu1 %v1934_v63 }
 0xca8   :  { %2181 = vmatprep.subr.bf16.mxu1 %v1961_v0 }
 0xcab   :  { %2182 = vmatpush3.bf16.msra.mxu1 %v1937_v1 }
 0xcac   :  { %2183 = vmatprep.subr.bf16.mxu1 %v1964_v2 }
 0xcaf   :  { %2184 = vmatpush3.bf16.msra.mxu1 %v1940_v3 }
 0xcb0   :  { %2185 = vmatprep.subr.bf16.mxu1 %v1967_v4 }
 0xcb3   :  { %2186 = vmatpush3.bf16.msra.mxu1 %v1943_v40 }
 0xcb4   :  { %2187 = vmatprep.subr.bf16.mxu1 %v1970_v5 }
 0xcb7   :  { %2188 = vmatpush3.bf16.msra.mxu1 %v1946_v6 }
 0xcb8   :  { %2189 = vmatprep.subr.bf16.mxu1 %v1973_v7 }
 0xcbb   :  { %2190 = vmatpush3.bf16.msra.mxu1 %v1949_v8 }
 0xcbc   :  { %2191 = vmatprep.subr.bf16.mxu1 %v1976_v9 }
 0xcbf   :  { %2192 = vmatpush3.bf16.msra.mxu1 %v1952_v10 }
 0xcc2   :  { %2070 = vmatmul.mubr.bf16.vlgmr.msra.gmra.mrb[36].mxu1 %v1978_v60 }
 0xd75   :  { %v2030_v25 = vpop.f32.mrb[32].mxu1 }
 0xd76   :  { %v2031_v14 = vadd.f32 %v2030_v25, %v1984_v12  ;;  %v2032_v15 = vpop.f32.mrb[33].mxu1 }
 0xd77   :  { %v2033_v16 = vadd.f32 %v2032_v15, %v1988_v13  ;;  %v2034_v17 = vpop.f32.mrb[34].mxu1 }
 0xd78   :  { %2077 = vst [vmem:[#allocation9] sm:$0xff] %v2031_v14  ;;  %v2035_v18 = vpop.f32.mrb[35].mxu1 }
 0xd79   :  { %2078 = vst [vmem:[#allocation9 + $0x8] sm:$0xff] %v2033_v16 }
 0xd95   :  { %v2193_v41 = vpop.f32.mrb[36].mxu1 }
 0xd96   :  { %v2194_v19 = vpop.f32.mrb[37].mxu1 }
 0xd97   :  { %v2195_v20 = vadd.f32 %v2194_v19, %v2193_v41  ;;  %v2196_v21 = vpop.f32.mrb[38].mxu1 }
 0xd98   :  { %v2197_v22 = vpop.f32.mrb[39].mxu1 }
 0xd99   :  { %v2072_v58 = vadd.f32 %v2195_v20, %v1992_v28 }
 0xd9b   :  { %2079 = vst [vmem:[#allocation9 + $0x10] sm:$0xff] %v2072_v58 }
 0xd9c   :  { %2386 = shalt.err (!%p2383_p8)
}
 0xd9d   :  { %s2387_s4 = scalar_lea.hbm %s2937_s14, 384 }
 0xd9e   :  { %p2388_p9 = scmp.ne.s32.totalorder %s2937_s14, %s2387_s4  ;;  %p2391_p10 = scmp.lt.u32.totalorder %s2387_s4, %s2937_s14 }
 0xda0   :  { %p2393_p11 = pnand %p2391_p10, %p2388_p9 }
 0xda2   :  { %2396 = shalt.err (!%p2393_p11)
}
 0xda3   :  { %2089 = dma.vmem_to_hbm [thread:$0]  %s2087_s17, 384, %s2937_s14, [#allocation6]  }
 0xda4   :  { %2423 = dma.done.wait [#allocation6], 384  }
 0xda5   :  { %2424 = vsyncadd [#allocation6], 4294966912 }
 0xda6   :  { %2097 = vsyncpa [#allocation5], 1 }
 0xda7   :  { %2098 = vsyncpa [#allocation8], 1 }
 0xda8   :  { %2099 = vsyncpa [#allocation6], 1 }
 0xda9   :  { %2100 = vsyncmov [#allocation3] }
 0xdac   :  { %s2101_s23 = vpop.sfrf %2100 }
 0xdad   :  { %p2141_p12 = scmp.ne.s32.totalorder %s2101_s23, 0 }
 0xdaf   :  { %2105 = shalt.err (%p2141_p12)  }
 0xdb0   :  { %2107 = vsyncmov [#allocation3 + $0x1] }
 0xdb3   :  { %s2108_s27 = vpop.sfrf %2107 }
 0xdb4   :  { %p2142_p13 = scmp.ne.s32.totalorder %s2108_s27, 0 }
 0xdb6   :  { %2112 = shalt.err (%p2142_p13)  }

</bundles_post_ra>
